<compile_context>
chip_gen: v7x
topology: tpu7x:2x2x1
jax: 0.10.0
libtpu: 0.0.40
codegen_flags: <defaults>
</compile_context>

<pallas_src>
import functools
import math

import jax
import jax.numpy as jnp
from jax import lax
from jax.experimental import pallas as pl
from jax.experimental.pallas import tpu as pltpu


def _round_up(x, m):
    return (x + m - 1) // m * m


def _tpu_budgets():
    """Return (vmem_limit_bytes, tile_budget_bytes, two_tensorcores)."""
    vmem = None
    try:
        info = pltpu.get_tpu_info()
        for attr in ("vmem_capacity_bytes", "vmem_size_bytes", "vmem_bytes"):
            v = getattr(info, attr, None)
            if isinstance(v, int) and v > 0:
                vmem = v
                break
    except Exception:
        pass
    if vmem is None:
        vmem = 64 << 20  # conservative: v7x has 64 MiB VMEM per TensorCore

    kind = ""
    try:
        kind = jax.devices()[0].device_kind.lower()
    except Exception:
        pass
    two_tc = ("v7" in kind) or ("7x" in kind)

    # Scoped-VMEM headroom: ~48 MiB on v7x (64 MiB phys), ~96 MiB on v5e/v6e.
    vmem_limit = min(int(vmem * 3 // 4), 96 << 20)
    # Per grid step roughly: 2x double-buffered in tile + 2x out tile + ~3 f32
    # intermediates ~= 8x one tile.  Keep that at about half the scoped limit.
    tile_budget = max(2 << 20, min(8 << 20, vmem_limit // 16))
    return vmem_limit, tile_budget, two_tc


# --------------------- channels_last: normalize over last dim ---------------------

def _ln_last_kernel(x_ref, g_ref, b_ref, o_ref, *, eps):
    x = x_ref[...].astype(jnp.float32)                       # (tm, C)
    mean = jnp.mean(x, axis=-1, keepdims=True)
    xc = x - mean
    var = jnp.mean(xc * xc, axis=-1, keepdims=True)          # biased, matches torch
    inv = lax.rsqrt(var + eps)                               # EUP rsqrt
    y = xc * (g_ref[...].astype(jnp.float32) * inv) + b_ref[...].astype(jnp.float32)
    o_ref[...] = y.astype(o_ref.dtype)


def _ln_last_packed_kernel(x_ref, e_ref, g_ref, b_ref, o_ref, *, eps):
    # k rows are packed side-by-side on the lane axis (width k*C == 128).
    # E is block-diagonal with 1/C blocks, so x @ E is the per-segment mean
    # already broadcast back: reduce+broadcast on the (otherwise idle) MXU,
    # keeping every vector load/store a full unmasked 128-lane access.
    x = x_ref[...].astype(jnp.float32)                       # (tm, P)
    e = e_ref[...]                                           # (P, P) f32
    mean = jnp.dot(x, e, preferred_element_type=jnp.float32,
                   precision=lax.Precision.HIGHEST)
    xc = x - mean
    var = jnp.dot(xc * xc, e, preferred_element_type=jnp.float32,
                  precision=lax.Precision.HIGHEST)
    inv = lax.rsqrt(var + eps)
    y = xc * (g_ref[...].astype(jnp.float32) * inv) + b_ref[...].astype(jnp.float32)
    o_ref[...] = y.astype(o_ref.dtype)


def layernorm_channels_last(x, weight, bias, eps=1e-6):
    shape = x.shape
    C = shape[-1]
    M = int(math.prod(shape[:-1])) if len(shape) > 1 else 1

    itemsize = x.dtype.itemsize
    sub = max(8, 32 // itemsize)          # 8 rows f32, 16 bf16, 32 int8/fp8
    vmem_limit, tile_budget, two_tc = _tpu_budgets()

    # Lane-dense packing when C divides 128: view k consecutive rows as one
    # 128-lane row (free contiguous reshape).
    k = (128 // C) if (C < 128 and 128 % C == 0) else 1
    pack = k > 1 and M % k == 0 and M >= k

    if pack:
        P = k * C                                            # == 128
        rows = M // k
        x2 = x.reshape(rows, P)
        g2 = jnp.tile(weight.reshape(-1), k).reshape(1, P)
        b2 = jnp.tile(bias.reshape(-1), k).reshape(1, P)
        seg = jnp.arange(P, dtype=jnp.int32) // C
        e = (seg[:, None] == seg[None, :]).astype(jnp.float32) / float(C)
        kernel = functools.partial(_ln_last_packed_kernel, eps=eps)
        extra_inputs = (e,)
        extra_specs = [pl.BlockSpec((P, P), lambda i: (0, 0))]
        width = P
    else:
        rows = M
        x2 = x.reshape(rows, C)
        g2 = weight.reshape(1, C)
        b2 = bias.reshape(1, C)
        kernel = functools.partial(_ln_last_kernel, eps=eps)
        extra_inputs = ()
        extra_specs = []
        width = C

    # Byte-budgeted row tile (VMEM lanes pad to multiples of 128).
    row_bytes = _round_up(width, 128) * itemsize
    tm = max(sub, tile_budget // row_bytes // sub * sub)
    tm = min(tm, _round_up(rows, sub))
    if two_tc and rows > 2 * sub:
        # Only on 2-TensorCore chips: keep >=2 grid steps so both cores work.
        while tm >= rows and tm > sub:
            tm = _round_up(tm // 2, sub)
    grid = (pl.cdiv(rows, tm),)

    out = pl.pallas_call(
        kernel,
        out_shape=jax.ShapeDtypeStruct((rows, width), x.dtype),
        grid=grid,
        in_specs=[pl.BlockSpec((tm, width), lambda i: (i, 0))]
                + extra_specs
                + [pl.BlockSpec((1, width), lambda i: (0, 0)),
                   pl.BlockSpec((1, width), lambda i: (0, 0))],
        out_specs=pl.BlockSpec((tm, width), lambda i: (i, 0)),
        compiler_params=pltpu.CompilerParams(
            dimension_semantics=("parallel",),
            vmem_limit_bytes=vmem_limit),
    )(x2, *extra_inputs, g2, b2)

    return out.reshape(shape)


# --------------------- channels_first: normalize over dim 1 ---------------------

def _ln_first_kernel(x_ref, g_ref, b_ref, o_ref, *, eps):
    x = x_ref[...].astype(jnp.float32)                       # (tb, C, ts)
    mean = jnp.mean(x, axis=1, keepdims=True)                # sublane reduce (XLU)
    xc = x - mean
    var = jnp.mean(xc * xc, axis=1, keepdims=True)
    inv = lax.rsqrt(var + eps)
    y = xc * (g_ref[...].astype(jnp.float32) * inv) + b_ref[...].astype(jnp.float32)
    o_ref[...] = y.astype(o_ref.dtype)                       # lane-dense store


def layernorm_channels_first(x, weight, bias, eps=1e-6):
    shape = x.shape
    B, C = shape[0], shape[1]
    S = int(math.prod(shape[2:])) if len(shape) > 2 else 1
    x3 = x.reshape(B, C, S)

    itemsize = x.dtype.itemsize
    vmem_limit, tile_budget, _ = _tpu_budgets()

    # Spatial sits on the lane axis -> wide, unmasked vector stores.
    per_col_bytes = _round_up(C, 8) * itemsize               # one lane column
    max_lanes = max(128, tile_budget // per_col_bytes // 128 * 128)

    if S <= max_lanes:
        ts = S                                               # full dim: exempt from 128 rule
        per_batch_bytes = per_col_bytes * _round_up(S, 128)
        tb = max(1, min(B, tile_budget // max(1, per_batch_bytes)))
        grid = (pl.cdiv(B, tb),)
        x_spec = pl.BlockSpec((tb, C, ts), lambda i: (i, 0, 0))
        o_spec = pl.BlockSpec((tb, C, ts), lambda i: (i, 0, 0))
        gb_spec = pl.BlockSpec((1, C, 1), lambda i: (0, 0, 0))
        dims = ("parallel",)
    else:
        ts = max_lanes                                       # multiple of 128
        grid = (B, pl.cdiv(S, ts))
        x_spec = pl.BlockSpec((1, C, ts), lambda b, j: (b, 0, j))
        o_spec = pl.BlockSpec((1, C, ts), lambda b, j: (b, 0, j))
        gb_spec = pl.BlockSpec((1, C, 1), lambda b, j: (0, 0, 0))
        dims = ("parallel", "parallel")

    out = pl.pallas_call(
        functools.partial(_ln_first_kernel, eps=eps),
        out_shape=jax.ShapeDtypeStruct((B, C, S), x.dtype),
        grid=grid,
        in_specs=[x_spec, gb_spec, gb_spec],
        out_specs=o_spec,
        compiler_params=pltpu.CompilerParams(
            dimension_semantics=dims,
            vmem_limit_bytes=vmem_limit),
    )(x3, weight.reshape(1, C, 1), bias.reshape(1, C, 1))

    return out.reshape(shape)


def layer_norm(x, weight, bias, eps=1e-6, data_format="channels_last"):
    """Forward pass of the reference LayerNorm module (eps default 1e-6)."""
    if data_format == "channels_last":
        return layernorm_channels_last(x, weight, bias, eps)
    elif data_format == "channels_first":
        return layernorm_channels_first(x, weight, bias, eps)
    raise NotImplementedError


# ------------------------------ pure-JAX references ------------------------------

def _ref_channels_last(x, g, b, eps):
    x = x.astype(jnp.float32)
    mean = jnp.mean(x, axis=-1, keepdims=True)
    var = jnp.mean((x - mean) ** 2, axis=-1, keepdims=True)
    return (x - mean) / jnp.sqrt(var + eps) * g + b


def _ref_channels_first(x, g, b, eps):
    x = x.astype(jnp.float32)
    u = jnp.mean(x, axis=1, keepdims=True)
    s = jnp.mean((x - u) ** 2, axis=1, keepdims=True)
    xh = (x - u) / jnp.sqrt(s + eps)
    bshape = (1, x.shape[1]) + (1,) * (x.ndim - 2)
    return g.reshape(bshape) * xh + b.reshape(bshape)


# --------------------------------------- main ---------------------------------------

if __name__ == "__main__":
    key = jax.random.PRNGKey(0)
    keys = jax.random.split(key, 10)
    eps = 1e-6

    # ---- channels_last: (B, D, H, W, C), C=64 -> lane-dense packed path ----
    B, D, H, W, C = 2, 8, 8, 8, 64
    x_last = jax.random.normal(keys[0], (B, D, H, W, C), dtype=jnp.float32)
    g_last = 1.0 + 0.1 * jax.random.normal(keys[1], (C,), dtype=jnp.float32)
    b_last = 0.1 * jax.random.normal(keys[2], (C,), dtype=jnp.float32)

    y_last = layer_norm(x_last, g_last, b_last, eps, "channels_last")
    jax.block_until_ready(y_last)
    ref_last = _ref_channels_last(x_last, g_last, b_last, eps)
    assert jnp.allclose(y_last, ref_last, atol=1e-4, rtol=1e-4), (
        float(jnp.max(jnp.abs(y_last - ref_last))))

    # ---- channels_last with awkward (non-tile-multiple) rows and C=48 ----
    x_odd = jax.random.normal(keys[3], (3, 5, 7, 48), dtype=jnp.float32)
    g_odd = 1.0 + 0.1 * jax.random.normal(keys[4], (48,), dtype=jnp.float32)
    b_odd = 0.1 * jax.random.normal(keys[5], (48,), dtype=jnp.float32)
    y_odd = layer_norm(x_odd, g_odd, b_odd, eps, "channels_last")
    jax.block_until_ready(y_odd)
    ref_odd = _ref_channels_last(x_odd, g_odd, b_odd, eps)
    assert jnp.allclose(y_odd, ref_odd, atol=1e-4, rtol=1e-4), (
        float(jnp.max(jnp.abs(y_odd - ref_odd))))

    # ---- channels_first: (B, C, D, H, W) ----
    Cf = 32
    x_first = jax.random.normal(keys[6], (2, Cf, 8, 8, 8), dtype=jnp.float32)
    g_first = 1.0 + 0.1 * jax.random.normal(keys[7], (Cf,), dtype=jnp.float32)
    b_first = 0.1 * jax.random.normal(keys[8], (Cf,), dtype=jnp.float32)

    y_first = layer_norm(x_first, g_first, b_first, eps, "channels_first")
    jax.block_until_ready(y_first)
    ref_first = _ref_channels_first(x_first, g_first, b_first, eps)
    assert jnp.allclose(y_first, ref_first, atol=1e-4, rtol=1e-4), (
        float(jnp.max(jnp.abs(y_first - ref_first))))

    # ---- bf16 activation carry (stats still f32 in-kernel) ----
    x_bf16 = x_last.astype(jnp.bfloat16)
    y_bf16 = layer_norm(x_bf16, g_last, b_last, eps, "channels_last")
    jax.block_until_ready(y_bf16)
    ref_bf16 = _ref_channels_last(x_bf16.astype(jnp.float32), g_last, b_last, eps)
    assert jnp.allclose(y_bf16.astype(jnp.float32), ref_bf16, atol=5e-2, rtol=5e-2), (
        float(jnp.max(jnp.abs(y_bf16.astype(jnp.float32) - ref_bf16))))

    print("KERNEL_OK")
</pallas_src>

<mosaic_0001>
module attributes {stable_mosaic.version = 11 : i64} {
  func.func @_ln_last_packed_kernel(%arg0: i32, %arg1: memref<512x128xf32, #tpu.memory_space<vmem>>, %arg2: memref<128x128xf32, #tpu.memory_space<vmem>>, %arg3: memref<1x128xf32, #tpu.memory_space<vmem>>, %arg4: memref<1x128xf32, #tpu.memory_space<vmem>>, %arg5: memref<512x128xf32, #tpu.memory_space<vmem>>) attributes {dimension_semantics = [#tpu.dimension_semantics<parallel>], iteration_bounds = array<i64: 1>, scalar_prefetch = 0 : i64, scratch_operands = 0 : i64, tpu.core_type = #tpu.core_type<tc>, window_params = [{transform_indices = @transform_0, window_bounds = array<i64: 512, 128>}, {pipeline_mode = #tpu.pipeline_mode<synchronous>, transform_indices = @transform_1, window_bounds = array<i64: 128, 128>}, {pipeline_mode = #tpu.pipeline_mode<synchronous>, transform_indices = @transform_2, window_bounds = array<i64: 1, 128>}, {pipeline_mode = #tpu.pipeline_mode<synchronous>, transform_indices = @transform_3, window_bounds = array<i64: 1, 128>}, {transform_indices = @transform_4, window_bounds = array<i64: 512, 128>}]} {
    %c0 = arith.constant 0 : index
    %c0_0 = arith.constant 0 : index
    %0 = vector.load %arg1[%c0, %c0_0] : memref<512x128xf32, #tpu.memory_space<vmem>>, vector<512x128xf32>
    %c0_1 = arith.constant 0 : index
    %c0_2 = arith.constant 0 : index
    %1 = vector.load %arg2[%c0_1, %c0_2] : memref<128x128xf32, #tpu.memory_space<vmem>>, vector<128x128xf32>
    %cst = arith.constant dense<0.000000e+00> : vector<512x128xf32>
    %2 = tpu.matmul %0, %1, %cst {dimension_numbers = #tpu.dot_dimension_numbers<[1], [0], [0], [1], [0, 0, 1, 1], [], []>, precision = #tpu.contract_precision<fp32>} : vector<512x128xf32>, vector<128x128xf32>, vector<512x128xf32> -> vector<512x128xf32>
    %3 = arith.subf %0, %2 : vector<512x128xf32>
    %4 = arith.mulf %3, %3 : vector<512x128xf32>
    %cst_3 = arith.constant dense<0.000000e+00> : vector<512x128xf32>
    %5 = tpu.matmul %4, %1, %cst_3 {dimension_numbers = #tpu.dot_dimension_numbers<[1], [0], [0], [1], [0, 0, 1, 1], [], []>, precision = #tpu.contract_precision<fp32>} : vector<512x128xf32>, vector<128x128xf32>, vector<512x128xf32> -> vector<512x128xf32>
    %cst_4 = arith.constant 9.99999997E-7 : f32
    %6 = vector.broadcast %cst_4 : f32 to vector<512x128xf32>
    %7 = arith.addf %5, %6 : vector<512x128xf32>
    %8 = math.rsqrt %7 : vector<512x128xf32>
    %c0_5 = arith.constant 0 : index
    %c0_6 = arith.constant 0 : index
    %9 = vector.load %arg3[%c0_5, %c0_6] : memref<1x128xf32, #tpu.memory_space<vmem>>, vector<1x128xf32>
    %10 = vector.broadcast %9 : vector<1x128xf32> to vector<512x128xf32>
    %11 = arith.mulf %10, %8 : vector<512x128xf32>
    %12 = arith.mulf %3, %11 : vector<512x128xf32>
    %c0_7 = arith.constant 0 : index
    %c0_8 = arith.constant 0 : index
    %13 = vector.load %arg4[%c0_7, %c0_8] : memref<1x128xf32, #tpu.memory_space<vmem>>, vector<1x128xf32>
    %14 = vector.broadcast %13 : vector<1x128xf32> to vector<512x128xf32>
    %15 = arith.addf %12, %14 : vector<512x128xf32>
    %c0_9 = arith.constant 0 : index
    %c0_10 = arith.constant 0 : index
    %16 = vector.load %arg5[%c0_9, %c0_10] : memref<512x128xf32, #tpu.memory_space<vmem>>, vector<512x128xf32>
    tpu.vector_store %arg5[%c0_9, %c0_10], %15 {strides = array<i32>} : memref<512x128xf32, #tpu.memory_space<vmem>>, vector<512x128xf32>,
    return
  }
  func.func @transform_0(%arg0: i32) -> (i32, i32) {
    %c0_i32 = arith.constant 0 : i32
    %c0_i32_0 = arith.constant 0 : i32
    return %arg0, %c0_i32 : i32, i32
  }
  func.func @transform_1(%arg0: i32) -> (i32, i32) {
    %c0_i32 = arith.constant 0 : i32
    %c0_i32_0 = arith.constant 0 : i32
    %c0_i32_1 = arith.constant 0 : i32
    return %c0_i32, %c0_i32_0 : i32, i32
  }
  func.func @transform_2(%arg0: i32) -> (i32, i32) {
    %c0_i32 = arith.constant 0 : i32
    %c0_i32_0 = arith.constant 0 : i32
    %c0_i32_1 = arith.constant 0 : i32
    return %c0_i32, %c0_i32_0 : i32, i32
  }
  func.func @transform_3(%arg0: i32) -> (i32, i32) {
    %c0_i32 = arith.constant 0 : i32
    %c0_i32_0 = arith.constant 0 : i32
    %c0_i32_1 = arith.constant 0 : i32
    return %c0_i32, %c0_i32_0 : i32, i32
  }
  func.func @transform_4(%arg0: i32) -> (i32, i32) {
    %c0_i32 = arith.constant 0 : i32
    %c0_i32_0 = arith.constant 0 : i32
    return %arg0, %c0_i32 : i32, i32
  }
}

</mosaic_0001>

<bundles_post_ra>
// kernel: tpu_custom_call.1
= control target key start
LH: loop header
LB: loop body
LE: loop exit
PB: predicated region body
PF: predicated region fallthrough
CT: control target
= control target key end

     0   :  { %9 = vsyncpa [#allocation3], 0  ;;  %s14126_s0 = inlined_call_operand.hbm [shape: f32[512,128], index: 0, kind: input, shape index: {}]   ;;  %s14127_s1 = inlined_call_operand.hbm [shape: f32[128,128], index: 1, kind: input, shape index: {}]   ;;  %s14128_s2 = inlined_call_operand.vmem [shape: f32[1,128], index: 2, kind: input, shape index: {}]   ;;  %s14129_s3 = inlined_call_operand.vmem [shape: f32[1,128], index: 3, kind: input, shape index: {}]   ;;  %s14130_s4 = inlined_call_operand.hbm [shape: f32[512,128], index: 4, kind: output, shape index: {}]  }
   0x1   :  { %10 = vsyncpa [#allocation6], 0 }
   0x2   :  { %11 = vsyncpa [#allocation4], 0  ;;  %s11161_s15 = smov [#allocation2]   ;;  %s11089_s19 = scalar_lea.hbm %s14126_s0, 8192 }
   0x3   :  { %s17_s16 = sshll.u32 %s11161_s15, 4  ;;  %p11090_p0 = scmp.ne.s32.totalorder %s14126_s0, %s11089_s19  ;;  %s18_s16 = int_to_ptr.vmem [resolvable:$true] %s17_s16 }
   0x4   :  { %p11093_p1 = scmp.lt.u32.totalorder %s11089_s19, %s14126_s0 }
   0x6   :  { %p11095_p2 = pnand %p11093_p1, %p11090_p0 }
   0x8   :  { %11098 = shalt.err (!%p11095_p2)
}
   0x9   :  { %s11099_s24 = scalar_lea.vmem %s18_s16, 8192  ;;  %p11104_p4 = scmp.lt.s32.totalorder %s18_s16, %s18_s16 }
   0xa   :  { %p11100_p3 = scmp.ne.s32.totalorder %s18_s16, %s11099_s24  ;;  %p11105_p5 = scmp.lt.s32.totalorder %s11099_s24, %s11099_s24 }
   0xc   :  { %p11106_p6 = por %p11105_p5, %p11104_p4 }
   0xe   :  { %p11107_p7 = pnand %p11106_p6, %p11100_p3 }
  0x10   :  { %11110 = shalt.err (!%p11107_p7)
}
  0x11   :  { %s11162_s25 = smov 128   ;;  %s11163_s26 = smov 8  }
  0x12   :  { %23 = dma.hbm_to_vmem [thread:$0]  %s14126_s0, 8192, %s18_s16, [#allocation3], %s11162_s25, %s11162_s25, %s11163_s26  }
  0x13   :  { %s11164_s29 = smov [#allocation5]   ;;  %s11111_s7 = scalar_lea.hbm %s14127_s1, 2048 }
  0x14   :  { %s29_s30 = sshll.u32 %s11164_s29, 4  ;;  %p11112_p8 = scmp.ne.s32.totalorder %s14127_s1, %s11111_s7  ;;  %s30_s30 = int_to_ptr.vmem [resolvable:$true] %s29_s30 }
  0x15   :  { %p11115_p9 = scmp.lt.u32.totalorder %s11111_s7, %s14127_s1 }
  0x17   :  { %p11117_p10 = pnand %p11115_p9, %p11112_p8 }
  0x19   :  { %11120 = shalt.err (!%p11117_p10)
}
  0x1a   :  { %s11121_s12 = scalar_lea.vmem %s30_s30, 2048  ;;  %p11126_p12 = scmp.lt.s32.totalorder %s30_s30, %s30_s30 }
  0x1b   :  { %p11122_p11 = scmp.ne.s32.totalorder %s30_s30, %s11121_s12  ;;  %p11127_p13 = scmp.lt.s32.totalorder %s11121_s12, %s11121_s12 }
  0x1d   :  { %p11128_p0 = por %p11127_p13, %p11126_p12 }
  0x1f   :  { %p11129_p1 = pnand %p11128_p0, %p11122_p11 }
  0x21   :  { %11132 = shalt.err (!%p11129_p1)
}
  0x22   :  { %35 = dma.hbm_to_vmem [thread:$0]  %s14127_s1, 2048, %s30_s30, [#allocation6], %s11162_s25, %s11162_s25, %s11163_s26  }
  0x23   :  { %11155 = dma.done.wait [#allocation3], 8192  }
  0x24   :  { %11156 = vsyncadd [#allocation3], 4294959104 }
  0x25   :  { %11157 = dma.done.wait [#allocation6], 2048  }
  0x26   :  { %11158 = vsyncadd [#allocation6], 4294965248  ;;  %v110_v0 = vld [vmem:[#allocation5] sm:$0xff]  ;;  %v111_v1 = vld [vmem:[#allocation5 + $0x8] sm:$0xff] }
  0x27   :  { %v11221_v2 = vld [vmem:[#allocation5 + $0x10] sm:$0xff]  ;;  %v127_v3 = vand.u32 4294901760, %v110_v0  ;;  %v130_v4 = vand.u32 4294901760, %v111_v1  ;;  %v11223_v5 = vld [vmem:[#allocation5 + $0x18] sm:$0xff]  ;;  %v11226_v7 = vld [vmem:[#allocation5 + $0x20] sm:$0xff] }
  0x28   :  { %v133_v6 = vand.u32 4294901760, %v11221_v2  ;;  %v11228_v8 = vld [vmem:[#allocation5 + $0x28] sm:$0xff]  ;;  %v136_v9 = vand.u32 4294901760, %v11223_v5  ;;  %v139_v11 = vand.u32 4294901760, %v11226_v7  ;;  %v11241_v14 = vld [vmem:[#allocation5 + $0x30] sm:$0xff]  ;;  %v11243_v15 = vld [vmem:[#allocation5 + $0x38] sm:$0xff] }
  0x29   :  { %v11231_v10 = vpack.c.bf16 %v130_v4, %v127_v3  ;;  %v142_v12 = vand.u32 4294901760, %v11228_v8  ;;  %v46_v16 = vld [vmem:[#allocation2] sm:$0xff]  ;;  %v14150_v19 = vand.u32 4294901760, %v11241_v14  ;;  %v14149_v20 = vand.u32 4294901760, %v11243_v15  ;;  %v11263_v22 = vld [vmem:[#allocation5 + $0x48] sm:$0xff]  ;;  %v11280_v28 = vld [vmem:[#allocation5 + $0x50] sm:$0xff] }
  0x2a   :  { %v11239_v13 = vpack.c.bf16 %v136_v9, %v133_v6  ;;  %v11248_v17 = vand.u32 4294901760, %v46_v16  ;;  %v11261_v21 = vld [vmem:[#allocation5 + $0x40] sm:$0xff]  ;;  %v14144_v27 = vand.u32 4294901760, %v11263_v22  ;;  %v11282_v29 = vld [vmem:[#allocation5 + $0x58] sm:$0xff]  ;;  %v47_v31 = vld [vmem:[#allocation2 + $0x8] sm:$0xff]  ;;  %v14143_v32 = vand.u32 4294901760, %v11280_v28 }
  0x2b   :  { %14884 = vst [vmem:[#allocation11_spill] sm:$0xff] %v11231_v10  ;;  %9805 = vmatprep.subr.bf16.mxu0 %v11231_v10  ;;  %9997 = vmatprep.subr.bf16.mxu1 %v11231_v10  ;;  %v11256_v18 = vpack.c.bf16 %v142_v12, %v139_v11  ;;  %v11276_v25 = vpack.c.bf16 %v14149_v20, %v14150_v19  ;;  %v14145_v26 = vand.u32 4294901760, %v11261_v21  ;;  %v14142_v33 = vand.u32 4294901760, %v11282_v29  ;;  %v48_v35 = vld [vmem:[#allocation2 + $0x10] sm:$0xff]  ;;  %v11299_v37 = vld [vmem:[#allocation5 + $0x60] sm:$0xff]  ;;  %v11301_v38 = vld [vmem:[#allocation5 + $0x68] sm:$0xff] }
  0x2c   :  { %14885 = vst [vmem:[#allocation12_spill] sm:$0xff] %v11239_v13  ;;  %9807 = vmatpush3.bf16.msra.mxu0 %v11231_v10  ;;  %14886 = vst [vmem:[#allocation13_spill] sm:$0xff] %v11248_v17  ;;  %9999 = vmatpush3.bf16.msra.mxu1 %v11231_v10  ;;  %v11266_v23 = vsub.f32 %v46_v16, %v11248_v17  ;;  %v11303_v39 = vsub.f32 %v110_v0, %v127_v3  ;;  %v11308_v41 = vand.u32 4294901760, %v47_v31  ;;  %v49_v46 = vld [vmem:[#allocation2 + $0x18] sm:$0xff]  ;;  %v50_v47 = vld [vmem:[#allocation2 + $0x20] sm:$0xff] }
  0x2d   :  { %9809 = vmatprep.subr.bf16.mxu0 %v11239_v13  ;;  %14887 = vst [vmem:[#allocation14_spill] sm:$0xff] %v11256_v18  ;;  %10001 = vmatprep.subr.bf16.mxu1 %v11239_v13  ;;  %14889 = vst [vmem:[#allocation16_spill] sm:$0xff] %v11276_v25  ;;  %v11297_v36 = vpack.c.bf16 %v14144_v27, %v14145_v26  ;;  %v11305_v40 = vsub.f32 %v111_v1, %v130_v4  ;;  %v11310_v42 = vand.u32 4294901760, %v48_v35  ;;  %v11323_v48 = vld [vmem:[#allocation5 + $0x70] sm:$0xff]  ;;  %v11325_v49 = vld [vmem:[#allocation5 + $0x78] sm:$0xff] }
  0x2e   :  { %14888 = vst [vmem:[#allocation15_spill] sm:$0xff] %v11266_v23  ;;  %v14131_v24 = vand.u32 4294901760, %v11266_v23  ;;  %14891 = vst [vmem:[#allocation18_spill] sm:$0xff] %v11303_v39  ;;  %v11317_v43 = vpack.c.bf16 %v14142_v33, %v14143_v32  ;;  %v14141_v44 = vand.u32 4294901760, %v11299_v37  ;;  %v14139_v45 = vand.u32 4294901760, %v11301_v38  ;;  %v51_v52 = vld [vmem:[#allocation2 + $0x28] sm:$0xff] }
  0x2f   :  { %14890 = vst [vmem:[#allocation17_spill] sm:$0xff] %v11297_v36  ;;  %14892 = vst [vmem:[#allocation19_spill] sm:$0xff] %v11305_v40  ;;  %v14133_v50 = vand.u32 4294901760, %v11303_v39  ;;  %v14132_v51 = vand.u32 4294901760, %v11305_v40  ;;  %v11332_v53 = vsub.f32 %v11221_v2, %v133_v6  ;;  %v11337_v54 = vsub.f32 %v11223_v5, %v136_v9  ;;  %v52_v1 = vld [vmem:[#allocation2 + $0x30] sm:$0xff]  ;;  %v53_v16 = vld [vmem:[#allocation2 + $0x38] sm:$0xff] }
  0x30   :  { %9811 = vmatpush3.bf16.msra.mxu0 %v11239_v13  ;;  %10003 = vmatpush3.bf16.msra.mxu1 %v11239_v13  ;;  %v210_v30 = vsub.f32 %v11266_v23, %v14131_v24  ;;  %14893 = vst [vmem:[#allocation20_spill] sm:$0xff] %v11308_v41  ;;  %14894 = vst [vmem:[#allocation21_spill] sm:$0xff] %v11310_v42  ;;  %v11341_v55 = vsub.f32 %v47_v31, %v11308_v41  ;;  %v11346_v57 = vand.u32 4294901760, %v49_v46  ;;  %v56_v33 = vld [vmem:[#allocation2 + $0x50] sm:$0xff] }
  0x31   :  { %9813 = vmatprep.subr.bf16.mxu0 %v11256_v18  ;;  %10005 = vmatprep.subr.bf16.mxu1 %v11256_v18  ;;  %14895 = vst [vmem:[#allocation22_spill] sm:$0xff] %v11317_v43  ;;  %v11344_v56 = vsub.f32 %v48_v35, %v11310_v42  ;;  %v11348_v58 = vand.u32 4294901760, %v50_v47  ;;  %v11355_v59 = vpack.c.bf16 %v14139_v45, %v14141_v44  ;;  %v14138_v60 = vand.u32 4294901760, %v11323_v48 }
  0x32   :  { %v211_v34 = vand.u32 4294901760, %v210_v30  ;;  %14896 = vst [vmem:[#allocation23_spill] sm:$0xff] %v11341_v55  ;;  %14898 = vst [vmem:[#allocation25_spill] sm:$0xff] %v11346_v57  ;;  %v14135_v61 = vand.u32 4294901760, %v11325_v49  ;;  %v11359_v62 = vand.u32 4294901760, %v51_v52  ;;  %v851_v63 = vsub.f32 %v11303_v39, %v14133_v50 }
  0x33   :  { %14897 = vst [vmem:[#allocation24_spill] sm:$0xff] %v11344_v56  ;;  %14899 = vst [vmem:[#allocation26_spill] sm:$0xff] %v11348_v58  ;;  %v858_v0 = vsub.f32 %v11305_v40, %v14132_v51  ;;  %v14134_v2 = vand.u32 4294901760, %v11332_v53  ;;  %v14136_v3 = vand.u32 4294901760, %v11337_v54  ;;  %v14137_v4 = vand.u32 4294901760, %v11341_v55 }
  0x34   :  { %9815 = vmatpush3.bf16.msra.mxu0 %v11256_v18  ;;  %10007 = vmatpush3.bf16.msra.mxu1 %v11256_v18  ;;  %14900 = vst [vmem:[#allocation27_spill] sm:$0xff] %v11355_v59  ;;  %14901 = vst [vmem:[#allocation28_spill] sm:$0xff] %v11359_v62  ;;  %v14140_v5 = vand.u32 4294901760, %v11344_v56  ;;  %v11375_v6 = vsub.f32 %v49_v46, %v11346_v57  ;;  %v11378_v9 = vsub.f32 %v50_v47, %v11348_v58  ;;  %v54_v47 = vld [vmem:[#allocation2 + $0x40] sm:$0xff] }
  0x35   :  { %9817 = vmatprep.subr.bf16.mxu0 %v11276_v25  ;;  %10009 = vmatprep.subr.bf16.mxu1 %v11276_v25  ;;  %v11385_v30 = vpack.c.bf16 %v14135_v61, %v14138_v60  ;;  %v11388_v31 = vsub.f32 %v51_v52, %v11359_v62  ;;  %v852_v35 = vand.u32 4294901760, %v851_v63  ;;  %v859_v46 = vand.u32 4294901760, %v858_v0  ;;  %v55_v61 = vld [vmem:[#allocation2 + $0x48] sm:$0xff] }
  0x36   :  { %8300 = vmatprep.mubr.f32.mxu0 %v211_v34  ;;  %14902 = vst [vmem:[#allocation29_spill] sm:$0xff] %v11375_v6  ;;  %14903 = vst [vmem:[#allocation30_spill] sm:$0xff] %v11378_v9  ;;  %v11390_v34 = vand.u32 4294901760, %v52_v1  ;;  %v865_v24 = vsub.f32 %v11332_v53, %v14134_v2  ;;  %v872_v51 = vsub.f32 %v11337_v54, %v14136_v3  ;;  %v11404_v50 = vand.u32 4294901760, %v53_v16 }
  0x37   :  { %14904 = vst [vmem:[#allocation31_spill] sm:$0xff] %v11385_v30  ;;  %14905 = vst [vmem:[#allocation32_spill] sm:$0xff] %v11388_v31  ;;  %v220_v52 = vsub.f32 %v11341_v55, %v14137_v4  ;;  %v230_v63 = vsub.f32 %v11344_v56, %v14140_v5  ;;  %v14146_v0 = vand.u32 4294901760, %v11375_v6  ;;  %v14147_v2 = vand.u32 4294901760, %v11378_v9  ;;  %v69_v56 = vld [vmem:[#allocation2 + $0xb8] sm:$0xff] }
  0x38   :  { %9819 = vmatpush3.bf16.msra.mxu0 %v11276_v25  ;;  %10011 = vmatpush3.bf16.msra.mxu1 %v11276_v25  ;;  %14906 = vst [vmem:[#allocation33_spill] sm:$0xff] %v11390_v34  ;;  %14907 = vst [vmem:[#allocation34_spill] sm:$0xff] %v11404_v50  ;;  %v11414_v3 = vsub.f32 %v11226_v7, %v139_v11  ;;  %v11419_v60 = vsub.f32 %v52_v1, %v11390_v34  ;;  %v11421_v45 = vand.u32 4294901760, %v54_v47 }
  0x39   :  { %9821 = vmatprep.subr.bf16.mxu0 %v11297_v36  ;;  %10013 = vmatprep.subr.bf16.mxu1 %v11297_v36  ;;  %v11426_v5 = vsub.f32 %v11228_v8, %v142_v12  ;;  %v11430_v7 = vpack.c.bf16 %v859_v46, %v852_v35  ;;  %v866_v11 = vand.u32 4294901760, %v865_v24  ;;  %v873_v44 = vand.u32 4294901760, %v872_v51  ;;  %v57_v51 = vld [vmem:[#allocation2 + $0x58] sm:$0xff] }
  0x3a   :  { %14908 = vst [vmem:[#allocation35_spill] sm:$0xff] %v11419_v60  ;;  %14909 = vst [vmem:[#allocation36_spill] sm:$0xff] %v11421_v45  ;;  %v14148_v32 = vand.u32 4294901760, %v11414_v3  ;;  %v221_v1 = vand.u32 4294901760, %v220_v52  ;;  %v11435_v27 = vsub.f32 %v53_v16, %v11404_v50  ;;  %v11437_v26 = vand.u32 4294901760, %v55_v61 }
  0x3b   :  { %14910 = vst [vmem:[#allocation37_spill] sm:$0xff] %v11430_v7  ;;  %v14151_v8 = vand.u32 4294901760, %v11426_v5  ;;  %v231_v12 = vand.u32 4294901760, %v230_v63  ;;  %v240_v35 = vsub.f32 %v11375_v6, %v14146_v0  ;;  %v250_v24 = vsub.f32 %v11378_v9, %v14147_v2 }
  0x3c   :  { %9823 = vmatpush3.bf16.msra.mxu0 %v11297_v36  ;;  %10015 = vmatpush3.bf16.msra.mxu1 %v11297_v36  ;;  %14911 = vst [vmem:[#allocation38_spill] sm:$0xff] %v11435_v27  ;;  %14912 = vst [vmem:[#allocation39_spill] sm:$0xff] %v11437_v26  ;;  %v879_v46 = vsub.f32 %v11414_v3, %v14148_v32  ;;  %v11452_v52 = vsub.f32 %v54_v47, %v11421_v45  ;;  %v11454_v63 = vand.u32 4294901760, %v56_v33  ;;  %v58_v32 = vld [vmem:[#allocation2 + $0x60] sm:$0xff] }
  0x3d   :  { %9825 = vmatprep.subr.bf16.mxu0 %v11317_v43  ;;  %10017 = vmatprep.subr.bf16.mxu1 %v11317_v43  ;;  %v886_v0 = vsub.f32 %v11426_v5, %v14151_v8  ;;  %v11461_v2 = vpack.c.bf16 %v873_v44, %v866_v11  ;;  %v11466_v47 = vsub.f32 %v55_v61, %v11437_v26  ;;  %v11468_v16 = vand.u32 4294901760, %v57_v51  ;;  %v61_v61 = vld [vmem:[#allocation2 + $0x78] sm:$0xff] }
  0x3e   :  { %14913 = vst [vmem:[#allocation40_spill] sm:$0xff] %v11452_v52  ;;  %14914 = vst [vmem:[#allocation41_spill] sm:$0xff] %v11454_v63  ;;  %v880_v20 = vand.u32 4294901760, %v879_v46  ;;  %v241_v8 = vand.u32 4294901760, %v240_v35  ;;  %v14919_v11 = vand.u32 4294901760, %v11419_v60  ;;  %v11479_v19 = vsub.f32 %v56_v33, %v11454_v63  ;;  %v60_v35 = vld [vmem:[#allocation2 + $0x70] sm:$0xff] }
  0x3f   :  { %14915 = vst [vmem:[#allocation42_spill] sm:$0xff] %v11461_v2  ;;  %14916 = vst [vmem:[#allocation43_spill] sm:$0xff] %v11466_v47  ;;  %v887_v4 = vand.u32 4294901760, %v886_v0  ;;  %v11481_v0 = vand.u32 4294901760, %v58_v32  ;;  %v11495_v36 = vand.u32 4294901760, %v60_v35 }
  0x40   :  { %9827 = vmatpush3.bf16.msra.mxu0 %v11317_v43  ;;  %10019 = vmatpush3.bf16.msra.mxu1 %v11317_v43  ;;  %14917 = vst [vmem:[#allocation44_spill] sm:$0xff] %v11468_v16  ;;  %v270_v46 = vsub.f32 %v11419_v60, %v14919_v11  ;;  %14920 = vst [vmem:[#allocation45_spill] sm:$0xff] %v11479_v19  ;;  %v11491_v11 = vsub.f32 %v57_v51, %v11468_v16 }
  0x41   :  { %9829 = vmatprep.subr.bf16.mxu0 %v11355_v59  ;;  %10021 = vmatprep.subr.bf16.mxu1 %v11355_v59  ;;  %14921 = vst [vmem:[#allocation46_spill] sm:$0xff] %v11481_v0  ;;  %14926 = vst [vmem:[#allocation50_spill] sm:$0xff] %v11495_v36  ;;  %v11503_v51 = vsub.f32 %v58_v32, %v11481_v0 }
  0x42   :  { %14924 = vst [vmem:[#allocation48_spill] sm:$0xff] %v11491_v11  ;;  %v271_v25 = vand.u32 4294901760, %v270_v46 }
  0x43   :  { %14928 = vst [vmem:[#allocation51_spill] sm:$0xff] %v11503_v51 }
  0x44   :  { %9831 = vmatpush3.bf16.msra.mxu0 %v11355_v59  ;;  %10023 = vmatpush3.bf16.msra.mxu1 %v11355_v59  ;;  %v251_v59 = vand.u32 4294901760, %v250_v24  ;;  %v11484_v24 = vpack.c.bf16 %v887_v4, %v880_v20  ;;  %v14927_v20 = vand.u32 4294901760, %v11452_v52 }
  0x45   :  { %9833 = vmatprep.subr.bf16.mxu0 %v11385_v30  ;;  %10025 = vmatprep.subr.bf16.mxu1 %v11385_v30 }
  0x46   :  { %14922 = vst [vmem:[#allocation47_spill] sm:$0xff] %v11484_v24  ;;  %v290_v4 = vsub.f32 %v11452_v52, %v14927_v20  ;;  %v14934_v52 = vand.u32 4294901760, %v11241_v14 }
  0x48   :  { %9835 = vmatpush3.bf16.msra.mxu0 %v11385_v30  ;;  %10027 = vmatpush3.bf16.msra.mxu1 %v11385_v30  ;;  %v14918_v30 = vand.u32 4294901760, %v11388_v31  ;;  %v291_v60 = vand.u32 4294901760, %v290_v4  ;;  %v14940_v4 = vand.u32 4294901760, %v11491_v11 }
  0x49   :  { %9837 = vmatprep.subr.bf16.mxu0 %v11430_v7  ;;  %10029 = vmatprep.subr.bf16.mxu1 %v11430_v7 }
  0x4a   :  { %v260_v44 = vsub.f32 %v11388_v31, %v14918_v30  ;;  %v14923_v30 = vand.u32 4294901760, %v11435_v27 }
  0x4b   :  { %8301 = vmatmul.mubr.f32.vlgmr.msra.gmra.mrb[0].mxu0 %v221_v1  ;;  %v59_v1 = vld [vmem:[#allocation2 + $0x68] sm:$0xff] }
  0x4c   :  { %9839 = vmatpush3.bf16.msra.mxu0 %v11430_v7  ;;  %8303 = vmatprep.mubr.f32.mxu0 %v231_v12  ;;  %v280_v12 = vsub.f32 %v11435_v27, %v14923_v30  ;;  %v261_v33 = vand.u32 4294901760, %v260_v44  ;;  %v11493_v43 = vand.u32 4294901760, %v59_v1  ;;  %v62_v7 = vld [vmem:[#allocation2 + $0x80] sm:$0xff]  ;;  %v11516_v30 = vsub.f32 %v60_v35, %v11495_v36 }
  0x4d   :  { %9841 = vmatprep.subr.bf16.mxu0 %v11461_v2  ;;  %v11518_v32 = vand.u32 4294901760, %v62_v7  ;;  %v14937_v35 = vand.u32 4294901760, %v11243_v15 }
  0x4e   :  { %14925 = vst [vmem:[#allocation49_spill] sm:$0xff] %v11493_v43  ;;  %v281_v44 = vand.u32 4294901760, %v280_v12  ;;  %v11513_v20 = vsub.f32 %v59_v1, %v11493_v43  ;;  %14932 = vst [vmem:[#allocation54_spill] sm:$0xff] %v11516_v30  ;;  %v11523_v12 = vsub.f32 %v11241_v14, %v14934_v52  ;;  %v64_v14 = vld [vmem:[#allocation2 + $0x90] sm:$0xff] }
  0x4f   :  { %8304 = vmatmul.mubr.f32.gmra.mrb[2].mxu0 %v241_v8  ;;  %v11505_v8 = vand.u32 4294901760, %v61_v61  ;;  %14933 = vst [vmem:[#allocation55_spill] sm:$0xff] %v11518_v32  ;;  %v11533_v27 = vsub.f32 %v11243_v15, %v14937_v35  ;;  %v11556_v31 = vand.u32 4294901760, %v64_v14 }
  0x50   :  { %8306 = vmatprep.mubr.f32.mxu0 %v251_v59  ;;  %9843 = vmatpush3.bf16.msra.mxu0 %v11461_v2  ;;  %v14930_v59 = vand.u32 4294901760, %v11466_v47  ;;  %14931 = vst [vmem:[#allocation53_spill] sm:$0xff] %v11513_v20  ;;  %v63_v2 = vld [vmem:[#allocation2 + $0x88] sm:$0xff]  ;;  %14935 = vst [vmem:[#allocation56_spill] sm:$0xff] %v11523_v12 }
  0x51   :  { %14929 = vst [vmem:[#allocation52_spill] sm:$0xff] %v11505_v8  ;;  %9845 = vmatprep.subr.bf16.mxu0 %v11484_v24  ;;  %14938 = vst [vmem:[#allocation57_spill] sm:$0xff] %v11533_v27  ;;  %v14190_v1 = vand.u32 4294901760, %v11533_v27 }
  0x52   :  { %v300_v46 = vsub.f32 %v11466_v47, %v14930_v59  ;;  %v14936_v59 = vand.u32 4294901760, %v11479_v19  ;;  %v11536_v47 = vsub.f32 %v61_v61, %v11505_v8  ;;  %v11548_v61 = vsub.f32 %v62_v7, %v11518_v32  ;;  %14944 = vst [vmem:[#allocation61_spill] sm:$0xff] %v11556_v31  ;;  %v67_v7 = vld [vmem:[#allocation2 + $0xa8] sm:$0xff] }
  0x53   :  { %8307 = vmatmul.mubr.f32.gmra.mrb[4].mxu0 %v261_v33  ;;  %v900_v15 = vsub.f32 %v11533_v27, %v14190_v1  ;;  %v11585_v1 = vand.u32 4294901760, %v67_v7 }
  0x54   :  { %8309 = vmatprep.mubr.f32.mxu0 %v271_v25  ;;  %v310_v33 = vsub.f32 %v11479_v19, %v14936_v59  ;;  %9847 = vmatpush3.bf16.msra.mxu0 %v11484_v24  ;;  %14939 = vst [vmem:[#allocation58_spill] sm:$0xff] %v11536_v47  ;;  %v14185_v25 = vand.u32 4294901760, %v11523_v12  ;;  %v301_v52 = vand.u32 4294901760, %v300_v46  ;;  %v320_v59 = vsub.f32 %v11491_v11, %v14940_v4  ;;  %v66_v24 = vld [vmem:[#allocation2 + $0xa0] sm:$0xff] }
  0x55   :  { %v11542_v19 = vand.u32 4294901760, %v63_v2  ;;  %14942 = vst [vmem:[#allocation60_spill] sm:$0xff] %v11548_v61  ;;  %v14943_v4 = vand.u32 4294901760, %v11503_v51  ;;  %14953 = vst [vmem:[#allocation67_spill] sm:$0xff] %v11585_v1 }
  0x56   :  { %v893_v46 = vsub.f32 %v11523_v12, %v14185_v25  ;;  %v311_v35 = vand.u32 4294901760, %v310_v33  ;;  %v321_v9 = vand.u32 4294901760, %v320_v59  ;;  %v14946_v33 = vand.u32 4294901760, %v11513_v20 }
  0x57   :  { %14941 = vst [vmem:[#allocation59_spill] sm:$0xff] %v11542_v19  ;;  %8310 = vmatmul.mubr.f32.gmra.mrb[6].mxu0 %v281_v44  ;;  %v330_v11 = vsub.f32 %v11503_v51, %v14943_v4  ;;  %v65_v44 = vld [vmem:[#allocation2 + $0x98] sm:$0xff]  ;;  %v11563_v25 = vsub.f32 %v63_v2, %v11542_v19  ;;  %v14947_v51 = vand.u32 4294901760, %v11516_v30  ;;  %v11575_v2 = vsub.f32 %v64_v14, %v11556_v31 }
  0x58   :  { %8312 = vmatprep.mubr.f32.mxu0 %v291_v60  ;;  %v894_v18 = vand.u32 4294901760, %v893_v46  ;;  %v901_v60 = vand.u32 4294901760, %v900_v15  ;;  %v340_v4 = vsub.f32 %v11513_v20, %v14946_v33  ;;  %v11572_v13 = vand.u32 4294901760, %v65_v44  ;;  %v68_v46 = vld [vmem:[#allocation2 + $0xb0] sm:$0xff] }
  0x59   :  { %14945 = vst [vmem:[#allocation62_spill] sm:$0xff] %v11563_v25  ;;  %v350_v6 = vsub.f32 %v11516_v30, %v14947_v51  ;;  %v331_v59 = vand.u32 4294901760, %v330_v11  ;;  %14949 = vst [vmem:[#allocation64_spill] sm:$0xff] %v11575_v2  ;;  %v14952_v33 = vand.u32 4294901760, %v11536_v47  ;;  %v11587_v30 = vand.u32 4294901760, %v68_v46 }
  0x5a   :  { %14948 = vst [vmem:[#allocation63_spill] sm:$0xff] %v11572_v13  ;;  %v11579_v15 = vpack.c.bf16 %v901_v60, %v894_v18  ;;  %v14955_v11 = vand.u32 4294901760, %v11261_v21  ;;  %v341_v18 = vand.u32 4294901760, %v340_v4  ;;  %v14959_v51 = vand.u32 4294901760, %v11263_v22 }
  0x5b   :  { %8313 = vmatmul.mubr.f32.gmra.mrb[8].mxu0 %v301_v52  ;;  %v11577_v52 = vand.u32 4294901760, %v66_v24  ;;  %v360_v20 = vsub.f32 %v11536_v47, %v14952_v33  ;;  %14954 = vst [vmem:[#allocation68_spill] sm:$0xff] %v11587_v30  ;;  %v11599_v33 = vsub.f32 %v65_v44, %v11572_v13  ;;  %v351_v55 = vand.u32 4294901760, %v350_v6  ;;  %v70_v44 = vld [vmem:[#allocation2 + $0xc0] sm:$0xff] }
  0x5c   :  { %8315 = vmatprep.mubr.f32.mxu0 %v311_v35  ;;  %14951 = vst [vmem:[#allocation66_spill] sm:$0xff] %v11579_v15  ;;  %9849 = vmatprep.subr.bf16.mxu0 %v11579_v15  ;;  %v11593_v14 = vsub.f32 %v11261_v21, %v14955_v11  ;;  %v14957_v35 = vand.u32 4294901760, %v11548_v61  ;;  %v11604_v47 = vsub.f32 %v11263_v22, %v14959_v51  ;;  %v11612_v4 = vand.u32 4294901760, %v69_v56  ;;  %v71_v11 = vld [vmem:[#allocation2 + $0xc8] sm:$0xff] }
  0x5d   :  { %14950 = vst [vmem:[#allocation65_spill] sm:$0xff] %v11577_v52  ;;  %14958 = vst [vmem:[#allocation70_spill] sm:$0xff] %v11599_v33  ;;  %v11608_v21 = vsub.f32 %v66_v24, %v11577_v52  ;;  %9851 = vmatpush3.bf16.msra.mxu0 %v11579_v15  ;;  %v11616_v22 = vsub.f32 %v67_v7, %v11585_v1  ;;  %v11619_v6 = vsub.f32 %v68_v46, %v11587_v30 }
  0x5e   :  { %14956 = vst [vmem:[#allocation69_spill] sm:$0xff] %v11593_v14  ;;  %v370_v60 = vsub.f32 %v11548_v61, %v14957_v35  ;;  %14960 = vst [vmem:[#allocation71_spill] sm:$0xff] %v11604_v47  ;;  %v361_v35 = vand.u32 4294901760, %v360_v20  ;;  %v14965_v51 = vand.u32 4294901760, %v11563_v25  ;;  %v14966_v20 = vand.u32 4294901760, %v11604_v47 }
  0x5f   :  { %8316 = vmatmul.mubr.f32.gmra.mrb[10].mxu0 %v321_v9  ;;  %14961 = vst [vmem:[#allocation72_spill] sm:$0xff] %v11608_v21  ;;  %v14209_v9 = vand.u32 4294901760, %v11593_v14  ;;  %14962 = vst [vmem:[#allocation73_spill] sm:$0xff] %v11612_v4  ;;  %v14967_v46 = vand.u32 4294901760, %v11575_v2  ;;  %v11638_v30 = vsub.f32 %v69_v56, %v11612_v4  ;;  %v14973_v56 = vand.u32 4294901760, %v11608_v21  ;;  %v73_v4 = vld [vmem:[#allocation2 + $0xd8] sm:$0xff] }
  0x60   :  { %8318 = vmatprep.mubr.f32.mxu0 %v331_v59  ;;  %14963 = vst [vmem:[#allocation74_spill] sm:$0xff] %v11616_v22  ;;  %14964 = vst [vmem:[#allocation75_spill] sm:$0xff] %v11619_v6  ;;  %v371_v59 = vand.u32 4294901760, %v370_v60  ;;  %v380_v23 = vsub.f32 %v11563_v25, %v14965_v51  ;;  %v914_v7 = vsub.f32 %v11604_v47, %v14966_v20  ;;  %v72_v51 = vld [vmem:[#allocation2 + $0xd0] sm:$0xff]  ;;  %v11642_v20 = vand.u32 4294901760, %v71_v11 }
  0x61   :  { %v907_v24 = vsub.f32 %v11593_v14, %v14209_v9  ;;  %v390_v61 = vsub.f32 %v11575_v2, %v14967_v46  ;;  %14969 = vst [vmem:[#allocation77_spill] sm:$0xff] %v11638_v30  ;;  %v14971_v46 = vand.u32 4294901760, %v11599_v33  ;;  %v11655_v1 = vand.u32 4294901760, %v72_v51 }
  0x62   :  { %v915_v15 = vand.u32 4294901760, %v914_v7  ;;  %14970 = vst [vmem:[#allocation78_spill] sm:$0xff] %v11642_v20  ;;  %v410_v7 = vsub.f32 %v11608_v21, %v14973_v56  ;;  %v11671_v56 = vsub.f32 %v71_v11, %v11642_v20 }
  0x63   :  { %8319 = vmatmul.mubr.f32.gmra.mrb[12].mxu0 %v341_v18  ;;  %v11635_v18 = vand.u32 4294901760, %v70_v44  ;;  %v908_v60 = vand.u32 4294901760, %v907_v24  ;;  %v400_v9 = vsub.f32 %v11599_v33, %v14971_v46  ;;  %v391_v24 = vand.u32 4294901760, %v390_v61  ;;  %14975 = vst [vmem:[#allocation81_spill] sm:$0xff] %v11655_v1 }
  0x64   :  { %8321 = vmatprep.mubr.f32.mxu0 %v351_v55  ;;  %v381_v55 = vand.u32 4294901760, %v380_v23  ;;  %v14978_v61 = vand.u32 4294901760, %v11616_v22  ;;  %14980 = vst [vmem:[#allocation83_spill] sm:$0xff] %v11671_v56  ;;  %v14981_v23 = vand.u32 4294901760, %v11282_v29 }
  0x65   :  { %14968 = vst [vmem:[#allocation76_spill] sm:$0xff] %v11635_v18  ;;  %v11647_v2 = vpack.c.bf16 %v915_v15, %v908_v60  ;;  %v11653_v25 = vsub.f32 %v70_v44, %v11635_v18  ;;  %v14976_v15 = vand.u32 4294901760, %v11280_v28  ;;  %v14979_v44 = vand.u32 4294901760, %v11619_v6 }
  0x66   :  { %v420_v60 = vsub.f32 %v11616_v22, %v14978_v61  ;;  %v11677_v21 = vsub.f32 %v11282_v29, %v14981_v23  ;;  %v75_v61 = vld [vmem:[#allocation2 + $0xe8] sm:$0xff] }
  0x67   :  { %8322 = vmatmul.mubr.f32.gmra.mrb[14].mxu0 %v361_v35  ;;  %14972 = vst [vmem:[#allocation79_spill] sm:$0xff] %v11647_v2  ;;  %14974 = vst [vmem:[#allocation80_spill] sm:$0xff] %v11653_v25  ;;  %v74_v35 = vld [vmem:[#allocation2 + $0xe0] sm:$0xff]  ;;  %9853 = vmatprep.subr.bf16.mxu0 %v11647_v2  ;;  %v430_v46 = vsub.f32 %v11619_v6, %v14979_v44  ;;  %v411_v44 = vand.u32 4294901760, %v410_v7  ;;  %v76_v6 = vld [vmem:[#allocation2 + $0xf0] sm:$0xff]  ;;  %v11696_v7 = vand.u32 4294901760, %v75_v61 }
  0x68   :  { %8324 = vmatprep.mubr.f32.mxu0 %v371_v59  ;;  %v11662_v59 = vsub.f32 %v11280_v28, %v14976_v15  ;;  %9855 = vmatpush3.bf16.msra.mxu0 %v11647_v2  ;;  %14982 = vst [vmem:[#allocation84_spill] sm:$0xff] %v11677_v21  ;;  %v401_v28 = vand.u32 4294901760, %v400_v9  ;;  %v11679_v15 = vand.u32 4294901760, %v73_v4  ;;  %v11681_v33 = vand.u32 4294901760, %v74_v35 }
  0x69   :  { %v11686_v2 = vsub.f32 %v72_v51, %v11655_v1  ;;  %v14241_v29 = vand.u32 4294901760, %v11677_v21  ;;  %v421_v20 = vand.u32 4294901760, %v420_v60  ;;  %14987 = vst [vmem:[#allocation88_spill] sm:$0xff] %v11696_v7  ;;  %v431_v60 = vand.u32 4294901760, %v430_v46 }
  0x6a   :  { %14977 = vst [vmem:[#allocation82_spill] sm:$0xff] %v11662_v59  ;;  %14983 = vst [vmem:[#allocation85_spill] sm:$0xff] %v11679_v15  ;;  %v14236_v22 = vand.u32 4294901760, %v11662_v59  ;;  %v11702_v11 = vsub.f32 %v73_v4, %v11679_v15  ;;  %v11705_v1 = vsub.f32 %v74_v35, %v11681_v33  ;;  %v14992_v4 = vand.u32 4294901760, %v11671_v56 }
  0x6b   :  { %8325 = vmatmul.mubr.f32.gmra.mrb[16].mxu0 %v381_v55  ;;  %14984 = vst [vmem:[#allocation86_spill] sm:$0xff] %v11681_v33  ;;  %14985 = vst [vmem:[#allocation87_spill] sm:$0xff] %v11686_v2  ;;  %v14986_v55 = vand.u32 4294901760, %v11638_v30  ;;  %v928_v51 = vsub.f32 %v11677_v21, %v14241_v29  ;;  %v11717_v35 = vsub.f32 %v75_v61, %v11696_v7  ;;  %v84_v7 = vld [vmem:[#allocation2 + $0x130] sm:$0xff] }
  0x6c   :  { %8327 = vmatprep.mubr.f32.mxu0 %v391_v24  ;;  %v921_v23 = vsub.f32 %v11662_v59, %v14236_v22  ;;  %14988 = vst [vmem:[#allocation89_spill] sm:$0xff] %v11702_v11  ;;  %14989 = vst [vmem:[#allocation90_spill] sm:$0xff] %v11705_v1  ;;  %v14991_v24 = vand.u32 4294901760, %v11653_v25  ;;  %v460_v15 = vsub.f32 %v11671_v56, %v14992_v4  ;;  %v14997_v4 = vand.u32 4294901760, %v11686_v2 }
  0x6d   :  { %v440_v9 = vsub.f32 %v11638_v30, %v14986_v55  ;;  %v11707_v55 = vand.u32 4294901760, %v76_v6  ;;  %v77_v30 = vld [vmem:[#allocation2 + $0xf8] sm:$0xff]  ;;  %v929_v29 = vand.u32 4294901760, %v928_v51  ;;  %14993 = vst [vmem:[#allocation92_spill] sm:$0xff] %v11717_v35 }
  0x6e   :  { %v922_v22 = vand.u32 4294901760, %v921_v23  ;;  %v450_v18 = vsub.f32 %v11653_v25, %v14991_v24  ;;  %v11719_v33 = vand.u32 4294901760, %v77_v30  ;;  %v79_v23 = vld [vmem:[#allocation2 + $0x108] sm:$0xff]  ;;  %v14256_v24 = vand.u32 4294901760, %v11702_v11 }
  0x6f   :  { %8328 = vmatmul.mubr.f32.gmra.mrb[18].mxu0 %v401_v28  ;;  %14990 = vst [vmem:[#allocation91_spill] sm:$0xff] %v11707_v55  ;;  %v78_v28 = vld [vmem:[#allocation2 + $0x100] sm:$0xff]  ;;  %v441_v46 = vand.u32 4294901760, %v440_v9  ;;  %v11726_v51 = vsub.f32 %v76_v6, %v11707_v55  ;;  %v470_v61 = vsub.f32 %v11686_v2, %v14997_v4  ;;  %v461_v9 = vand.u32 4294901760, %v460_v15 }
  0x70   :  { %8330 = vmatprep.mubr.f32.mxu0 %v411_v44  ;;  %14994 = vst [vmem:[#allocation93_spill] sm:$0xff] %v11719_v33  ;;  %v11721_v44 = vpack.c.bf16 %v929_v29, %v922_v22  ;;  %v451_v25 = vand.u32 4294901760, %v450_v18  ;;  %v11731_v56 = vand.u32 4294901760, %v78_v28  ;;  %v11734_v22 = vand.u32 4294901760, %v79_v23 }
  0x71   :  { %14996 = vst [vmem:[#allocation95_spill] sm:$0xff] %v11726_v51  ;;  %v15000_v29 = vand.u32 4294901760, %v11299_v37  ;;  %v15003_v4 = vand.u32 4294901760, %v11301_v38  ;;  %v15005_v2 = vand.u32 4294901760, %v11705_v1  ;;  %v471_v18 = vand.u32 4294901760, %v470_v61 }
  0x72   :  { %14995 = vst [vmem:[#allocation94_spill] sm:$0xff] %v11721_v44  ;;  %14998 = vst [vmem:[#allocation96_spill] sm:$0xff] %v11731_v56  ;;  %9857 = vmatprep.subr.bf16.mxu0 %v11721_v44  ;;  %v15009_v15 = vand.u32 4294901760, %v11717_v35  ;;  %v11803_v61 = vand.u32 4294901760, %v84_v7 }
  0x73   :  { %8331 = vmatmul.mubr.f32.gmra.mrb[20].mxu0 %v421_v20  ;;  %14999 = vst [vmem:[#allocation97_spill] sm:$0xff] %v11734_v22  ;;  %v80_v20 = vld [vmem:[#allocation2 + $0x110] sm:$0xff]  ;;  %v11740_v6 = vsub.f32 %v11299_v37, %v15000_v29  ;;  %v11749_v52 = vsub.f32 %v11301_v38, %v15003_v4  ;;  %v490_v37 = vsub.f32 %v11705_v1, %v15005_v2  ;;  %v81_v29 = vld [vmem:[#allocation2 + $0x118] sm:$0xff] }
  0x74   :  { %8333 = vmatprep.mubr.f32.mxu0 %v431_v60  ;;  %9859 = vmatpush3.bf16.msra.mxu0 %v11721_v44  ;;  %v11744_v60 = vsub.f32 %v77_v30, %v11719_v33  ;;  %v480_v44 = vsub.f32 %v11702_v11, %v14256_v24  ;;  %v11760_v33 = vsub.f32 %v78_v28, %v11731_v56  ;;  %v11762_v38 = vand.u32 4294901760, %v80_v20  ;;  %v83_v56 = vld [vmem:[#allocation2 + $0x128] sm:$0xff] }
  0x75   :  { %15001 = vst [vmem:[#allocation98_spill] sm:$0xff] %v11740_v6  ;;  %15004 = vst [vmem:[#allocation100_spill] sm:$0xff] %v11749_v52  ;;  %v14267_v30 = vand.u32 4294901760, %v11740_v6  ;;  %v14274_v4 = vand.u32 4294901760, %v11749_v52  ;;  %v11766_v24 = vsub.f32 %v79_v23, %v11734_v22  ;;  %v11775_v28 = vand.u32 4294901760, %v81_v29 }
  0x76   :  { %15002 = vst [vmem:[#allocation99_spill] sm:$0xff] %v11744_v60  ;;  %15006 = vst [vmem:[#allocation101_spill] sm:$0xff] %v11760_v33  ;;  %v481_v11 = vand.u32 4294901760, %v480_v44  ;;  %v491_v23 = vand.u32 4294901760, %v490_v37  ;;  %v11793_v37 = vand.u32 4294901760, %v83_v56 }
  0x77   :  { %8334 = vmatmul.mubr.f32.gmra.mrb[22].mxu0 %v441_v46  ;;  %15007 = vst [vmem:[#allocation102_spill] sm:$0xff] %v11762_v38  ;;  %v82_v46 = vld [vmem:[#allocation2 + $0x120] sm:$0xff]  ;;  %15008 = vst [vmem:[#allocation103_spill] sm:$0xff] %v11766_v24  ;;  %v935_v2 = vsub.f32 %v11740_v6, %v14267_v30  ;;  %v942_v1 = vsub.f32 %v11749_v52, %v14274_v4  ;;  %v15012_v30 = vand.u32 4294901760, %v11726_v51 }
  0x78   :  { %8336 = vmatprep.mubr.f32.mxu0 %v451_v25  ;;  %v500_v25 = vsub.f32 %v11717_v35, %v15009_v15  ;;  %15010 = vst [vmem:[#allocation104_spill] sm:$0xff] %v11775_v28  ;;  %v11780_v22 = vand.u32 4294901760, %v82_v46  ;;  %v11787_v35 = vsub.f32 %v80_v20, %v11762_v38  ;;  %v11791_v44 = vsub.f32 %v81_v29, %v11775_v28 }
  0x79   :  { %v936_v55 = vand.u32 4294901760, %v935_v2  ;;  %v510_v15 = vsub.f32 %v11726_v51, %v15012_v30  ;;  %v943_v13 = vand.u32 4294901760, %v942_v1  ;;  %15015 = vst [vmem:[#allocation108_spill] sm:$0xff] %v11793_v37  ;;  %v15017_v30 = vand.u32 4294901760, %v11744_v60  ;;  %15019 = vst [vmem:[#allocation111_spill] sm:$0xff] %v11803_v61  ;;  %v85_v1 = vld [vmem:[#allocation2 + $0x138] sm:$0xff] }
  0x7a   :  { %15011 = vst [vmem:[#allocation105_spill] sm:$0xff] %v11780_v22  ;;  %15013 = vst [vmem:[#allocation106_spill] sm:$0xff] %v11787_v35  ;;  %v11801_v20 = vsub.f32 %v82_v46, %v11780_v22  ;;  %v15020_v29 = vand.u32 4294901760, %v11760_v33  ;;  %v15026_v46 = vand.u32 4294901760, %v11787_v35 }
  0x7b   :  { %8337 = vmatmul.mubr.f32.gmra.mrb[24].mxu0 %v461_v9  ;;  %15014 = vst [vmem:[#allocation107_spill] sm:$0xff] %v11791_v44  ;;  %v11795_v2 = vpack.c.bf16 %v943_v13, %v936_v55  ;;  %v520_v4 = vsub.f32 %v11744_v60, %v15017_v30  ;;  %v511_v9 = vand.u32 4294901760, %v510_v15  ;;  %v11818_v15 = vand.u32 4294901760, %v85_v1  ;;  %v88_v60 = vld [vmem:[#allocation2 + $0x150] sm:$0xff] }
  0x7c   :  { %8339 = vmatprep.mubr.f32.mxu0 %v471_v18  ;;  %v501_v18 = vand.u32 4294901760, %v500_v25  ;;  %15018 = vst [vmem:[#allocation110_spill] sm:$0xff] %v11801_v20  ;;  %v530_v51 = vsub.f32 %v11760_v33, %v15020_v29  ;;  %v86_v25 = vld [vmem:[#allocation2 + $0x140] sm:$0xff]  ;;  %v11822_v13 = vsub.f32 %v84_v7, %v11803_v61  ;;  %v15025_v33 = vand.u32 4294901760, %v11323_v48  ;;  %v89_v61 = vld [vmem:[#allocation2 + $0x158] sm:$0xff] }
  0x7d   :  { %15016 = vst [vmem:[#allocation109_spill] sm:$0xff] %v11795_v2  ;;  %9861 = vmatprep.subr.bf16.mxu0 %v11795_v2  ;;  %15023 = vst [vmem:[#allocation113_spill] sm:$0xff] %v11818_v15  ;;  %v521_v30 = vand.u32 4294901760, %v520_v4  ;;  %v15028_v4 = vand.u32 4294901760, %v11325_v49 }
  0x7e   :  { %9863 = vmatpush3.bf16.msra.mxu0 %v11795_v2  ;;  %15024 = vst [vmem:[#allocation114_spill] sm:$0xff] %v11822_v13  ;;  %v531_v2 = vand.u32 4294901760, %v530_v51 }
  0x7f   :  { %8340 = vmatmul.mubr.f32.gmra.mrb[26].mxu0 %v481_v11  ;;  %v15021_v11 = vand.u32 4294901760, %v11766_v24  ;;  %v11837_v29 = vsub.f32 %v11325_v49, %v15028_v4 }
  0x80   :  { %8342 = vmatprep.mubr.f32.mxu0 %v491_v23  ;;  %v11816_v23 = vsub.f32 %v83_v56, %v11793_v37  ;;  %v550_v56 = vsub.f32 %v11787_v35, %v15026_v46  ;;  %v15031_v35 = vand.u32 4294901760, %v11801_v20  ;;  %v11860_v46 = vand.u32 4294901760, %v88_v60 }
  0x81   :  { %v540_v55 = vsub.f32 %v11766_v24, %v15021_v11  ;;  %v11827_v11 = vsub.f32 %v11323_v48, %v15025_v33  ;;  %v11832_v24 = vand.u32 4294901760, %v86_v25  ;;  %v15029_v48 = vand.u32 4294901760, %v11791_v44 }
  0x82   :  { %15022 = vst [vmem:[#allocation112_spill] sm:$0xff] %v11816_v23  ;;  %v570_v49 = vsub.f32 %v11801_v20, %v15031_v35  ;;  %v551_v51 = vand.u32 4294901760, %v550_v56  ;;  %15035 = vst [vmem:[#allocation119_spill] sm:$0xff] %v11860_v46  ;;  %v90_v20 = vld [vmem:[#allocation2 + $0x160] sm:$0xff] }
  0x83   :  { %8343 = vmatmul.mubr.f32.gmra.mrb[28].mxu0 %v501_v18  ;;  %15027 = vst [vmem:[#allocation115_spill] sm:$0xff] %v11832_v24  ;;  %v87_v18 = vld [vmem:[#allocation2 + $0x148] sm:$0xff]  ;;  %v541_v7 = vand.u32 4294901760, %v540_v55  ;;  %v560_v33 = vsub.f32 %v11791_v44, %v15029_v48  ;;  %v15033_v37 = vand.u32 4294901760, %v11827_v11  ;;  %v15037_v44 = vand.u32 4294901760, %v11816_v23 }
  0x84   :  { %8345 = vmatprep.mubr.f32.mxu0 %v511_v9  ;;  %v11845_v9 = vsub.f32 %v85_v1, %v11818_v15  ;;  %v11852_v4 = vand.u32 4294901760, %v87_v18  ;;  %v11858_v1 = vsub.f32 %v86_v25, %v11832_v24  ;;  %v571_v56 = vand.u32 4294901760, %v570_v49 }
  0x85   :  { %v949_v48 = vsub.f32 %v11827_v11, %v15033_v37  ;;  %v580_v15 = vsub.f32 %v11816_v23, %v15037_v44  ;;  %v11869_v37 = vand.u32 4294901760, %v89_v61  ;;  %v561_v25 = vand.u32 4294901760, %v560_v33 }
  0x86   :  { %15030 = vst [vmem:[#allocation116_spill] sm:$0xff] %v11845_v9  ;;  %15032 = vst [vmem:[#allocation117_spill] sm:$0xff] %v11852_v4  ;;  %v15039_v24 = vand.u32 4294901760, %v11822_v13  ;;  %v11879_v44 = vsub.f32 %v88_v60, %v11860_v46  ;;  %v11881_v22 = vand.u32 4294901760, %v90_v20  ;;  %v11887_v33 = vpack.c.bf16 %v11305_v40, %v11303_v39 }
  0x87   :  { %8346 = vmatmul.mubr.f32.gmra.mrb[30].mxu0 %v521_v30  ;;  %15034 = vst [vmem:[#allocation118_spill] sm:$0xff] %v11858_v1  ;;  %v15036_v30 = vand.u32 4294901760, %v11837_v29  ;;  %v950_v55 = vand.u32 4294901760, %v949_v48  ;;  %15038 = vst [vmem:[#allocation120_spill] sm:$0xff] %v11869_v37  ;;  %v91_v48 = vld [vmem:[#allocation2 + $0x168] sm:$0xff] }
  0x88   :  { %8348 = vmatprep.mubr.f32.mxu0 %v531_v2  ;;  %v590_v28 = vsub.f32 %v11822_v13, %v15039_v24  ;;  %15041 = vst [vmem:[#allocation122_spill] sm:$0xff] %v11879_v44  ;;  %15042 = vst [vmem:[#allocation123_spill] sm:$0xff] %v11881_v22  ;;  %v581_v24 = vand.u32 4294901760, %v580_v15  ;;  %v11895_v38 = vand.u32 4294901760, %v91_v48  ;;  %v11907_v15 = vpack.c.bf16 %v11604_v47, %v11593_v14  ;;  %v93_v13 = vld [vmem:[#allocation2 + $0x178] sm:$0xff] }
  0x89   :  { %v956_v35 = vsub.f32 %v11837_v29, %v15036_v30  ;;  %v11875_v30 = vsub.f32 %v87_v18, %v11852_v4  ;;  %15044 = vst [vmem:[#allocation125_spill] sm:$0xff] %v11887_v33  ;;  %v15045_v18 = vand.u32 4294901760, %v11845_v9  ;;  %v11914_v60 = vsub.f32 %v90_v20, %v11881_v22 }
  0x8a   :  { %15047 = vst [vmem:[#allocation127_spill] sm:$0xff] %v11895_v38  ;;  %15050 = vst [vmem:[#allocation130_spill] sm:$0xff] %v11907_v15  ;;  %v11928_v14 = vand.u32 4294901760, %v93_v13 }
  0x8b   :  { %v957_v2 = vand.u32 4294901760, %v956_v35  ;;  %8349 = vmatmul.mubr.f32.gmra.mrb[32].mxu0 %v541_v7  ;;  %15040 = vst [vmem:[#allocation121_spill] sm:$0xff] %v11875_v30  ;;  %v92_v35 = vld [vmem:[#allocation2 + $0x170] sm:$0xff]  ;;  %v600_v49 = vsub.f32 %v11845_v9, %v15045_v18  ;;  %v15051_v18 = vand.u32 4294901760, %v11858_v1  ;;  %15052 = vst [vmem:[#allocation131_spill] sm:$0xff] %v11914_v60  ;;  %v15062_v40 = vand.u32 4294901760, %v11914_v60 }
  0x8c   :  { %8351 = vmatprep.mubr.f32.mxu0 %v551_v51  ;;  %v11893_v51 = vsub.f32 %v89_v61, %v11869_v37  ;;  %v591_v61 = vand.u32 4294901760, %v590_v28  ;;  %15056 = vst [vmem:[#allocation134_spill] sm:$0xff] %v11928_v14 }
  0x8d   :  { %v11883_v7 = vpack.c.bf16 %v957_v2, %v950_v55  ;;  %v11899_v55 = vand.u32 4294901760, %v92_v35  ;;  %v11903_v2 = vpack.c.bf16 %v11533_v27, %v11523_v12  ;;  %v610_v9 = vsub.f32 %v11858_v1, %v15051_v18  ;;  %v94_v27 = vld [vmem:[#allocation2 + $0x180] sm:$0xff] }
  0x8e   :  { %15046 = vst [vmem:[#allocation126_spill] sm:$0xff] %v11893_v51  ;;  %v601_v28 = vand.u32 4294901760, %v600_v49  ;;  %v15054_v18 = vand.u32 4294901760, %v11875_v30  ;;  %v15057_v12 = vand.u32 4294901760, %v11879_v44  ;;  %v11934_v1 = vand.u32 4294901760, %v94_v27  ;;  %v96_v49 = vld [vmem:[#allocation2 + $0x190] sm:$0xff] }
  0x8f   :  { %15043 = vst [vmem:[#allocation124_spill] sm:$0xff] %v11883_v7  ;;  %9865 = vmatprep.subr.bf16.mxu0 %v11883_v7  ;;  %8352 = vmatmul.mubr.f32.gmra.mrb[34].mxu0 %v561_v25  ;;  %15048 = vst [vmem:[#allocation128_spill] sm:$0xff] %v11899_v55  ;;  %v11926_v20 = vsub.f32 %v92_v35, %v11899_v55  ;;  %v15059_v23 = vand.u32 4294901760, %v11893_v51  ;;  %v650_v39 = vsub.f32 %v11914_v60, %v15062_v40  ;;  %v99_v60 = vld [vmem:[#allocation2 + $0x1a8] sm:$0xff] }
  0x90   :  { %15049 = vst [vmem:[#allocation129_spill] sm:$0xff] %v11903_v2  ;;  %8354 = vmatprep.mubr.f32.mxu0 %v571_v56  ;;  %9867 = vmatpush3.bf16.msra.mxu0 %v11883_v7  ;;  %v11920_v56 = vsub.f32 %v91_v48, %v11895_v38  ;;  %v620_v25 = vsub.f32 %v11875_v30, %v15054_v18  ;;  %v611_v7 = vand.u32 4294901760, %v610_v9  ;;  %15058 = vst [vmem:[#allocation135_spill] sm:$0xff] %v11934_v1  ;;  %v97_v48 = vld [vmem:[#allocation2 + $0x198] sm:$0xff] }
  0x91   :  { %9869 = vmatprep.subr.bf16.mxu0 %v11887_v33  ;;  %15055 = vst [vmem:[#allocation133_spill] sm:$0xff] %v11926_v20  ;;  %v630_v47 = vsub.f32 %v11879_v44, %v15057_v12  ;;  %v640_v18 = vsub.f32 %v11893_v51, %v15059_v23  ;;  %v11950_v23 = vsub.f32 %v94_v27, %v11934_v1  ;;  %v11952_v35 = vand.u32 4294901760, %v96_v49 }
  0x92   :  { %15053 = vst [vmem:[#allocation132_spill] sm:$0xff] %v11920_v56  ;;  %v621_v30 = vand.u32 4294901760, %v620_v25  ;;  %v98_v25 = vld [vmem:[#allocation2 + $0x1a0] sm:$0xff]  ;;  %v15065_v9 = vand.u32 4294901760, %v11920_v56  ;;  %v11957_v51 = vand.u32 4294901760, %v97_v48  ;;  %v651_v1 = vand.u32 4294901760, %v650_v39 }
  0x93   :  { %8355 = vmatmul.mubr.f32.gmra.mrb[36].mxu0 %v581_v24  ;;  %v95_v24 = vld [vmem:[#allocation2 + $0x188] sm:$0xff]  ;;  %v631_v44 = vand.u32 4294901760, %v630_v47  ;;  %15063 = vst [vmem:[#allocation138_spill] sm:$0xff] %v11950_v23  ;;  %15064 = vst [vmem:[#allocation139_spill] sm:$0xff] %v11952_v35  ;;  %v15067_v47 = vand.u32 4294901760, %v11926_v20 }
  0x94   :  { %8357 = vmatprep.mubr.f32.mxu0 %v591_v61  ;;  %v11942_v61 = vsub.f32 %v93_v13, %v11928_v14  ;;  %v11944_v12 = vand.u32 4294901760, %v95_v24  ;;  %v660_v13 = vsub.f32 %v11920_v56, %v15065_v9  ;;  %15066 = vst [vmem:[#allocation140_spill] sm:$0xff] %v11957_v51  ;;  %v11974_v56 = vand.u32 4294901760, %v98_v25  ;;  %v101_v9 = vld [vmem:[#allocation2 + $0x1b8] sm:$0xff] }
  0x95   :  { %v11977_v40 = vsub.f32 %v97_v48, %v11957_v51 }
  0x96   :  { %15060 = vst [vmem:[#allocation136_spill] sm:$0xff] %v11942_v61  ;;  %15061 = vst [vmem:[#allocation137_spill] sm:$0xff] %v11944_v12  ;;  %v11964_v27 = vsub.f32 %v95_v24, %v11944_v12  ;;  %v11979_v24 = vand.u32 4294901760, %v99_v60  ;;  %v11990_v51 = vsub.f32 %v98_v25, %v11974_v56 }
  0x97   :  { %8358 = vmatmul.mubr.f32.gmra.mrb[38].mxu0 %v601_v28  ;;  %v641_v28 = vand.u32 4294901760, %v640_v18  ;;  %v11968_v18 = vpack.c.bf16 %v11677_v21, %v11662_v59  ;;  %15071 = vst [vmem:[#allocation144_spill] sm:$0xff] %v11974_v56  ;;  %15072 = vst [vmem:[#allocation145_spill] sm:$0xff] %v11977_v40  ;;  %v15074_v21 = vand.u32 4294901760, %v11942_v61 }
  0x98   :  { %8360 = vmatprep.mubr.f32.mxu0 %v611_v7  ;;  %v670_v7 = vsub.f32 %v11926_v20, %v15067_v47  ;;  %15068 = vst [vmem:[#allocation141_spill] sm:$0xff] %v11964_v27  ;;  %v100_v47 = vld [vmem:[#allocation2 + $0x1b0] sm:$0xff]  ;;  %15073 = vst [vmem:[#allocation146_spill] sm:$0xff] %v11979_v24  ;;  %v661_v20 = vand.u32 4294901760, %v660_v13  ;;  %v102_v13 = vld [vmem:[#allocation2 + $0x1c0] sm:$0xff] }
  0x99   :  { %15069 = vst [vmem:[#allocation142_spill] sm:$0xff] %v11968_v18  ;;  %v680_v39 = vsub.f32 %v11942_v61, %v15074_v21  ;;  %15076 = vst [vmem:[#allocation147_spill] sm:$0xff] %v11990_v51  ;;  %v11996_v21 = vsub.f32 %v99_v60, %v11979_v24  ;;  %v15080_v61 = vand.u32 4294901760, %v11964_v27  ;;  %v12003_v48 = vand.u32 4294901760, %v102_v13  ;;  %v103_v24 = vld [vmem:[#allocation2 + $0x1c8] sm:$0xff] }
  0x9a   :  { %v671_v12 = vand.u32 4294901760, %v670_v7  ;;  %v12022_v7 = vand.u32 4294901760, %v103_v24 }
  0x9b   :  { %8361 = vmatmul.mubr.f32.gmra.mrb[40].mxu0 %v621_v30  ;;  %v11972_v30 = vsub.f32 %v96_v49, %v11952_v35  ;;  %v15075_v49 = vand.u32 4294901760, %v11950_v23  ;;  %15078 = vst [vmem:[#allocation149_spill] sm:$0xff] %v11996_v21  ;;  %15081 = vst [vmem:[#allocation151_spill] sm:$0xff] %v12003_v48 }
  0x9c   :  { %8363 = vmatprep.mubr.f32.mxu0 %v631_v44  ;;  %v11998_v44 = vand.u32 4294901760, %v101_v9  ;;  %15087 = vst [vmem:[#allocation155_spill] sm:$0xff] %v12022_v7 }
  0x9d   :  { %15070 = vst [vmem:[#allocation143_spill] sm:$0xff] %v11972_v30  ;;  %v690_v59 = vsub.f32 %v11950_v23, %v15075_v49  ;;  %v700_v49 = vsub.f32 %v11964_v27, %v15080_v61  ;;  %v15082_v23 = vand.u32 4294901760, %v11972_v30  ;;  %v105_v61 = vld [vmem:[#allocation2 + $0x1d8] sm:$0xff] }
  0x9e   :  { %15079 = vst [vmem:[#allocation150_spill] sm:$0xff] %v11998_v44 }
  0x9f   :  { %8364 = vmatmul.mubr.f32.gmra.mrb[42].mxu0 %v641_v28  ;;  %v11992_v28 = vand.u32 4294901760, %v100_v47  ;;  %v691_v25 = vand.u32 4294901760, %v690_v59  ;;  %v710_v56 = vsub.f32 %v11972_v30, %v15082_v23  ;;  %v701_v59 = vand.u32 4294901760, %v700_v49 }
  0xa0   :  { %8366 = vmatprep.mubr.f32.mxu0 %v651_v1  ;;  %v681_v1 = vand.u32 4294901760, %v680_v39  ;;  %v15084_v39 = vand.u32 4294901760, %v11977_v40  ;;  %v12020_v23 = vsub.f32 %v102_v13, %v12003_v48  ;;  %v15088_v30 = vand.u32 4294901760, %v11990_v51 }
  0xa1   :  { %15077 = vst [vmem:[#allocation148_spill] sm:$0xff] %v11992_v28  ;;  %v12010_v60 = vsub.f32 %v100_v47, %v11992_v28  ;;  %v711_v47 = vand.u32 4294901760, %v710_v56  ;;  %v107_v56 = vld [vmem:[#allocation2 + $0x1e8] sm:$0xff] }
  0xa2   :  { %v720_v35 = vsub.f32 %v11977_v40, %v15084_v39  ;;  %15086 = vst [vmem:[#allocation154_spill] sm:$0xff] %v12020_v23  ;;  %v730_v27 = vsub.f32 %v11990_v51, %v15088_v30  ;;  %v12038_v30 = vand.u32 4294901760, %v105_v61  ;;  %v12042_v39 = vpack.c.bf16 %v11749_v52, %v11740_v6 }
  0xa3   :  { %8367 = vmatmul.mubr.f32.gmra.mrb[44].mxu0 %v661_v20  ;;  %15083 = vst [vmem:[#allocation152_spill] sm:$0xff] %v12010_v60  ;;  %v104_v20 = vld [vmem:[#allocation2 + $0x1d0] sm:$0xff]  ;;  %v15094_v51 = vand.u32 4294901760, %v12010_v60 }
  0xa4   :  { %8369 = vmatprep.mubr.f32.mxu0 %v671_v12  ;;  %v12017_v12 = vsub.f32 %v101_v9, %v11998_v44  ;;  %v12028_v40 = vand.u32 4294901760, %v104_v20  ;;  %v106_v9 = vld [vmem:[#allocation2 + $0x1e0] sm:$0xff]  ;;  %v721_v44 = vand.u32 4294901760, %v720_v35  ;;  %15092 = vst [vmem:[#allocation158_spill] sm:$0xff] %v12038_v30  ;;  %15093 = vst [vmem:[#allocation159_spill] sm:$0xff] %v12042_v39  ;;  %v731_v35 = vand.u32 4294901760, %v730_v27 }
  0xa6   :  { %15085 = vst [vmem:[#allocation153_spill] sm:$0xff] %v12017_v12  ;;  %15089 = vst [vmem:[#allocation156_spill] sm:$0xff] %v12028_v40  ;;  %v12048_v49 = vsub.f32 %v104_v20, %v12028_v40  ;;  %v12062_v20 = vand.u32 4294901760, %v107_v56 }
  0xa7   :  { %8370 = vmatmul.mubr.f32.gmra.mrb[46].mxu0 %v681_v1  ;;  %v15090_v1 = vand.u32 4294901760, %v11996_v21 }
  0xa8   :  { %8372 = vmatprep.mubr.f32.mxu0 %v691_v25  ;;  %v12036_v25 = vsub.f32 %v103_v24, %v12022_v7  ;;  %15095 = vst [vmem:[#allocation160_spill] sm:$0xff] %v12048_v49  ;;  %v108_v24 = vld [vmem:[#allocation2 + $0x1f0] sm:$0xff]  ;;  %v15097_v7 = vand.u32 4294901760, %v12017_v12  ;;  %15099 = vst [vmem:[#allocation162_spill] sm:$0xff] %v12062_v20 }
  0xa9   :  { %v740_v13 = vsub.f32 %v11996_v21, %v15090_v1  ;;  %v750_v1 = vsub.f32 %v12010_v60, %v15094_v51  ;;  %v12060_v51 = vsub.f32 %v105_v61, %v12038_v30 }
  0xaa   :  { %15091 = vst [vmem:[#allocation157_spill] sm:$0xff] %v12036_v25  ;;  %v760_v48 = vsub.f32 %v12017_v12, %v15097_v7  ;;  %v14375_v52 = vand.u32 4294901760, %v12036_v25  ;;  %v12068_v7 = vand.u32 4294901760, %v108_v24 }
  0xab   :  { %8373 = vmatmul.mubr.f32.gmra.mrb[48].mxu0 %v701_v59  ;;  %v12050_v59 = vand.u32 4294901760, %v106_v9  ;;  %v741_v21 = vand.u32 4294901760, %v740_v13  ;;  %v751_v6 = vand.u32 4294901760, %v750_v1  ;;  %v14378_v13 = vand.u32 4294901760, %v12048_v49 }
  0xac   :  { %8375 = vmatprep.mubr.f32.mxu0 %v711_v47  ;;  %v15098_v47 = vand.u32 4294901760, %v12020_v23  ;;  %15100 = vst [vmem:[#allocation163_spill] sm:$0xff] %v12068_v7  ;;  %v761_v12 = vand.u32 4294901760, %v760_v48  ;;  %v14379_v61 = vand.u32 4294901760, %v12060_v51 }
  0xad   :  { %15096 = vst [vmem:[#allocation161_spill] sm:$0xff] %v12050_v59  ;;  %v12066_v60 = vsub.f32 %v106_v9, %v12050_v59  ;;  %v790_v9 = vsub.f32 %v12048_v49, %v14378_v13 }
  0xae   :  { %v770_v27 = vsub.f32 %v12020_v23, %v15098_v47  ;;  %v780_v47 = vsub.f32 %v12036_v25, %v14375_v52  ;;  %v12075_v23 = vsub.f32 %v107_v56, %v12062_v20  ;;  %v800_v56 = vsub.f32 %v12060_v51, %v14379_v61 }
  0xaf   :  { %8376 = vmatmul.mubr.f32.gmra.mrb[50].mxu0 %v721_v44  ;;  %v109_v44 = vld [vmem:[#allocation2 + $0x1f8] sm:$0xff]  ;;  %v14380_v48 = vand.u32 4294901760, %v12066_v60 }
  0xb0   :  { %8378 = vmatprep.mubr.f32.mxu0 %v731_v35  ;;  %15101 = vst [vmem:[#allocation164_spill] sm:$0xff] %v12075_v23  ;;  %v12077_v35 = vand.u32 4294901760, %v109_v44  ;;  %v771_v1 = vand.u32 4294901760, %v770_v27  ;;  %v781_v52 = vand.u32 4294901760, %v780_v47  ;;  %v14381_v25 = vand.u32 4294901760, %v12075_v23 }
  0xb1   :  { %v791_v27 = vand.u32 4294901760, %v790_v9  ;;  %v810_v13 = vsub.f32 %v12066_v60, %v14380_v48 }
  0xb2   :  { %15102 = vst [vmem:[#allocation165_spill] sm:$0xff] %v12077_v35  ;;  %v820_v47 = vsub.f32 %v12075_v23, %v14381_v25 }
  0xb3   :  { %8379 = vmatmul.mubr.f32.gmra.mrb[52].mxu0 %v741_v21  ;;  %v12084_v21 = vsub.f32 %v108_v24, %v12068_v7 }
  0xb4   :  { %8381 = vmatprep.mubr.f32.mxu0 %v751_v6  ;;  %v12091_v6 = vsub.f32 %v109_v44, %v12077_v35  ;;  %v12103_v44 = vpack.c.bf16 %v11837_v29, %v11827_v11  ;;  %v821_v48 = vand.u32 4294901760, %v820_v47  ;;  %v15110_v47 = vld [vmem:[#allocation68_spill] sm:$0xff] }
  0xb5   :  { %v14383_v24 = vand.u32 4294901760, %v12084_v21 }
  0xb6   :  { %15103 = vst [vmem:[#allocation166_spill] sm:$0xff] %v12091_v6  ;;  %v14382_v61 = vand.u32 4294901760, %v12091_v6  ;;  %15104 = vst [vmem:[#allocation167_spill] sm:$0xff] %v12103_v44 }
  0xb7   :  { %8382 = vmatmul.mubr.f32.gmra.mrb[54].mxu0 %v761_v12  ;;  %v801_v12 = vand.u32 4294901760, %v800_v56  ;;  %v830_v9 = vsub.f32 %v12084_v21, %v14383_v24  ;;  %v15116_v24 = vld [vmem:[#allocation86_spill] sm:$0xff] }
  0xb8   :  { %8384 = vmatprep.mubr.f32.mxu0 %v771_v1  ;;  %v811_v1 = vand.u32 4294901760, %v810_v13  ;;  %v12114_v13 = vpack.c.bf16 %v11337_v54, %v11332_v53 }
  0xb9   :  { %v831_v56 = vand.u32 4294901760, %v830_v9  ;;  %v15112_v9 = vld [vmem:[#allocation76_spill] sm:$0xff] }
  0xba   :  { %15105 = vst [vmem:[#allocation168_spill] sm:$0xff] %v12114_v13 }
  0xbb   :  { %8385 = vmatmul.mubr.f32.gmra.mrb[56].mxu0 %v781_v52  ;;  %v840_v52 = vsub.f32 %v12091_v6, %v14382_v61  ;;  %v15115_v61 = vld [vmem:[#allocation85_spill] sm:$0xff] }
  0xbc   :  { %8387 = vmatprep.mubr.f32.mxu0 %v791_v27  ;;  %v15108_v27 = vld [vmem:[#allocation65_spill] sm:$0xff] }
  0xbd   :  { %v841_v25 = vand.u32 4294901760, %v840_v52  ;;  %v15113_v52 = vld [vmem:[#allocation78_spill] sm:$0xff] }
  0xbf   :  { %8388 = vmatmul.mubr.f32.gmra.mrb[58].mxu0 %v801_v12  ;;  %v15109_v12 = vld [vmem:[#allocation67_spill] sm:$0xff] }
  0xc0   :  { %8390 = vmatprep.mubr.f32.mxu0 %v811_v1  ;;  %v15111_v1 = vld [vmem:[#allocation73_spill] sm:$0xff] }
  0xc3   :  { %8391 = vmatmul.mubr.f32.gmra.mrb[60].mxu0 %v821_v48  ;;  %v12122_v48 = vpack.c.bf16 %v11426_v5, %v11414_v3 }
  0xc4   :  { %8393 = vmatprep.mubr.f32.mxu0 %v831_v56  ;;  %v15114_v56 = vld [vmem:[#allocation81_spill] sm:$0xff] }
  0xc5   :  { %15106 = vst [vmem:[#allocation169_spill] sm:$0xff] %v12122_v48 }
  0xc7   :  { %8394 = vmatmul.mubr.f32.gmra.mrb[62].mxu0 %v841_v25  ;;  %v15107_v25 = vld [vmem:[#allocation63_spill] sm:$0xff] }
  0xc8   :  { %8428 = vmatprep.mubr.f32.mxu0 %v11248_v17  ;;  %v15199_v17 = vld [vmem:[#allocation141_spill] sm:$0xff] }
  0xcb   :  { %8429 = vmatmul.mubr.f32.vlgmr.msra.gmra.mrb[0].mxu0 %v11308_v41  ;;  %v15198_v41 = vld [vmem:[#allocation138_spill] sm:$0xff] }
  0xcc   :  { %9871 = vmatpush3.bf16.msra.mxu0 %v11887_v33  ;;  %8431 = vmatprep.mubr.f32.mxu0 %v11310_v42  ;;  %v15124_v33 = vld [vmem:[#allocation105_spill] sm:$0xff]  ;;  %v15197_v42 = vld [vmem:[#allocation136_spill] sm:$0xff] }
  0xcd   :  { %9873 = vmatprep.subr.bf16.mxu0 %v12114_v13 }
  0xcf   :  { %8432 = vmatmul.mubr.f32.gmra.mrb[2].mxu0 %v11346_v57  ;;  %v15195_v57 = vld [vmem:[#allocation132_spill] sm:$0xff] }
  0xd0   :  { %8434 = vmatprep.mubr.f32.mxu0 %v11348_v58  ;;  %9875 = vmatpush3.bf16.msra.mxu0 %v12114_v13  ;;  %v15123_v13 = vld [vmem:[#allocation104_spill] sm:$0xff]  ;;  %v15194_v58 = vld [vmem:[#allocation131_spill] sm:$0xff] }
  0xd1   :  { %9877 = vmatprep.subr.bf16.mxu0 %v12122_v48 }
  0xd3   :  { %8435 = vmatmul.mubr.f32.gmra.mrb[4].mxu0 %v11359_v62  ;;  %v15192_v62 = vld [vmem:[#allocation122_spill] sm:$0xff] }
  0xd4   :  { %8437 = vmatprep.mubr.f32.mxu0 %v11390_v34  ;;  %9879 = vmatpush3.bf16.msra.mxu0 %v12122_v48  ;;  %v15122_v48 = vld [vmem:[#allocation102_spill] sm:$0xff]  ;;  %v15191_v34 = vld [vmem:[#allocation121_spill] sm:$0xff] }
  0xd5   :  { %9881 = vmatprep.subr.bf16.mxu0 %v11903_v2 }
  0xd7   :  { %8438 = vmatmul.mubr.f32.gmra.mrb[6].mxu0 %v11404_v50  ;;  %v15189_v50 = vld [vmem:[#allocation116_spill] sm:$0xff] }
  0xd8   :  { %8440 = vmatprep.mubr.f32.mxu0 %v11421_v45  ;;  %9883 = vmatpush3.bf16.msra.mxu0 %v11903_v2  ;;  %v15121_v2 = vld [vmem:[#allocation97_spill] sm:$0xff]  ;;  %v15188_v45 = vld [vmem:[#allocation114_spill] sm:$0xff] }
  0xd9   :  { %9885 = vmatprep.subr.bf16.mxu0 %v11907_v15 }
  0xdb   :  { %8441 = vmatmul.mubr.f32.gmra.mrb[8].mxu0 %v11437_v26  ;;  %v15186_v26 = vld [vmem:[#allocation110_spill] sm:$0xff] }
  0xdc   :  { %8443 = vmatprep.mubr.f32.mxu0 %v11454_v63  ;;  %9887 = vmatpush3.bf16.msra.mxu0 %v11907_v15  ;;  %v15120_v15 = vld [vmem:[#allocation96_spill] sm:$0xff]  ;;  %v15185_v63 = vld [vmem:[#allocation107_spill] sm:$0xff] }
  0xdd   :  { %9889 = vmatprep.subr.bf16.mxu0 %v11968_v18 }
  0xdf   :  { %8444 = vmatmul.mubr.f32.gmra.mrb[10].mxu0 %v11468_v16  ;;  %v15183_v16 = vld [vmem:[#allocation103_spill] sm:$0xff] }
  0xe0   :  { %8446 = vmatprep.mubr.f32.mxu0 %v11481_v0  ;;  %9891 = vmatpush3.bf16.msra.mxu0 %v11968_v18  ;;  %v15119_v18 = vld [vmem:[#allocation93_spill] sm:$0xff] }
  0xe1   :  { %9893 = vmatprep.subr.bf16.mxu0 %v12042_v39  ;;  %v15182_v0 = vld [vmem:[#allocation101_spill] sm:$0xff] }
  0xe3   :  { %8447 = vmatmul.mubr.f32.gmra.mrb[12].mxu0 %v11493_v43  ;;  %v15180_v43 = vld [vmem:[#allocation95_spill] sm:$0xff] }
  0xe4   :  { %8449 = vmatprep.mubr.f32.mxu0 %v11495_v36  ;;  %9895 = vmatpush3.bf16.msra.mxu0 %v12042_v39  ;;  %v15118_v39 = vld [vmem:[#allocation91_spill] sm:$0xff]  ;;  %v15179_v36 = vld [vmem:[#allocation92_spill] sm:$0xff] }
  0xe5   :  { %9897 = vmatprep.subr.bf16.mxu0 %v12103_v44 }
  0xe7   :  { %8450 = vmatmul.mubr.f32.gmra.mrb[14].mxu0 %v11505_v8  ;;  %v15177_v8 = vld [vmem:[#allocation89_spill] sm:$0xff] }
  0xe8   :  { %8452 = vmatprep.mubr.f32.mxu0 %v11518_v32  ;;  %9899 = vmatpush3.bf16.msra.mxu0 %v12103_v44  ;;  %v15117_v44 = vld [vmem:[#allocation88_spill] sm:$0xff]  ;;  %v15176_v32 = vld [vmem:[#allocation87_spill] sm:$0xff] }
  0xe9   :  { %9901 = vmatprep.subr.bf16.mxu0 %v11231_v10 }
  0xeb   :  { %8453 = vmatmul.mubr.f32.gmra.mrb[16].mxu0 %v11542_v19  ;;  %v15175_v19 = vld [vmem:[#allocation83_spill] sm:$0xff] }
  0xec   :  { %8455 = vmatprep.mubr.f32.mxu0 %v11556_v31  ;;  %v15170_v31 = vld [vmem:[#allocation72_spill] sm:$0xff] }
  0xef   :  { %8456 = vmatmul.mubr.f32.gmra.mrb[18].mxu0 %v15107_v25  ;;  %v15169_v25 = vld [vmem:[#allocation70_spill] sm:$0xff] }
  0xf0   :  { %8458 = vmatprep.mubr.f32.mxu0 %v15108_v27  ;;  %v15168_v27 = vld [vmem:[#allocation64_spill] sm:$0xff] }
  0xf3   :  { %8459 = vmatmul.mubr.f32.gmra.mrb[20].mxu0 %v15109_v12  ;;  %v15167_v12 = vld [vmem:[#allocation62_spill] sm:$0xff] }
  0xf4   :  { %8461 = vmatprep.mubr.f32.mxu0 %v15110_v47  ;;  %v15166_v47 = vld [vmem:[#allocation60_spill] sm:$0xff] }
  0xf7   :  { %8462 = vmatmul.mubr.f32.gmra.mrb[22].mxu0 %v15111_v1  ;;  %v15165_v1 = vld [vmem:[#allocation58_spill] sm:$0xff] }
  0xf8   :  { %8464 = vmatprep.mubr.f32.mxu0 %v15112_v9 }
  0xfb   :  { %8465 = vmatmul.mubr.f32.gmra.mrb[24].mxu0 %v15113_v52 }
  0xfc   :  { %8467 = vmatprep.mubr.f32.mxu0 %v15114_v56  ;;  %v15125_v56 = vld [vmem:[#allocation108_spill] sm:$0xff] }
  0xff   :  { %8468 = vmatmul.mubr.f32.gmra.mrb[26].mxu0 %v15115_v61  ;;  %v15126_v61 = vld [vmem:[#allocation111_spill] sm:$0xff] }
 0x100   :  { %8470 = vmatprep.mubr.f32.mxu0 %v15116_v24  ;;  %v15127_v24 = vld [vmem:[#allocation113_spill] sm:$0xff] }
 0x103   :  { %8471 = vmatmul.mubr.f32.gmra.mrb[28].mxu0 %v15117_v44  ;;  %v15128_v44 = vld [vmem:[#allocation115_spill] sm:$0xff] }
 0x104   :  { %8473 = vmatprep.mubr.f32.mxu0 %v15118_v39  ;;  %v15162_v39 = vld [vmem:[#allocation19_spill] sm:$0xff] }
 0x105   :  { %v15163_v52 = vand.u32 4294901760, %v15162_v39  ;;  %v15173_v39 = vld [vmem:[#allocation77_spill] sm:$0xff] }
 0x107   :  { %8474 = vmatmul.mubr.f32.gmra.mrb[30].mxu0 %v15119_v18 }
 0x108   :  { %8476 = vmatprep.mubr.f32.mxu0 %v15120_v15  ;;  %v15160_v15 = vld [vmem:[#allocation18_spill] sm:$0xff] }
 0x109   :  { %v15161_v18 = vand.u32 4294901760, %v15160_v15  ;;  %v15171_v15 = vld [vmem:[#allocation74_spill] sm:$0xff] }
 0x10b   :  { %8477 = vmatmul.mubr.f32.gmra.mrb[32].mxu0 %v15121_v2  ;;  %v15159_v2 = vld [vmem:[#allocation31_spill] sm:$0xff]  ;;  %v12232_v9 = vpack.c.bf16 %v15163_v52, %v15161_v18  ;;  %v15174_v52 = vld [vmem:[#allocation80_spill] sm:$0xff] }
 0x10c   :  { %8479 = vmatprep.mubr.f32.mxu0 %v15122_v48  ;;  %v15158_v48 = vld [vmem:[#allocation54_spill] sm:$0xff]  ;;  %v15172_v18 = vld [vmem:[#allocation75_spill] sm:$0xff] }
 0x10f   :  { %8480 = vmatmul.mubr.f32.gmra.mrb[34].mxu0 %v15123_v13  ;;  %v15157_v13 = vld [vmem:[#allocation53_spill] sm:$0xff] }
 0x110   :  { %8482 = vmatprep.mubr.f32.mxu0 %v15124_v33  ;;  %v15156_v33 = vld [vmem:[#allocation27_spill] sm:$0xff] }
 0x113   :  { %8483 = vmatmul.mubr.f32.gmra.mrb[36].mxu0 %v15125_v56  ;;  %v15129_v56 = vld [vmem:[#allocation135_spill] sm:$0xff] }
 0x114   :  { %8485 = vmatprep.mubr.f32.mxu0 %v15126_v61  ;;  %v15130_v61 = vld [vmem:[#allocation137_spill] sm:$0xff] }
 0x117   :  { %8486 = vmatmul.mubr.f32.gmra.mrb[38].mxu0 %v15127_v24  ;;  %v15131_v24 = vld [vmem:[#allocation139_spill] sm:$0xff] }
 0x118   :  { %8488 = vmatprep.mubr.f32.mxu0 %v15128_v44  ;;  %v15132_v44 = vld [vmem:[#allocation140_spill] sm:$0xff] }
 0x11b   :  { %8489 = vmatmul.mubr.f32.gmra.mrb[40].mxu0 %v11852_v4  ;;  %v15133_v4 = vld [vmem:[#allocation144_spill] sm:$0xff] }
 0x11c   :  { %8491 = vmatprep.mubr.f32.mxu0 %v11860_v46  ;;  %v15134_v46 = vld [vmem:[#allocation146_spill] sm:$0xff] }
 0x11f   :  { %8492 = vmatmul.mubr.f32.gmra.mrb[42].mxu0 %v11869_v37  ;;  %v15155_v37 = vld [vmem:[#allocation51_spill] sm:$0xff] }
 0x120   :  { %8494 = vmatprep.mubr.f32.mxu0 %v11881_v22  ;;  %v15135_v22 = vld [vmem:[#allocation150_spill] sm:$0xff] }
 0x123   :  { %8495 = vmatmul.mubr.f32.gmra.mrb[44].mxu0 %v11895_v38  ;;  %v15136_v38 = vld [vmem:[#allocation151_spill] sm:$0xff] }
 0x124   :  { %8497 = vmatprep.mubr.f32.mxu0 %v11899_v55  ;;  %v15137_v55 = vld [vmem:[#allocation155_spill] sm:$0xff] }
 0x127   :  { %8498 = vmatmul.mubr.f32.gmra.mrb[46].mxu0 %v11928_v14  ;;  %v15154_v14 = vld [vmem:[#allocation48_spill] sm:$0xff] }
 0x128   :  { %8500 = vmatprep.mubr.f32.mxu0 %v15129_v56  ;;  %v15153_v56 = vld [vmem:[#allocation22_spill] sm:$0xff] }
 0x12b   :  { %8501 = vmatmul.mubr.f32.gmra.mrb[48].mxu0 %v15130_v61  ;;  %v15152_v61 = vld [vmem:[#allocation45_spill] sm:$0xff] }
 0x12c   :  { %8503 = vmatprep.mubr.f32.mxu0 %v15131_v24  ;;  %v15151_v24 = vld [vmem:[#allocation43_spill] sm:$0xff] }
 0x12f   :  { %8504 = vmatmul.mubr.f32.gmra.mrb[50].mxu0 %v15132_v44  ;;  %v15150_v44 = vld [vmem:[#allocation17_spill] sm:$0xff] }
 0x130   :  { %8506 = vmatprep.mubr.f32.mxu0 %v15133_v4  ;;  %v15149_v4 = vld [vmem:[#allocation40_spill] sm:$0xff] }
 0x133   :  { %8507 = vmatmul.mubr.f32.gmra.mrb[52].mxu0 %v15134_v46  ;;  %v15138_v46 = vld [vmem:[#allocation15_spill] sm:$0xff] }
 0x134   :  { %8509 = vmatprep.mubr.f32.mxu0 %v11992_v28  ;;  %v15139_v28 = vld [vmem:[#allocation23_spill] sm:$0xff]  ;;  %15164 = vst [vmem:[#allocation15_spill] sm:$0xff] %v12232_v9 }
 0x137   :  { %8510 = vmatmul.mubr.f32.gmra.mrb[54].mxu0 %v15135_v22  ;;  %v15148_v22 = vld [vmem:[#allocation38_spill] sm:$0xff] }
 0x138   :  { %8512 = vmatprep.mubr.f32.mxu0 %v15136_v38  ;;  %v15140_v38 = vld [vmem:[#allocation24_spill] sm:$0xff] }
 0x13b   :  { %8513 = vmatmul.mubr.f32.gmra.mrb[56].mxu0 %v15137_v55  ;;  %v15141_v55 = vld [vmem:[#allocation12_spill] sm:$0xff] }
 0x13c   :  { %8515 = vmatprep.mubr.f32.mxu0 %v12028_v40  ;;  %v15142_v40 = vld [vmem:[#allocation29_spill] sm:$0xff] }
 0x13f   :  { %8516 = vmatmul.mubr.f32.gmra.mrb[58].mxu0 %v12038_v30  ;;  %v15143_v30 = vld [vmem:[#allocation30_spill] sm:$0xff] }
 0x140   :  { %8518 = vmatprep.mubr.f32.mxu0 %v12050_v59  ;;  %v15147_v59 = vld [vmem:[#allocation16_spill] sm:$0xff] }
 0x143   :  { %8519 = vmatmul.mubr.f32.gmra.mrb[60].mxu0 %v12062_v20  ;;  %v15144_v20 = vld [vmem:[#allocation14_spill] sm:$0xff] }
 0x144   :  { %8521 = vmatprep.mubr.f32.mxu0 %v12068_v7  ;;  %v15145_v7 = vld [vmem:[#allocation32_spill] sm:$0xff] }
 0x147   :  { %8522 = vmatmul.mubr.f32.gmra.mrb[62].mxu0 %v12077_v35  ;;  %v15146_v35 = vld [vmem:[#allocation35_spill] sm:$0xff] }
 0x148   :  { %8556 = vmatprep.mubr.f32.mxu0 %v15138_v46 }
 0x14b   :  { %8557 = vmatmul.mubr.f32.vlgmr.msra.gmra.mrb[0].mxu0 %v15139_v28 }
 0x14c   :  { %9903 = vmatpush3.bf16.msra.mxu0 %v11231_v10  ;;  %8559 = vmatprep.mubr.f32.mxu0 %v15140_v38 }
 0x14d   :  { %9905 = vmatprep.subr.bf16.mxu0 %v15141_v55 }
 0x14f   :  { %8560 = vmatmul.mubr.f32.gmra.mrb[2].mxu0 %v15142_v40 }
 0x150   :  { %8562 = vmatprep.mubr.f32.mxu0 %v15143_v30  ;;  %9907 = vmatpush3.bf16.msra.mxu0 %v15141_v55  ;;  %v15196_v55 = vld [vmem:[#allocation133_spill] sm:$0xff] }
 0x151   :  { %9909 = vmatprep.subr.bf16.mxu0 %v15144_v20 }
 0x153   :  { %8563 = vmatmul.mubr.f32.gmra.mrb[4].mxu0 %v15145_v7 }
 0x154   :  { %8565 = vmatprep.mubr.f32.mxu0 %v15146_v35  ;;  %9911 = vmatpush3.bf16.msra.mxu0 %v15144_v20  ;;  %v15193_v20 = vld [vmem:[#allocation126_spill] sm:$0xff] }
 0x155   :  { %9913 = vmatprep.subr.bf16.mxu0 %v15147_v59 }
 0x157   :  { %8566 = vmatmul.mubr.f32.gmra.mrb[6].mxu0 %v15148_v22 }
 0x158   :  { %8568 = vmatprep.mubr.f32.mxu0 %v15149_v4  ;;  %9915 = vmatpush3.bf16.msra.mxu0 %v15147_v59  ;;  %v15190_v59 = vld [vmem:[#allocation118_spill] sm:$0xff] }
 0x159   :  { %9917 = vmatprep.subr.bf16.mxu0 %v15150_v44 }
 0x15b   :  { %8569 = vmatmul.mubr.f32.gmra.mrb[8].mxu0 %v15151_v24 }
 0x15c   :  { %8571 = vmatprep.mubr.f32.mxu0 %v15152_v61  ;;  %9919 = vmatpush3.bf16.msra.mxu0 %v15150_v44  ;;  %v15187_v44 = vld [vmem:[#allocation112_spill] sm:$0xff] }
 0x15d   :  { %9921 = vmatprep.subr.bf16.mxu0 %v15153_v56 }
 0x15f   :  { %8572 = vmatmul.mubr.f32.gmra.mrb[10].mxu0 %v15154_v14 }
 0x160   :  { %8574 = vmatprep.mubr.f32.mxu0 %v15155_v37  ;;  %9923 = vmatpush3.bf16.msra.mxu0 %v15153_v56  ;;  %v15184_v56 = vld [vmem:[#allocation106_spill] sm:$0xff] }
 0x161   :  { %9925 = vmatprep.subr.bf16.mxu0 %v15156_v33 }
 0x163   :  { %8575 = vmatmul.mubr.f32.gmra.mrb[12].mxu0 %v15157_v13 }
 0x164   :  { %8577 = vmatprep.mubr.f32.mxu0 %v15158_v48  ;;  %9927 = vmatpush3.bf16.msra.mxu0 %v15156_v33  ;;  %v15181_v33 = vld [vmem:[#allocation99_spill] sm:$0xff] }
 0x165   :  { %9929 = vmatprep.subr.bf16.mxu0 %v15159_v2 }
 0x167   :  { %8578 = vmatmul.mubr.f32.gmra.mrb[14].mxu0 %v15165_v1 }
 0x168   :  { %8580 = vmatprep.mubr.f32.mxu0 %v15166_v47  ;;  %9931 = vmatpush3.bf16.msra.mxu0 %v15159_v2  ;;  %v15178_v2 = vld [vmem:[#allocation90_spill] sm:$0xff] }
 0x169   :  { %9933 = vmatprep.subr.bf16.mxu0 %v12232_v9 }
 0x16b   :  { %8581 = vmatmul.mubr.f32.gmra.mrb[16].mxu0 %v15167_v12 }
 0x16c   :  { %8583 = vmatprep.mubr.f32.mxu0 %v15168_v27 }
 0x16f   :  { %8584 = vmatmul.mubr.f32.gmra.mrb[18].mxu0 %v15169_v25 }
 0x170   :  { %8586 = vmatprep.mubr.f32.mxu0 %v15170_v31 }
 0x173   :  { %8587 = vmatmul.mubr.f32.gmra.mrb[20].mxu0 %v15171_v15 }
 0x174   :  { %8589 = vmatprep.mubr.f32.mxu0 %v15172_v18 }
 0x177   :  { %8590 = vmatmul.mubr.f32.gmra.mrb[22].mxu0 %v15173_v39 }
 0x178   :  { %8592 = vmatprep.mubr.f32.mxu0 %v15174_v52 }
 0x17b   :  { %8593 = vmatmul.mubr.f32.gmra.mrb[24].mxu0 %v15175_v19 }
 0x17c   :  { %8595 = vmatprep.mubr.f32.mxu0 %v15176_v32 }
 0x17f   :  { %8596 = vmatmul.mubr.f32.gmra.mrb[26].mxu0 %v15177_v8 }
 0x180   :  { %8598 = vmatprep.mubr.f32.mxu0 %v15178_v2 }
 0x183   :  { %8599 = vmatmul.mubr.f32.gmra.mrb[28].mxu0 %v15179_v36 }
 0x184   :  { %8601 = vmatprep.mubr.f32.mxu0 %v15180_v43 }
 0x187   :  { %8602 = vmatmul.mubr.f32.gmra.mrb[30].mxu0 %v15181_v33 }
 0x188   :  { %8604 = vmatprep.mubr.f32.mxu0 %v15182_v0 }
 0x18b   :  { %8605 = vmatmul.mubr.f32.gmra.mrb[32].mxu0 %v15183_v16 }
 0x18c   :  { %8607 = vmatprep.mubr.f32.mxu0 %v15184_v56 }
 0x18f   :  { %8608 = vmatmul.mubr.f32.gmra.mrb[34].mxu0 %v15185_v63 }
 0x190   :  { %8610 = vmatprep.mubr.f32.mxu0 %v15186_v26 }
 0x193   :  { %8611 = vmatmul.mubr.f32.gmra.mrb[36].mxu0 %v15187_v44 }
 0x194   :  { %8613 = vmatprep.mubr.f32.mxu0 %v15188_v45 }
 0x197   :  { %8614 = vmatmul.mubr.f32.gmra.mrb[38].mxu0 %v15189_v50  ;;  %v15200_v50 = vld [vmem:[#allocation143_spill] sm:$0xff] }
 0x198   :  { %8616 = vmatprep.mubr.f32.mxu0 %v15190_v59  ;;  %v15201_v59 = vld [vmem:[#allocation145_spill] sm:$0xff] }
 0x19b   :  { %8617 = vmatmul.mubr.f32.gmra.mrb[40].mxu0 %v15191_v34  ;;  %v15202_v34 = vld [vmem:[#allocation147_spill] sm:$0xff] }
 0x19c   :  { %8619 = vmatprep.mubr.f32.mxu0 %v15192_v62  ;;  %v15203_v62 = vld [vmem:[#allocation149_spill] sm:$0xff] }
 0x19f   :  { %8620 = vmatmul.mubr.f32.gmra.mrb[42].mxu0 %v15193_v20  ;;  %v15204_v20 = vld [vmem:[#allocation152_spill] sm:$0xff] }
 0x1a0   :  { %8622 = vmatprep.mubr.f32.mxu0 %v15194_v58  ;;  %v15205_v58 = vld [vmem:[#allocation153_spill] sm:$0xff] }
 0x1a3   :  { %8623 = vmatmul.mubr.f32.gmra.mrb[44].mxu0 %v15195_v57  ;;  %v15206_v57 = vld [vmem:[#allocation154_spill] sm:$0xff] }
 0x1a4   :  { %8625 = vmatprep.mubr.f32.mxu0 %v15196_v55  ;;  %v15207_v55 = vld [vmem:[#allocation157_spill] sm:$0xff] }
 0x1a7   :  { %8626 = vmatmul.mubr.f32.gmra.mrb[46].mxu0 %v15197_v42 }
 0x1a8   :  { %8628 = vmatprep.mubr.f32.mxu0 %v15198_v41 }
 0x1ab   :  { %8629 = vmatmul.mubr.f32.gmra.mrb[48].mxu0 %v15199_v17 }
 0x1ac   :  { %8631 = vmatprep.mubr.f32.mxu0 %v15200_v50 }
 0x1af   :  { %8632 = vmatmul.mubr.f32.gmra.mrb[50].mxu0 %v15201_v59 }
 0x1b0   :  { %8634 = vmatprep.mubr.f32.mxu0 %v15202_v34 }
 0x1b3   :  { %8635 = vmatmul.mubr.f32.gmra.mrb[52].mxu0 %v15203_v62 }
 0x1b4   :  { %8637 = vmatprep.mubr.f32.mxu0 %v15204_v20  ;;  %v15208_v20 = vand.u32 4294901760, %v15138_v46  ;;  %v15215_v46 = vand.u32 4294901760, %v11426_v5  ;;  %v15225_v5 = vand.u32 4294901760, %v15146_v35 }
 0x1b7   :  { %8638 = vmatmul.mubr.f32.gmra.mrb[54].mxu0 %v15205_v58  ;;  %v15209_v58 = vand.u32 4294901760, %v11332_v53  ;;  %v15217_v53 = vand.u32 4294901760, %v15142_v40  ;;  %v15226_v40 = vld [vmem:[#allocation69_spill] sm:$0xff] }
 0x1b8   :  { %8640 = vmatprep.mubr.f32.mxu0 %v15206_v57  ;;  %v15210_v57 = vand.u32 4294901760, %v11337_v54  ;;  %v15218_v54 = vand.u32 4294901760, %v15143_v30  ;;  %v15228_v30 = vld [vmem:[#allocation71_spill] sm:$0xff] }
 0x1bb   :  { %8641 = vmatmul.mubr.f32.gmra.mrb[56].mxu0 %v15207_v55  ;;  %v12291_v55 = vpack.c.bf16 %v15210_v57, %v15209_v58  ;;  %v15219_v57 = vld [vmem:[#allocation56_spill] sm:$0xff] }
 0x1bc   :  { %8643 = vmatprep.mubr.f32.mxu0 %v12048_v49  ;;  %v15212_v49 = vand.u32 4294901760, %v15139_v28  ;;  %v15220_v58 = vand.u32 4294901760, %v15219_v57  ;;  %v15235_v57 = vld [vmem:[#allocation84_spill] sm:$0xff] }
 0x1bd   :  { %15211 = vst [vmem:[#allocation23_spill] sm:$0xff] %v12291_v55 }
 0x1bf   :  { %8644 = vmatmul.mubr.f32.gmra.mrb[58].mxu0 %v12060_v51 }
 0x1c0   :  { %8646 = vmatprep.mubr.f32.mxu0 %v12066_v60 }
 0x1c3   :  { %8647 = vmatmul.mubr.f32.gmra.mrb[60].mxu0 %v12075_v23  ;;  %v15213_v23 = vand.u32 4294901760, %v15140_v38  ;;  %v15221_v38 = vld [vmem:[#allocation57_spill] sm:$0xff] }
 0x1c4   :  { %8649 = vmatprep.mubr.f32.mxu0 %v12084_v21  ;;  %v15222_v28 = vand.u32 4294901760, %v15221_v38 }
 0x1c7   :  { %8650 = vmatmul.mubr.f32.gmra.mrb[62].mxu0 %v12091_v6  ;;  %v15214_v6 = vand.u32 4294901760, %v11414_v3  ;;  %v15224_v3 = vand.u32 4294901760, %v15145_v7  ;;  %v15233_v7 = vld [vmem:[#allocation82_spill] sm:$0xff] }
 0x1c8   :  { %8684 = vmatprep.mubr.f32.mxu0 %v15208_v20  ;;  %v15234_v35 = vand.u32 4294901760, %v15233_v7  ;;  %v15251_v7 = vand.u32 4294901760, %v15158_v48  ;;  %v15257_v48 = vand.u32 4294901760, %v15170_v31  ;;  %v15264_v31 = vand.u32 4294901760, %v15177_v8 }
 0x1c9   :  { %v12303_v20 = vpack.c.bf16 %v15215_v46, %v15214_v6  ;;  %v15229_v6 = vand.u32 4294901760, %v15228_v30  ;;  %v15245_v30 = vand.u32 4294901760, %v15154_v14  ;;  %v15252_v14 = vand.u32 4294901760, %v15165_v1 }
 0x1ca   :  { %v15258_v1 = vand.u32 4294901760, %v15171_v15  ;;  %v15265_v15 = vand.u32 4294901760, %v15178_v2  ;;  %v15271_v8 = vand.u32 4294901760, %v15184_v56  ;;  %v15272_v2 = vand.u32 4294901760, %v15185_v63  ;;  %v15280_v56 = vld [vmem:[#allocation121_spill] sm:$0xff]  ;;  %v15282_v63 = vld [vmem:[#allocation122_spill] sm:$0xff] }
 0x1cb   :  { %8685 = vmatmul.mubr.f32.vlgmr.msra.gmra.mrb[0].mxu0 %v15212_v49  ;;  %15216 = vst [vmem:[#allocation24_spill] sm:$0xff] %v12303_v20  ;;  %v15227_v49 = vand.u32 4294901760, %v15226_v40 }
 0x1cc   :  { %9935 = vmatpush3.bf16.msra.mxu0 %v12232_v9  ;;  %8687 = vmatprep.mubr.f32.mxu0 %v15213_v23  ;;  %v12315_v23 = vpack.c.bf16 %v15222_v28, %v15220_v58  ;;  %v15236_v58 = vand.u32 4294901760, %v15235_v57  ;;  %v15238_v28 = vand.u32 4294901760, %v15151_v24  ;;  %v15248_v24 = vand.u32 4294901760, %v11837_v29  ;;  %v15378_v9 = vld [vmem:[#allocation150_spill] sm:$0xff] }
 0x1cd   :  { %9937 = vmatprep.subr.bf16.mxu0 %v12291_v55  ;;  %v12327_v46 = vpack.c.bf16 %v15229_v6, %v15227_v49  ;;  %v15246_v6 = vand.u32 4294901760, %v15155_v37  ;;  %v15253_v37 = vand.u32 4294901760, %v15166_v47  ;;  %v15254_v29 = vand.u32 4294901760, %v15167_v12 }
 0x1ce   :  { %15223 = vst [vmem:[#allocation29_spill] sm:$0xff] %v12315_v23  ;;  %v12339_v38 = vpack.c.bf16 %v15236_v58, %v15234_v35  ;;  %v15259_v47 = vand.u32 4294901760, %v15172_v18  ;;  %v15260_v35 = vand.u32 4294901760, %v15173_v39  ;;  %v15261_v12 = vand.u32 4294901760, %v15174_v52 }
 0x1cf   :  { %8688 = vmatmul.mubr.f32.gmra.mrb[2].mxu0 %v15217_v53  ;;  %15230 = vst [vmem:[#allocation30_spill] sm:$0xff] %v12327_v46  ;;  %v15231_v53 = vand.u32 4294901760, %v15148_v22  ;;  %v15240_v22 = vld [vmem:[#allocation98_spill] sm:$0xff]  ;;  %v15266_v18 = vand.u32 4294901760, %v15179_v36  ;;  %v15267_v39 = vand.u32 4294901760, %v15180_v43  ;;  %v15268_v52 = vand.u32 4294901760, %v15181_v33 }
 0x1d0   :  { %8690 = vmatprep.mubr.f32.mxu0 %v15218_v54  ;;  %9939 = vmatpush3.bf16.msra.mxu0 %v12291_v55  ;;  %v15232_v54 = vand.u32 4294901760, %v15149_v4  ;;  %15237 = vst [vmem:[#allocation32_spill] sm:$0xff] %v12339_v38  ;;  %v15241_v4 = vand.u32 4294901760, %v15240_v22  ;;  %v15273_v36 = vand.u32 4294901760, %v15186_v26  ;;  %v15274_v43 = vand.u32 4294901760, %v15187_v44  ;;  %v15284_v26 = vld [vmem:[#allocation126_spill] sm:$0xff] }
 0x1d1   :  { %9941 = vmatprep.subr.bf16.mxu0 %v12303_v20  ;;  %v15275_v33 = vand.u32 4294901760, %v15188_v45  ;;  %v15285_v22 = vand.u32 4294901760, %v15284_v26  ;;  %v15286_v44 = vld [vmem:[#allocation131_spill] sm:$0xff]  ;;  %v15288_v45 = vld [vmem:[#allocation132_spill] sm:$0xff] }
 0x1d2   :  { %v15339_v26 = vld [vmem:[#allocation55_spill] sm:$0xff]  ;;  %v15377_v55 = vld [vmem:[#allocation148_spill] sm:$0xff] }
 0x1d3   :  { %8691 = vmatmul.mubr.f32.gmra.mrb[4].mxu0 %v15224_v3  ;;  %v15239_v3 = vand.u32 4294901760, %v15152_v61  ;;  %v15247_v61 = vand.u32 4294901760, %v11827_v11  ;;  %v15255_v11 = vand.u32 4294901760, %v15168_v27  ;;  %v15262_v27 = vand.u32 4294901760, %v15175_v19 }
 0x1d4   :  { %8693 = vmatprep.mubr.f32.mxu0 %v15225_v5  ;;  %9943 = vmatpush3.bf16.msra.mxu0 %v12303_v20  ;;  %v15242_v5 = vld [vmem:[#allocation100_spill] sm:$0xff]  ;;  %v15269_v19 = vand.u32 4294901760, %v15182_v0  ;;  %v15376_v20 = vld [vmem:[#allocation146_spill] sm:$0xff] }
 0x1d5   :  { %9945 = vmatprep.subr.bf16.mxu0 %v12315_v23  ;;  %v15243_v40 = vand.u32 4294901760, %v15242_v5  ;;  %v15276_v0 = vld [vmem:[#allocation116_spill] sm:$0xff]  ;;  %v15289_v5 = vand.u32 4294901760, %v15288_v45  ;;  %v15343_v45 = vld [vmem:[#allocation65_spill] sm:$0xff] }
 0x1d6   :  { %v15277_v57 = vand.u32 4294901760, %v15276_v0  ;;  %v15331_v0 = vld [vmem:[#allocation22_spill] sm:$0xff] }
 0x1d7   :  { %8694 = vmatmul.mubr.f32.gmra.mrb[6].mxu0 %v15231_v53  ;;  %v12351_v49 = vpack.c.bf16 %v15243_v40, %v15241_v4  ;;  %v12363_v53 = vpack.c.bf16 %v15248_v24, %v15247_v61  ;;  %v15287_v4 = vand.u32 4294901760, %v15286_v44  ;;  %v15290_v40 = vld [vmem:[#allocation133_spill] sm:$0xff]  ;;  %v15293_v61 = vand.u32 4294901760, %v15198_v41 }
 0x1d8   :  { %8696 = vmatprep.mubr.f32.mxu0 %v15232_v54  ;;  %9947 = vmatpush3.bf16.msra.mxu0 %v12315_v23  ;;  %v15250_v54 = vand.u32 4294901760, %v15157_v13  ;;  %v15256_v13 = vand.u32 4294901760, %v15169_v25  ;;  %v15263_v25 = vand.u32 4294901760, %v15176_v32  ;;  %v15270_v32 = vand.u32 4294901760, %v15183_v16  ;;  %v15278_v16 = vld [vmem:[#allocation118_spill] sm:$0xff]  ;;  %v15301_v41 = vld [vmem:[#allocation153_spill] sm:$0xff] }
 0x1d9   :  { %9949 = vmatprep.subr.bf16.mxu0 %v12327_v46  ;;  %15244 = vst [vmem:[#allocation35_spill] sm:$0xff] %v12351_v49  ;;  %15249 = vst [vmem:[#allocation38_spill] sm:$0xff] %v12363_v53  ;;  %v15279_v58 = vand.u32 4294901760, %v15278_v16  ;;  %v15294_v24 = vand.u32 4294901760, %v15199_v17  ;;  %v15303_v17 = vld [vmem:[#allocation154_spill] sm:$0xff]  ;;  %v15341_v44 = vld [vmem:[#allocation61_spill] sm:$0xff] }
 0x1da   :  { %v15333_v16 = vld [vmem:[#allocation46_spill] sm:$0xff]  ;;  %v15375_v23 = vld [vmem:[#allocation144_spill] sm:$0xff] }
 0x1db   :  { %8697 = vmatmul.mubr.f32.gmra.mrb[8].mxu0 %v15238_v28  ;;  %v15281_v28 = vand.u32 4294901760, %v15280_v56  ;;  %v15335_v56 = vld [vmem:[#allocation49_spill] sm:$0xff] }
 0x1dc   :  { %8699 = vmatprep.mubr.f32.mxu0 %v15239_v3  ;;  %9951 = vmatpush3.bf16.msra.mxu0 %v12327_v46  ;;  %v15283_v3 = vand.u32 4294901760, %v15282_v63  ;;  %v15337_v63 = vld [vmem:[#allocation31_spill] sm:$0xff]  ;;  %v15374_v46 = vld [vmem:[#allocation140_spill] sm:$0xff] }
 0x1dd   :  { %9953 = vmatprep.subr.bf16.mxu0 %v12339_v38 }
 0x1df   :  { %8700 = vmatmul.mubr.f32.gmra.mrb[10].mxu0 %v15245_v30  ;;  %v15291_v30 = vand.u32 4294901760, %v15290_v40  ;;  %v15345_v40 = vld [vmem:[#allocation68_spill] sm:$0xff] }
 0x1e0   :  { %8702 = vmatprep.mubr.f32.mxu0 %v15246_v6  ;;  %9955 = vmatpush3.bf16.msra.mxu0 %v12339_v38  ;;  %v15292_v6 = vand.u32 4294901760, %v15197_v42  ;;  %v15299_v42 = vld [vmem:[#allocation152_spill] sm:$0xff]  ;;  %v15373_v38 = vld [vmem:[#allocation139_spill] sm:$0xff] }
 0x1e1   :  { %9957 = vmatprep.subr.bf16.mxu0 %v12351_v49 }
 0x1e3   :  { %8703 = vmatmul.mubr.f32.gmra.mrb[12].mxu0 %v15250_v54  ;;  %v15295_v54 = vand.u32 4294901760, %v15200_v50  ;;  %v15305_v50 = vld [vmem:[#allocation157_spill] sm:$0xff] }
 0x1e4   :  { %8705 = vmatprep.mubr.f32.mxu0 %v15251_v7  ;;  %9959 = vmatpush3.bf16.msra.mxu0 %v12351_v49  ;;  %v15296_v7 = vand.u32 4294901760, %v15201_v59  ;;  %v15307_v59 = vld [vmem:[#allocation160_spill] sm:$0xff]  ;;  %v15372_v49 = vld [vmem:[#allocation137_spill] sm:$0xff] }
 0x1e5   :  { %9961 = vmatprep.subr.bf16.mxu0 %v12363_v53 }
 0x1e7   :  { %8706 = vmatmul.mubr.f32.gmra.mrb[14].mxu0 %v15252_v14  ;;  %v15297_v14 = vand.u32 4294901760, %v15202_v34  ;;  %v15309_v34 = vand.u32 4294901760, %v12060_v51  ;;  %v15318_v51 = vld [vmem:[#allocation21_spill] sm:$0xff] }
 0x1e8   :  { %8708 = vmatprep.mubr.f32.mxu0 %v15253_v37  ;;  %9963 = vmatpush3.bf16.msra.mxu0 %v12363_v53  ;;  %v15298_v37 = vand.u32 4294901760, %v15203_v62  ;;  %v15310_v62 = vand.u32 4294901760, %v12066_v60  ;;  %v15320_v60 = vld [vmem:[#allocation25_spill] sm:$0xff]  ;;  %v15371_v53 = vld [vmem:[#allocation135_spill] sm:$0xff] }
 0x1e9   :  { %9965 = vmatprep.subr.bf16.mxu0 %v11231_v10 }
 0x1eb   :  { %8709 = vmatmul.mubr.f32.gmra.mrb[16].mxu0 %v15254_v29  ;;  %v15300_v29 = vand.u32 4294901760, %v15299_v42  ;;  %v15354_v42 = vld [vmem:[#allocation93_spill] sm:$0xff] }
 0x1ec   :  { %8711 = vmatprep.mubr.f32.mxu0 %v15255_v11  ;;  %v15302_v11 = vand.u32 4294901760, %v15301_v41  ;;  %v15356_v41 = vld [vmem:[#allocation97_spill] sm:$0xff] }
 0x1ef   :  { %8712 = vmatmul.mubr.f32.gmra.mrb[18].mxu0 %v15256_v13  ;;  %v15304_v13 = vand.u32 4294901760, %v15303_v17  ;;  %v15358_v17 = vld [vmem:[#allocation104_spill] sm:$0xff] }
 0x1f0   :  { %8714 = vmatprep.mubr.f32.mxu0 %v15257_v48  ;;  %v15306_v48 = vand.u32 4294901760, %v15305_v50  ;;  %v15360_v50 = vld [vmem:[#allocation108_spill] sm:$0xff] }
 0x1f3   :  { %8715 = vmatmul.mubr.f32.gmra.mrb[20].mxu0 %v15258_v1  ;;  %v15308_v1 = vand.u32 4294901760, %v15307_v59  ;;  %v15362_v59 = vld [vmem:[#allocation113_spill] sm:$0xff] }
 0x1f4   :  { %8717 = vmatprep.mubr.f32.mxu0 %v15259_v47  ;;  %v15311_v47 = vld [vmem:[#allocation164_spill] sm:$0xff] }
 0x1f7   :  { %8718 = vmatmul.mubr.f32.gmra.mrb[22].mxu0 %v15260_v35  ;;  %v15312_v35 = vand.u32 4294901760, %v15311_v47  ;;  %v15366_v47 = vld [vmem:[#allocation120_spill] sm:$0xff] }
 0x1f8   :  { %8720 = vmatprep.mubr.f32.mxu0 %v15261_v12  ;;  %v15313_v12 = vand.u32 4294901760, %v12084_v21  ;;  %v15322_v21 = vld [vmem:[#allocation14_spill] sm:$0xff] }
 0x1fb   :  { %8721 = vmatmul.mubr.f32.gmra.mrb[24].mxu0 %v15262_v27  ;;  %v15314_v27 = vld [vmem:[#allocation166_spill] sm:$0xff] }
 0x1fc   :  { %8723 = vmatprep.mubr.f32.mxu0 %v15263_v25  ;;  %v15315_v25 = vand.u32 4294901760, %v15314_v27  ;;  %v15369_v27 = vld [vmem:[#allocation128_spill] sm:$0xff] }
 0x1ff   :  { %8724 = vmatmul.mubr.f32.gmra.mrb[26].mxu0 %v15264_v31  ;;  %v15316_v31 = vld [vmem:[#allocation13_spill] sm:$0xff] }
 0x200   :  { %8726 = vmatprep.mubr.f32.mxu0 %v15265_v15  ;;  %v15317_v15 = vld [vmem:[#allocation20_spill] sm:$0xff] }
 0x203   :  { %8727 = vmatmul.mubr.f32.gmra.mrb[28].mxu0 %v15266_v18  ;;  %v15319_v18 = vld [vmem:[#allocation12_spill] sm:$0xff] }
 0x204   :  { %8729 = vmatprep.mubr.f32.mxu0 %v15267_v39  ;;  %v15321_v39 = vld [vmem:[#allocation26_spill] sm:$0xff] }
 0x207   :  { %8730 = vmatmul.mubr.f32.gmra.mrb[30].mxu0 %v15268_v52  ;;  %v15323_v52 = vld [vmem:[#allocation28_spill] sm:$0xff] }
 0x208   :  { %8732 = vmatprep.mubr.f32.mxu0 %v15269_v19  ;;  %v15324_v19 = vld [vmem:[#allocation33_spill] sm:$0xff] }
 0x20b   :  { %8733 = vmatmul.mubr.f32.gmra.mrb[32].mxu0 %v15270_v32  ;;  %v15325_v32 = vld [vmem:[#allocation16_spill] sm:$0xff] }
 0x20c   :  { %8735 = vmatprep.mubr.f32.mxu0 %v15271_v8  ;;  %v15326_v8 = vld [vmem:[#allocation34_spill] sm:$0xff] }
 0x20f   :  { %8736 = vmatmul.mubr.f32.gmra.mrb[34].mxu0 %v15272_v2  ;;  %v15327_v2 = vld [vmem:[#allocation36_spill] sm:$0xff] }
 0x210   :  { %8738 = vmatprep.mubr.f32.mxu0 %v15273_v36  ;;  %v15328_v36 = vld [vmem:[#allocation17_spill] sm:$0xff] }
 0x213   :  { %8739 = vmatmul.mubr.f32.gmra.mrb[36].mxu0 %v15274_v43  ;;  %v15329_v43 = vld [vmem:[#allocation39_spill] sm:$0xff] }
 0x214   :  { %8741 = vmatprep.mubr.f32.mxu0 %v15275_v33  ;;  %v15330_v33 = vld [vmem:[#allocation41_spill] sm:$0xff] }
 0x217   :  { %8742 = vmatmul.mubr.f32.gmra.mrb[38].mxu0 %v15277_v57  ;;  %v15332_v57 = vld [vmem:[#allocation44_spill] sm:$0xff] }
 0x218   :  { %8744 = vmatprep.mubr.f32.mxu0 %v15279_v58  ;;  %v15334_v58 = vld [vmem:[#allocation27_spill] sm:$0xff] }
 0x21b   :  { %8745 = vmatmul.mubr.f32.gmra.mrb[40].mxu0 %v15281_v28  ;;  %v15336_v28 = vld [vmem:[#allocation50_spill] sm:$0xff] }
 0x21c   :  { %8747 = vmatprep.mubr.f32.mxu0 %v15283_v3  ;;  %v15338_v3 = vld [vmem:[#allocation52_spill] sm:$0xff] }
 0x21f   :  { %8748 = vmatmul.mubr.f32.gmra.mrb[42].mxu0 %v15285_v22  ;;  %v15340_v22 = vld [vmem:[#allocation59_spill] sm:$0xff] }
 0x220   :  { %8750 = vmatprep.mubr.f32.mxu0 %v15287_v4  ;;  %v15342_v4 = vld [vmem:[#allocation63_spill] sm:$0xff] }
 0x223   :  { %8751 = vmatmul.mubr.f32.gmra.mrb[44].mxu0 %v15289_v5  ;;  %v15344_v5 = vld [vmem:[#allocation67_spill] sm:$0xff] }
 0x224   :  { %8753 = vmatprep.mubr.f32.mxu0 %v15291_v30  ;;  %v15346_v30 = vld [vmem:[#allocation73_spill] sm:$0xff] }
 0x227   :  { %8754 = vmatmul.mubr.f32.gmra.mrb[46].mxu0 %v15292_v6  ;;  %v15347_v6 = vld [vmem:[#allocation76_spill] sm:$0xff] }
 0x228   :  { %8756 = vmatprep.mubr.f32.mxu0 %v15293_v61  ;;  %v15348_v61 = vld [vmem:[#allocation78_spill] sm:$0xff] }
 0x22b   :  { %8757 = vmatmul.mubr.f32.gmra.mrb[48].mxu0 %v15294_v24  ;;  %v15349_v24 = vld [vmem:[#allocation81_spill] sm:$0xff] }
 0x22c   :  { %8759 = vmatprep.mubr.f32.mxu0 %v15295_v54  ;;  %v15350_v54 = vld [vmem:[#allocation85_spill] sm:$0xff] }
 0x22f   :  { %8760 = vmatmul.mubr.f32.gmra.mrb[50].mxu0 %v15296_v7  ;;  %v15351_v7 = vld [vmem:[#allocation86_spill] sm:$0xff] }
 0x230   :  { %8762 = vmatprep.mubr.f32.mxu0 %v15297_v14  ;;  %v15352_v14 = vld [vmem:[#allocation88_spill] sm:$0xff] }
 0x233   :  { %8763 = vmatmul.mubr.f32.gmra.mrb[52].mxu0 %v15298_v37  ;;  %v15353_v37 = vld [vmem:[#allocation91_spill] sm:$0xff] }
 0x234   :  { %8765 = vmatprep.mubr.f32.mxu0 %v15300_v29  ;;  %v15355_v29 = vld [vmem:[#allocation96_spill] sm:$0xff] }
 0x237   :  { %8766 = vmatmul.mubr.f32.gmra.mrb[54].mxu0 %v15302_v11  ;;  %v15357_v11 = vld [vmem:[#allocation102_spill] sm:$0xff] }
 0x238   :  { %8768 = vmatprep.mubr.f32.mxu0 %v15304_v13  ;;  %v15359_v13 = vld [vmem:[#allocation105_spill] sm:$0xff] }
 0x23b   :  { %8769 = vmatmul.mubr.f32.gmra.mrb[56].mxu0 %v15306_v48  ;;  %v15361_v48 = vld [vmem:[#allocation111_spill] sm:$0xff] }
 0x23c   :  { %8771 = vmatprep.mubr.f32.mxu0 %v15308_v1  ;;  %v15363_v1 = vld [vmem:[#allocation115_spill] sm:$0xff] }
 0x23f   :  { %8772 = vmatmul.mubr.f32.gmra.mrb[58].mxu0 %v15309_v34  ;;  %v15364_v34 = vld [vmem:[#allocation117_spill] sm:$0xff] }
 0x240   :  { %8774 = vmatprep.mubr.f32.mxu0 %v15310_v62  ;;  %v15365_v62 = vld [vmem:[#allocation119_spill] sm:$0xff] }
 0x243   :  { %8775 = vmatmul.mubr.f32.gmra.mrb[60].mxu0 %v15312_v35  ;;  %v15367_v35 = vld [vmem:[#allocation123_spill] sm:$0xff] }
 0x244   :  { %8777 = vmatprep.mubr.f32.mxu0 %v15313_v12  ;;  %v15368_v12 = vld [vmem:[#allocation127_spill] sm:$0xff] }
 0x247   :  { %8778 = vmatmul.mubr.f32.gmra.mrb[62].mxu0 %v15315_v25  ;;  %v15370_v25 = vld [vmem:[#allocation134_spill] sm:$0xff] }
 0x248   :  { %8812 = vmatprep.mubr.f32.mxu0 %v15316_v31 }
 0x24b   :  { %8813 = vmatmul.mubr.f32.vlgmr.msra.gmra.mrb[0].mxu0 %v15317_v15 }
 0x24c   :  { %9967 = vmatpush3.bf16.msra.mxu0 %v11231_v10  ;;  %8815 = vmatprep.mubr.f32.mxu0 %v15318_v51  ;;  %v15386_v10 = vld [vmem:[#allocation165_spill] sm:$0xff] }
 0x24d   :  { %9969 = vmatprep.subr.bf16.mxu0 %v15319_v18 }
 0x24f   :  { %8816 = vmatmul.mubr.f32.gmra.mrb[2].mxu0 %v15320_v60 }
 0x250   :  { %8818 = vmatprep.mubr.f32.mxu0 %v15321_v39  ;;  %9971 = vmatpush3.bf16.msra.mxu0 %v15319_v18  ;;  %v15385_v18 = vld [vmem:[#allocation163_spill] sm:$0xff] }
 0x251   :  { %9973 = vmatprep.subr.bf16.mxu0 %v15322_v21 }
 0x253   :  { %8819 = vmatmul.mubr.f32.gmra.mrb[4].mxu0 %v15323_v52 }
 0x254   :  { %8821 = vmatprep.mubr.f32.mxu0 %v15324_v19  ;;  %9975 = vmatpush3.bf16.msra.mxu0 %v15322_v21  ;;  %v15384_v21 = vld [vmem:[#allocation162_spill] sm:$0xff] }
 0x255   :  { %9977 = vmatprep.subr.bf16.mxu0 %v15325_v32 }
 0x257   :  { %8822 = vmatmul.mubr.f32.gmra.mrb[6].mxu0 %v15326_v8 }
 0x258   :  { %8824 = vmatprep.mubr.f32.mxu0 %v15327_v2  ;;  %9979 = vmatpush3.bf16.msra.mxu0 %v15325_v32  ;;  %v15383_v32 = vld [vmem:[#allocation161_spill] sm:$0xff] }
 0x259   :  { %9981 = vmatprep.subr.bf16.mxu0 %v15328_v36 }
 0x25b   :  { %8825 = vmatmul.mubr.f32.gmra.mrb[8].mxu0 %v15329_v43 }
 0x25c   :  { %8827 = vmatprep.mubr.f32.mxu0 %v15330_v33  ;;  %9983 = vmatpush3.bf16.msra.mxu0 %v15328_v36  ;;  %v15382_v36 = vld [vmem:[#allocation158_spill] sm:$0xff] }
 0x25d   :  { %9985 = vmatprep.subr.bf16.mxu0 %v15331_v0 }
 0x25f   :  { %8828 = vmatmul.mubr.f32.gmra.mrb[10].mxu0 %v15332_v57 }
 0x260   :  { %8830 = vmatprep.mubr.f32.mxu0 %v15333_v16  ;;  %9987 = vmatpush3.bf16.msra.mxu0 %v15331_v0  ;;  %v15381_v0 = vld [vmem:[#allocation156_spill] sm:$0xff] }
 0x261   :  { %9989 = vmatprep.subr.bf16.mxu0 %v15334_v58 }
 0x263   :  { %8831 = vmatmul.mubr.f32.gmra.mrb[12].mxu0 %v15335_v56 }
 0x264   :  { %8833 = vmatprep.mubr.f32.mxu0 %v15336_v28  ;;  %9991 = vmatpush3.bf16.msra.mxu0 %v15334_v58  ;;  %v15380_v58 = vld [vmem:[#allocation155_spill] sm:$0xff] }
 0x265   :  { %9993 = vmatprep.subr.bf16.mxu0 %v15337_v63 }
 0x267   :  { %8834 = vmatmul.mubr.f32.gmra.mrb[14].mxu0 %v15338_v3 }
 0x268   :  { %8836 = vmatprep.mubr.f32.mxu0 %v15339_v26  ;;  %9995 = vmatpush3.bf16.msra.mxu0 %v15337_v63  ;;  %v15379_v63 = vld [vmem:[#allocation151_spill] sm:$0xff] }
 0x26b   :  { %8837 = vmatmul.mubr.f32.gmra.mrb[16].mxu0 %v15340_v22 }
 0x26c   :  { %8839 = vmatprep.mubr.f32.mxu0 %v15341_v44 }
 0x26f   :  { %8840 = vmatmul.mubr.f32.gmra.mrb[18].mxu0 %v15342_v4 }
 0x270   :  { %8842 = vmatprep.mubr.f32.mxu0 %v15343_v45 }
 0x273   :  { %8843 = vmatmul.mubr.f32.gmra.mrb[20].mxu0 %v15344_v5 }
 0x274   :  { %8845 = vmatprep.mubr.f32.mxu0 %v15345_v40 }
 0x277   :  { %8846 = vmatmul.mubr.f32.gmra.mrb[22].mxu0 %v15346_v30 }
 0x278   :  { %8848 = vmatprep.mubr.f32.mxu0 %v15347_v6 }
 0x27b   :  { %8849 = vmatmul.mubr.f32.gmra.mrb[24].mxu0 %v15348_v61 }
 0x27c   :  { %8851 = vmatprep.mubr.f32.mxu0 %v15349_v24 }
 0x27f   :  { %8852 = vmatmul.mubr.f32.gmra.mrb[26].mxu0 %v15350_v54 }
 0x280   :  { %8854 = vmatprep.mubr.f32.mxu0 %v15351_v7 }
 0x283   :  { %8855 = vmatmul.mubr.f32.gmra.mrb[28].mxu0 %v15352_v14 }
 0x284   :  { %8857 = vmatprep.mubr.f32.mxu0 %v15353_v37 }
 0x287   :  { %8858 = vmatmul.mubr.f32.gmra.mrb[30].mxu0 %v15354_v42 }
 0x288   :  { %8860 = vmatprep.mubr.f32.mxu0 %v15355_v29 }
 0x28b   :  { %8861 = vmatmul.mubr.f32.gmra.mrb[32].mxu0 %v15356_v41 }
 0x28c   :  { %8863 = vmatprep.mubr.f32.mxu0 %v15357_v11 }
 0x28f   :  { %8864 = vmatmul.mubr.f32.gmra.mrb[34].mxu0 %v15358_v17 }
 0x290   :  { %8866 = vmatprep.mubr.f32.mxu0 %v15359_v13 }
 0x293   :  { %8867 = vmatmul.mubr.f32.gmra.mrb[36].mxu0 %v15360_v50 }
 0x294   :  { %8869 = vmatprep.mubr.f32.mxu0 %v15361_v48 }
 0x297   :  { %8870 = vmatmul.mubr.f32.gmra.mrb[38].mxu0 %v15362_v59 }
 0x298   :  { %8872 = vmatprep.mubr.f32.mxu0 %v15363_v1 }
 0x29b   :  { %8873 = vmatmul.mubr.f32.gmra.mrb[40].mxu0 %v15364_v34 }
 0x29c   :  { %8875 = vmatprep.mubr.f32.mxu0 %v15365_v62 }
 0x29f   :  { %8876 = vmatmul.mubr.f32.gmra.mrb[42].mxu0 %v15366_v47 }
 0x2a0   :  { %8878 = vmatprep.mubr.f32.mxu0 %v15367_v35 }
 0x2a3   :  { %8879 = vmatmul.mubr.f32.gmra.mrb[44].mxu0 %v15368_v12 }
 0x2a4   :  { %8881 = vmatprep.mubr.f32.mxu0 %v15369_v27 }
 0x2a7   :  { %8882 = vmatmul.mubr.f32.gmra.mrb[46].mxu0 %v15370_v25 }
 0x2a8   :  { %8884 = vmatprep.mubr.f32.mxu0 %v15371_v53 }
 0x2ab   :  { %8885 = vmatmul.mubr.f32.gmra.mrb[48].mxu0 %v15372_v49 }
 0x2ac   :  { %8887 = vmatprep.mubr.f32.mxu0 %v15373_v38 }
 0x2af   :  { %8888 = vmatmul.mubr.f32.gmra.mrb[50].mxu0 %v15374_v46 }
 0x2b0   :  { %8890 = vmatprep.mubr.f32.mxu0 %v15375_v23 }
 0x2b3   :  { %8891 = vmatmul.mubr.f32.gmra.mrb[52].mxu0 %v15376_v20 }
 0x2b4   :  { %8893 = vmatprep.mubr.f32.mxu0 %v15377_v55 }
 0x2b7   :  { %8894 = vmatmul.mubr.f32.gmra.mrb[54].mxu0 %v15378_v9 }
 0x2b8   :  { %8896 = vmatprep.mubr.f32.mxu0 %v15379_v63 }
 0x2bb   :  { %8897 = vmatmul.mubr.f32.gmra.mrb[56].mxu0 %v15380_v58 }
 0x2bc   :  { %8899 = vmatprep.mubr.f32.mxu0 %v15381_v0 }
 0x2bf   :  { %8900 = vmatmul.mubr.f32.gmra.mrb[58].mxu0 %v15382_v36 }
 0x2c0   :  { %8902 = vmatprep.mubr.f32.mxu0 %v15383_v32 }
 0x2c3   :  { %8903 = vmatmul.mubr.f32.gmra.mrb[60].mxu0 %v15384_v21 }
 0x2c4   :  { %8905 = vmatprep.mubr.f32.mxu0 %v15385_v18 }
 0x2c7   :  { %8906 = vmatmul.mubr.f32.gmra.mrb[62].mxu0 %v15386_v10 }
 0x2c8   :  { %8940 = vmatprep.mubr.f32.mxu0 %v15316_v31 }
 0x2cb   :  { %8941 = vmatmul.mubr.f32.vlgmr.msra.gmra.mrb[0].mxu0 %v15317_v15 }
 0x2cc   :  { %8943 = vmatprep.mubr.f32.mxu0 %v15318_v51  ;;  %v11027_v51 = vld [vmem:[#allocation2 + $0x18] sm:$0xff] }
 0x2cf   :  { %8944 = vmatmul.mubr.f32.gmra.mrb[2].mxu0 %v15320_v60 }
 0x2d0   :  { %8946 = vmatprep.mubr.f32.mxu0 %v15321_v39  ;;  %v11028_v39 = vld [vmem:[#allocation2 + $0x10] sm:$0xff] }
 0x2d3   :  { %8947 = vmatmul.mubr.f32.gmra.mrb[4].mxu0 %v15323_v52 }
 0x2d4   :  { %8949 = vmatprep.mubr.f32.mxu0 %v15324_v19 }
 0x2d7   :  { %8950 = vmatmul.mubr.f32.gmra.mrb[6].mxu0 %v15326_v8 }
 0x2d8   :  { %8952 = vmatprep.mubr.f32.mxu0 %v15327_v2 }
 0x2db   :  { %8953 = vmatmul.mubr.f32.gmra.mrb[8].mxu0 %v15329_v43  ;;  %v11029_v43 = vld [vmem:[#allocation2 + $0x28] sm:$0xff] }
 0x2dc   :  { %8955 = vmatprep.mubr.f32.mxu0 %v15330_v33 }
 0x2df   :  { %8956 = vmatmul.mubr.f32.gmra.mrb[10].mxu0 %v15332_v57 }
 0x2e0   :  { %8958 = vmatprep.mubr.f32.mxu0 %v15333_v16 }
 0x2e3   :  { %8959 = vmatmul.mubr.f32.gmra.mrb[12].mxu0 %v15335_v56 }
 0x2e4   :  { %8961 = vmatprep.mubr.f32.mxu0 %v15336_v28 }
 0x2e7   :  { %8962 = vmatmul.mubr.f32.gmra.mrb[14].mxu0 %v15338_v3 }
 0x2e8   :  { %8964 = vmatprep.mubr.f32.mxu0 %v15339_v26 }
 0x2eb   :  { %8965 = vmatmul.mubr.f32.gmra.mrb[16].mxu0 %v15340_v22 }
 0x2ec   :  { %8967 = vmatprep.mubr.f32.mxu0 %v15341_v44 }
 0x2ef   :  { %8968 = vmatmul.mubr.f32.gmra.mrb[18].mxu0 %v15342_v4 }
 0x2f0   :  { %8970 = vmatprep.mubr.f32.mxu0 %v15343_v45 }
 0x2f3   :  { %8971 = vmatmul.mubr.f32.gmra.mrb[20].mxu0 %v15344_v5 }
 0x2f4   :  { %8973 = vmatprep.mubr.f32.mxu0 %v15345_v40  ;;  %v11031_v40 = vld [vmem:[#allocation2 + $0x38] sm:$0xff] }
 0x2f7   :  { %8974 = vmatmul.mubr.f32.gmra.mrb[22].mxu0 %v15346_v30 }
 0x2f8   :  { %8976 = vmatprep.mubr.f32.mxu0 %v15347_v6 }
 0x2fb   :  { %8977 = vmatmul.mubr.f32.gmra.mrb[24].mxu0 %v15348_v61 }
 0x2fc   :  { %8979 = vmatprep.mubr.f32.mxu0 %v15349_v24 }
 0x2ff   :  { %8980 = vmatmul.mubr.f32.gmra.mrb[26].mxu0 %v15350_v54  ;;  %v11032_v54 = vld [vmem:[#allocation2 + $0x30] sm:$0xff] }
 0x300   :  { %8982 = vmatprep.mubr.f32.mxu0 %v15351_v7 }
 0x303   :  { %8983 = vmatmul.mubr.f32.gmra.mrb[28].mxu0 %v15352_v14 }
 0x304   :  { %8985 = vmatprep.mubr.f32.mxu0 %v15353_v37 }
 0x307   :  { %8986 = vmatmul.mubr.f32.gmra.mrb[30].mxu0 %v15354_v42 }
 0x308   :  { %8988 = vmatprep.mubr.f32.mxu0 %v15355_v29 }
 0x30b   :  { %8989 = vmatmul.mubr.f32.gmra.mrb[32].mxu0 %v15356_v41 }
 0x30c   :  { %8991 = vmatprep.mubr.f32.mxu0 %v15357_v11 }
 0x30f   :  { %8992 = vmatmul.mubr.f32.gmra.mrb[34].mxu0 %v15358_v17 }
 0x310   :  { %8994 = vmatprep.mubr.f32.mxu0 %v15359_v13 }
 0x313   :  { %8995 = vmatmul.mubr.f32.gmra.mrb[36].mxu0 %v15360_v50 }
 0x314   :  { %8997 = vmatprep.mubr.f32.mxu0 %v15361_v48 }
 0x317   :  { %8998 = vmatmul.mubr.f32.gmra.mrb[38].mxu0 %v15362_v59 }
 0x318   :  { %9000 = vmatprep.mubr.f32.mxu0 %v15363_v1  ;;  %v11033_v1 = vld [vmem:[#allocation2 + $0x48] sm:$0xff] }
 0x31b   :  { %9001 = vmatmul.mubr.f32.gmra.mrb[40].mxu0 %v15364_v34 }
 0x31c   :  { %9003 = vmatprep.mubr.f32.mxu0 %v15365_v62 }
 0x31f   :  { %9004 = vmatmul.mubr.f32.gmra.mrb[42].mxu0 %v15366_v47 }
 0x320   :  { %9006 = vmatprep.mubr.f32.mxu0 %v15367_v35 }
 0x323   :  { %9007 = vmatmul.mubr.f32.gmra.mrb[44].mxu0 %v15368_v12  ;;  %v11034_v12 = vld [vmem:[#allocation2 + $0x40] sm:$0xff] }
 0x324   :  { %9009 = vmatprep.mubr.f32.mxu0 %v15369_v27 }
 0x327   :  { %9010 = vmatmul.mubr.f32.gmra.mrb[46].mxu0 %v15370_v25  ;;  %v15411_v25 = vld [vmem:[#allocation37_spill] sm:$0xff] }
 0x328   :  { %9012 = vmatprep.mubr.f32.mxu0 %v15371_v53 }
 0x32b   :  { %9013 = vmatmul.mubr.f32.gmra.mrb[48].mxu0 %v15372_v49 }
 0x32c   :  { %9015 = vmatprep.mubr.f32.mxu0 %v15373_v38 }
 0x32f   :  { %9016 = vmatmul.mubr.f32.gmra.mrb[50].mxu0 %v15374_v46  ;;  %v11026_v46 = vld [vmem:[#allocation2] sm:$0xff] }
 0x330   :  { %9018 = vmatprep.mubr.f32.mxu0 %v15375_v23 }
 0x333   :  { %9019 = vmatmul.mubr.f32.gmra.mrb[52].mxu0 %v15376_v20 }
 0x334   :  { %9021 = vmatprep.mubr.f32.mxu0 %v15377_v55  ;;  %v11025_v55 = vld [vmem:[#allocation2 + $0x8] sm:$0xff] }
 0x337   :  { %9022 = vmatmul.mubr.f32.gmra.mrb[54].mxu0 %v15378_v9 }
 0x338   :  { %9024 = vmatprep.mubr.f32.mxu0 %v15379_v63 }
 0x33b   :  { %9025 = vmatmul.mubr.f32.gmra.mrb[56].mxu0 %v15380_v58  ;;  %v11030_v58 = vld [vmem:[#allocation2 + $0x20] sm:$0xff] }
 0x33c   :  { %9027 = vmatprep.mubr.f32.mxu0 %v15381_v0 }
 0x33f   :  { %9028 = vmatmul.mubr.f32.gmra.mrb[58].mxu0 %v15382_v36 }
 0x340   :  { %9030 = vmatprep.mubr.f32.mxu0 %v15383_v32 }
 0x343   :  { %9031 = vmatmul.mubr.f32.gmra.mrb[60].mxu0 %v15384_v21 }
 0x344   :  { %9033 = vmatprep.mubr.f32.mxu0 %v15385_v18 }
 0x347   :  { %9034 = vmatmul.mubr.f32.gmra.mrb[62].mxu0 %v15386_v10 }
 0x39e   :  { %v8942_v20 = vpop.f32.mrb[0].mxu0 }
 0x39f   :  { %v12614_v23 = vsub.f32 %v11025_v55, %v8942_v20  ;;  %v3094_v9 = vpop.f32.mrb[1].mxu0 }
 0x3a0   :  { %v12616_v38 = vsub.f32 %v11026_v46, %v3094_v9 }
 0x3a1   :  { %15387 = vst [vmem:[#allocation40_spill] sm:$0xff] %v12614_v23  ;;  %v3541_v49 = vmul.f32 %v12614_v23, %v12614_v23 }
 0x3a2   :  { %15388 = vst [vmem:[#allocation43_spill] sm:$0xff] %v12616_v38  ;;  %v3540_v53 = vmul.f32 %v12616_v38, %v12616_v38  ;;  %v8945_v31 = vpop.f32.mrb[2].mxu0 }
 0x3a3   :  { %v12622_v15 = vand.u32 4294901760, %v3541_v49  ;;  %v12624_v18 = vsub.f32 %v11027_v51, %v8945_v31  ;;  %v3106_v10 = vpop.f32.mrb[3].mxu0  ;;  %v15413_v31 = vld [vmem:[#allocation42_spill] sm:$0xff] }
 0x3a4   :  { %v12626_v60 = vand.u32 4294901760, %v3540_v53  ;;  %v12628_v21 = vsub.f32 %v11028_v39, %v3106_v10 }
 0x3a5   :  { %15389 = vst [vmem:[#allocation45_spill] sm:$0xff] %v12622_v15  ;;  %15390 = vst [vmem:[#allocation48_spill] sm:$0xff] %v12624_v18  ;;  %v12631_v52 = vsub.f32 %v3541_v49, %v12622_v15  ;;  %v3543_v19 = vmul.f32 %v12624_v18, %v12624_v18 }
 0x3a6   :  { %15391 = vst [vmem:[#allocation51_spill] sm:$0xff] %v12626_v60  ;;  %15392 = vst [vmem:[#allocation53_spill] sm:$0xff] %v12628_v21  ;;  %v12636_v32 = vsub.f32 %v3540_v53, %v12626_v60  ;;  %v3542_v8 = vmul.f32 %v12628_v21, %v12628_v21  ;;  %v8948_v2 = vpop.f32.mrb[4].mxu0  ;;  %v11050_v21 = vld [vmem:[#allocation2 + $0xc0] sm:$0xff] }
 0x3a7   :  { %15393 = vst [vmem:[#allocation54_spill] sm:$0xff] %v12631_v52  ;;  %v12640_v36 = vand.u32 4294901760, %v3543_v19  ;;  %v12642_v33 = vsub.f32 %v11029_v43, %v8948_v2  ;;  %v3118_v0 = vpop.f32.mrb[5].mxu0  ;;  %v14511_v57 = vand.u32 4294901760, %v12631_v52  ;;  %v11035_v2 = vld [vmem:[#allocation2 + $0x58] sm:$0xff] }
 0x3a8   :  { %15394 = vst [vmem:[#allocation18_spill] sm:$0xff] %v12636_v32  ;;  %v12645_v16 = vand.u32 4294901760, %v3542_v8  ;;  %v12647_v56 = vsub.f32 %v11030_v58, %v3118_v0  ;;  %v14512_v28 = vand.u32 4294901760, %v12636_v32 }
 0x3a9   :  { %15395 = vst [vmem:[#allocation19_spill] sm:$0xff] %v12640_v36  ;;  %15396 = vst [vmem:[#allocation58_spill] sm:$0xff] %v12642_v33  ;;  %v12651_v63 = vsub.f32 %v3543_v19, %v12640_v36  ;;  %v3545_v3 = vmul.f32 %v12642_v33, %v12642_v33  ;;  %v3698_v26 = vsub.f32 %v12631_v52, %v14511_v57  ;;  %v15441_v57 = vld [vmem:[#allocation94_spill] sm:$0xff] }
 0x3aa   :  { %15397 = vst [vmem:[#allocation60_spill] sm:$0xff] %v12645_v16  ;;  %15398 = vst [vmem:[#allocation62_spill] sm:$0xff] %v12647_v56  ;;  %v12659_v22 = vsub.f32 %v3542_v8, %v12645_v16  ;;  %v3544_v44 = vmul.f32 %v12647_v56, %v12647_v56  ;;  %v8951_v4 = vpop.f32.mrb[6].mxu0  ;;  %v3688_v45 = vsub.f32 %v12636_v32, %v14512_v28  ;;  %v15462_v56 = vld [vmem:[#allocation125_spill] sm:$0xff] }
 0x3ab   :  { %15399 = vst [vmem:[#allocation64_spill] sm:$0xff] %v12651_v63  ;;  %v12666_v5 = vand.u32 4294901760, %v3545_v3  ;;  %v12668_v30 = vsub.f32 %v11031_v40, %v8951_v4  ;;  %v3130_v6 = vpop.f32.mrb[7].mxu0  ;;  %v14508_v61 = vand.u32 4294901760, %v12651_v63  ;;  %v3699_v41 = vand.u32 4294901760, %v3698_v26  ;;  %v11036_v26 = vld [vmem:[#allocation2 + $0x50] sm:$0xff] }
 0x3ac   :  { %15400 = vst [vmem:[#allocation70_spill] sm:$0xff] %v12659_v22  ;;  %v12671_v24 = vand.u32 4294901760, %v3544_v44  ;;  %v12673_v7 = vsub.f32 %v11032_v54, %v3130_v6  ;;  %v3689_v14 = vand.u32 4294901760, %v3688_v45  ;;  %v14509_v37 = vand.u32 4294901760, %v12659_v22 }
 0x3ad   :  { %15401 = vst [vmem:[#allocation72_spill] sm:$0xff] %v12666_v5  ;;  %15402 = vst [vmem:[#allocation74_spill] sm:$0xff] %v12668_v30  ;;  %v12677_v42 = vsub.f32 %v3545_v3, %v12666_v5  ;;  %v3547_v29 = vmul.f32 %v12668_v30, %v12668_v30  ;;  %v3718_v11 = vsub.f32 %v12651_v63, %v14508_v61 }
 0x3ae   :  { %15403 = vst [vmem:[#allocation75_spill] sm:$0xff] %v12671_v24  ;;  %15404 = vst [vmem:[#allocation77_spill] sm:$0xff] %v12673_v7  ;;  %v12685_v17 = vsub.f32 %v3544_v44, %v12671_v24  ;;  %v3546_v13 = vmul.f32 %v12673_v7, %v12673_v7  ;;  %v8954_v50 = vpop.f32.mrb[8].mxu0  ;;  %9068 = vmatprep.mubr.f32.mxu1 %v3689_v14  ;;  %v3708_v48 = vsub.f32 %v12659_v22, %v14509_v37  ;;  %v11048_v7 = vld [vmem:[#allocation2 + $0xb0] sm:$0xff] }
 0x3af   :  { %15405 = vst [vmem:[#allocation80_spill] sm:$0xff] %v12677_v42  ;;  %v12692_v59 = vand.u32 4294901760, %v3547_v29  ;;  %v12694_v34 = vsub.f32 %v11033_v1, %v8954_v50  ;;  %v3142_v62 = vpop.f32.mrb[9].mxu0  ;;  %9069 = vmatmul.mubr.f32.vlgmr.msra.gmra.mrb[0].mxu1 %v3699_v41  ;;  %v14506_v47 = vand.u32 4294901760, %v12677_v42  ;;  %v3719_v49 = vand.u32 4294901760, %v3718_v11  ;;  %v11037_v1 = vld [vmem:[#allocation2 + $0x68] sm:$0xff] }
 0x3b0   :  { %15406 = vst [vmem:[#allocation83_spill] sm:$0xff] %v12685_v17  ;;  %v12697_v35 = vand.u32 4294901760, %v3546_v13  ;;  %v12699_v27 = vsub.f32 %v11034_v12, %v3142_v62  ;;  %10031 = vmatpush3.bf16.msra.mxu1 %v15411_v25  ;;  %v3709_v20 = vand.u32 4294901760, %v3708_v48  ;;  %v14507_v55 = vand.u32 4294901760, %v12685_v17 }
 0x3b1   :  { %15407 = vst [vmem:[#allocation87_spill] sm:$0xff] %v12692_v59  ;;  %15408 = vst [vmem:[#allocation89_spill] sm:$0xff] %v12694_v34  ;;  %v12704_v9 = vsub.f32 %v3547_v29, %v12692_v59  ;;  %v3549_v46 = vmul.f32 %v12694_v34, %v12694_v34  ;;  %v3738_v53 = vsub.f32 %v12677_v42, %v14506_v47  ;;  %10033 = vmatprep.subr.bf16.mxu1 %v15413_v31  ;;  %v15420_v29 = vld [vmem:[#allocation47_spill] sm:$0xff] }
 0x3b2   :  { %15409 = vst [vmem:[#allocation90_spill] sm:$0xff] %v12697_v35  ;;  %15410 = vst [vmem:[#allocation92_spill] sm:$0xff] %v12699_v27  ;;  %v12713_v51 = vsub.f32 %v3546_v13, %v12697_v35  ;;  %v3548_v10 = vmul.f32 %v12699_v27, %v12699_v27  ;;  %v8957_v39 = vpop.f32.mrb[10].mxu0  ;;  %9071 = vmatprep.mubr.f32.mxu1 %v3709_v20  ;;  %v3728_v19 = vsub.f32 %v12685_v17, %v14507_v55  ;;  %v11042_v55 = vld [vmem:[#allocation2 + $0x80] sm:$0xff]  ;;  %v15455_v27 = vld [vmem:[#allocation124_spill] sm:$0xff] }
 0x3b3   :  { %15412 = vst [vmem:[#allocation95_spill] sm:$0xff] %v12704_v9  ;;  %v12720_v8 = vand.u32 4294901760, %v3549_v46  ;;  %v12722_v43 = vsub.f32 %v11035_v2, %v8957_v39  ;;  %v3154_v0 = vpop.f32.mrb[11].mxu0  ;;  %9072 = vmatmul.mubr.f32.gmra.mrb[2].mxu1 %v3719_v49  ;;  %v14503_v58 = vand.u32 4294901760, %v12704_v9  ;;  %v3739_v54 = vand.u32 4294901760, %v3738_v53 }
 0x3b4   :  { %15414 = vst [vmem:[#allocation99_spill] sm:$0xff] %v12713_v51  ;;  %v12725_v3 = vand.u32 4294901760, %v3548_v10  ;;  %v12727_v44 = vsub.f32 %v11036_v26, %v3154_v0  ;;  %v3729_v4 = vand.u32 4294901760, %v3728_v19  ;;  %v14504_v45 = vand.u32 4294901760, %v12713_v51  ;;  %10035 = vmatpush3.bf16.msra.mxu1 %v15413_v31  ;;  %v15427_v0 = vld [vmem:[#allocation66_spill] sm:$0xff] }
 0x3b5   :  { %15415 = vst [vmem:[#allocation101_spill] sm:$0xff] %v12720_v8  ;;  %15416 = vst [vmem:[#allocation103_spill] sm:$0xff] %v12722_v43  ;;  %v12732_v40 = vsub.f32 %v3549_v46, %v12720_v8  ;;  %v3551_v6 = vmul.f32 %v12722_v43, %v12722_v43  ;;  %v3758_v14 = vsub.f32 %v12704_v9, %v14503_v58  ;;  %10037 = vmatprep.subr.bf16.mxu1 %v15420_v29  ;;  %v11038_v46 = vld [vmem:[#allocation2 + $0x60] sm:$0xff] }
 0x3b6   :  { %15417 = vst [vmem:[#allocation106_spill] sm:$0xff] %v12725_v3  ;;  %15418 = vst [vmem:[#allocation107_spill] sm:$0xff] %v12727_v44  ;;  %v12741_v41 = vsub.f32 %v3548_v10, %v12725_v3  ;;  %v3550_v11 = vmul.f32 %v12727_v44, %v12727_v44  ;;  %v8960_v13 = vpop.f32.mrb[12].mxu0  ;;  %9074 = vmatprep.mubr.f32.mxu1 %v3729_v4  ;;  %v3748_v50 = vsub.f32 %v12713_v51, %v14504_v45  ;;  %v15434_v58 = vld [vmem:[#allocation79_spill] sm:$0xff] }
 0x3b7   :  { %15419 = vst [vmem:[#allocation110_spill] sm:$0xff] %v12732_v40  ;;  %v12748_v48 = vand.u32 4294901760, %v3551_v6  ;;  %v12750_v62 = vsub.f32 %v11037_v1, %v8960_v13  ;;  %v3166_v12 = vpop.f32.mrb[13].mxu0  ;;  %9075 = vmatmul.mubr.f32.gmra.mrb[4].mxu1 %v3739_v54  ;;  %v14501_v25 = vand.u32 4294901760, %v12732_v40  ;;  %v3759_v19 = vand.u32 4294901760, %v3758_v14  ;;  %v11039_v14 = vld [vmem:[#allocation2 + $0x78] sm:$0xff] }
 0x3b8   :  { %15421 = vst [vmem:[#allocation112_spill] sm:$0xff] %v12741_v41  ;;  %v12753_v20 = vand.u32 4294901760, %v3550_v11  ;;  %v12755_v49 = vsub.f32 %v11038_v46, %v3166_v12  ;;  %v3749_v53 = vand.u32 4294901760, %v3748_v50  ;;  %v14502_v31 = vand.u32 4294901760, %v12741_v41  ;;  %10039 = vmatpush3.bf16.msra.mxu1 %v15420_v29  ;;  %v11040_v12 = vld [vmem:[#allocation2 + $0x70] sm:$0xff]  ;;  %v11046_v44 = vld [vmem:[#allocation2 + $0xa0] sm:$0xff] }
 0x3b9   :  { %15422 = vst [vmem:[#allocation114_spill] sm:$0xff] %v12748_v48  ;;  %15423 = vst [vmem:[#allocation136_spill] sm:$0xff] %v12750_v62  ;;  %v12760_v10 = vsub.f32 %v3551_v6, %v12748_v48  ;;  %v3553_v39 = vmul.f32 %v12750_v62, %v12750_v62  ;;  %v3778_v2 = vsub.f32 %v12732_v40, %v14501_v25  ;;  %10041 = vmatprep.subr.bf16.mxu1 %v15427_v0 }
 0x3ba   :  { %15424 = vst [vmem:[#allocation138_spill] sm:$0xff] %v12753_v20  ;;  %15425 = vst [vmem:[#allocation141_spill] sm:$0xff] %v12755_v49  ;;  %v12769_v26 = vsub.f32 %v3550_v11, %v12753_v20  ;;  %v3552_v4 = vmul.f32 %v12755_v49, %v12755_v49  ;;  %v8963_v54 = vpop.f32.mrb[14].mxu0  ;;  %9077 = vmatprep.mubr.f32.mxu1 %v3749_v53  ;;  %v3768_v6 = vsub.f32 %v12741_v41, %v14502_v31  ;;  %v15448_v49 = vld [vmem:[#allocation109_spill] sm:$0xff] }
 0x3bb   :  { %15426 = vst [vmem:[#allocation143_spill] sm:$0xff] %v12760_v10  ;;  %v12776_v29 = vand.u32 4294901760, %v3553_v39  ;;  %v12778_v13 = vsub.f32 %v11039_v14, %v8963_v54  ;;  %v3178_v50 = vpop.f32.mrb[15].mxu0  ;;  %9078 = vmatmul.mubr.f32.gmra.mrb[6].mxu1 %v3759_v19  ;;  %v14505_v1 = vand.u32 4294901760, %v12760_v10  ;;  %v3779_v14 = vand.u32 4294901760, %v3778_v2  ;;  %v11041_v2 = vld [vmem:[#allocation2 + $0x88] sm:$0xff] }
 0x3bc   :  { %15428 = vst [vmem:[#allocation145_spill] sm:$0xff] %v12769_v26  ;;  %v12781_v11 = vand.u32 4294901760, %v3552_v4  ;;  %v12783_v46 = vsub.f32 %v11040_v12, %v3178_v50  ;;  %v3769_v25 = vand.u32 4294901760, %v3768_v6  ;;  %v14510_v53 = vand.u32 4294901760, %v12769_v26  ;;  %10043 = vmatpush3.bf16.msra.mxu1 %v15427_v0 }
 0x3bd   :  { %15429 = vst [vmem:[#allocation147_spill] sm:$0xff] %v12776_v29  ;;  %15430 = vst [vmem:[#allocation149_spill] sm:$0xff] %v12778_v13  ;;  %v12788_v31 = vsub.f32 %v3553_v39, %v12776_v29  ;;  %v3555_v54 = vmul.f32 %v12778_v13, %v12778_v13  ;;  %v3798_v19 = vsub.f32 %v12760_v10, %v14505_v1  ;;  %10045 = vmatprep.subr.bf16.mxu1 %v15434_v58 }
 0x3be   :  { %15431 = vst [vmem:[#allocation56_spill] sm:$0xff] %v12781_v11  ;;  %15432 = vst [vmem:[#allocation57_spill] sm:$0xff] %v12783_v46  ;;  %v12797_v50 = vsub.f32 %v3552_v4, %v12781_v11  ;;  %v3554_v6 = vmul.f32 %v12783_v46, %v12783_v46  ;;  %v8966_v0 = vpop.f32.mrb[16].mxu0  ;;  %9080 = vmatprep.mubr.f32.mxu1 %v3769_v25  ;;  %v3788_v39 = vsub.f32 %v12769_v26, %v14510_v53  ;;  %v11044_v46 = vld [vmem:[#allocation2 + $0x90] sm:$0xff] }
 0x3bf   :  { %15433 = vst [vmem:[#allocation69_spill] sm:$0xff] %v12788_v31  ;;  %v12804_v12 = vand.u32 4294901760, %v3555_v54  ;;  %v12806_v45 = vsub.f32 %v11041_v2, %v8966_v0  ;;  %v3190_v1 = vpop.f32.mrb[17].mxu0  ;;  %9081 = vmatmul.mubr.f32.gmra.mrb[8].mxu1 %v3779_v14  ;;  %v14513_v47 = vand.u32 4294901760, %v12788_v31  ;;  %v3799_v2 = vand.u32 4294901760, %v3798_v19  ;;  %v11043_v19 = vld [vmem:[#allocation2 + $0x98] sm:$0xff] }
 0x3c0   :  { %15435 = vst [vmem:[#allocation71_spill] sm:$0xff] %v12797_v50  ;;  %v12809_v4 = vand.u32 4294901760, %v3554_v6  ;;  %v12811_v61 = vsub.f32 %v11042_v55, %v3190_v1  ;;  %v3789_v37 = vand.u32 4294901760, %v3788_v39  ;;  %v14518_v25 = vand.u32 4294901760, %v12797_v50  ;;  %10047 = vmatpush3.bf16.msra.mxu1 %v15434_v58 }
 0x3c1   :  { %15436 = vst [vmem:[#allocation82_spill] sm:$0xff] %v12804_v12  ;;  %15437 = vst [vmem:[#allocation84_spill] sm:$0xff] %v12806_v45  ;;  %v12816_v53 = vsub.f32 %v3555_v54, %v12804_v12  ;;  %v3557_v0 = vmul.f32 %v12806_v45, %v12806_v45  ;;  %v3818_v14 = vsub.f32 %v12788_v31, %v14513_v47  ;;  %10049 = vmatprep.subr.bf16.mxu1 %v15441_v57 }
 0x3c2   :  { %15438 = vst [vmem:[#allocation98_spill] sm:$0xff] %v12809_v4  ;;  %15439 = vst [vmem:[#allocation100_spill] sm:$0xff] %v12811_v61  ;;  %v12825_v55 = vsub.f32 %v3554_v6, %v12809_v4  ;;  %v3556_v1 = vmul.f32 %v12811_v61, %v12811_v61  ;;  %v8969_v58 = vpop.f32.mrb[18].mxu0  ;;  %9083 = vmatprep.mubr.f32.mxu1 %v3789_v37  ;;  %v3808_v54 = vsub.f32 %v12797_v50, %v14518_v25 }
 0x3c3   :  { %15440 = vst [vmem:[#allocation116_spill] sm:$0xff] %v12816_v53  ;;  %v12832_v39 = vand.u32 4294901760, %v3557_v0  ;;  %v12834_v28 = vsub.f32 %v11043_v19, %v8969_v58  ;;  %v3202_v47 = vpop.f32.mrb[19].mxu0  ;;  %9084 = vmatmul.mubr.f32.gmra.mrb[10].mxu1 %v3799_v2  ;;  %v14521_v45 = vand.u32 4294901760, %v12816_v53  ;;  %v3819_v19 = vand.u32 4294901760, %v3818_v14  ;;  %v11045_v14 = vld [vmem:[#allocation2 + $0xa8] sm:$0xff] }
 0x3c4   :  { %15442 = vst [vmem:[#allocation118_spill] sm:$0xff] %v12825_v55  ;;  %v12837_v6 = vand.u32 4294901760, %v3556_v1  ;;  %v12839_v13 = vsub.f32 %v11044_v46, %v3202_v47  ;;  %v3809_v61 = vand.u32 4294901760, %v3808_v54  ;;  %v14526_v37 = vand.u32 4294901760, %v12825_v55  ;;  %10051 = vmatpush3.bf16.msra.mxu1 %v15441_v57 }
 0x3c5   :  { %15443 = vst [vmem:[#allocation121_spill] sm:$0xff] %v12832_v39  ;;  %15444 = vst [vmem:[#allocation122_spill] sm:$0xff] %v12834_v28  ;;  %v12844_v25 = vsub.f32 %v3557_v0, %v12832_v39  ;;  %v3559_v58 = vmul.f32 %v12834_v28, %v12834_v28  ;;  %v3838_v2 = vsub.f32 %v12816_v53, %v14521_v45  ;;  %10053 = vmatprep.subr.bf16.mxu1 %v15448_v49 }
 0x3c6   :  { %15445 = vst [vmem:[#allocation126_spill] sm:$0xff] %v12837_v6  ;;  %15446 = vst [vmem:[#allocation131_spill] sm:$0xff] %v12839_v13  ;;  %v12853_v47 = vsub.f32 %v3556_v1, %v12837_v6  ;;  %v3558_v46 = vmul.f32 %v12839_v13, %v12839_v13  ;;  %v8972_v57 = vpop.f32.mrb[20].mxu0  ;;  %9086 = vmatprep.mubr.f32.mxu1 %v3809_v61  ;;  %v3828_v0 = vsub.f32 %v12825_v55, %v14526_v37 }
 0x3c7   :  { %15447 = vst [vmem:[#allocation132_spill] sm:$0xff] %v12844_v25  ;;  %v12860_v54 = vand.u32 4294901760, %v3559_v58  ;;  %v12862_v28 = vsub.f32 %v11045_v14, %v8972_v57  ;;  %v3214_v45 = vpop.f32.mrb[21].mxu0  ;;  %9087 = vmatmul.mubr.f32.gmra.mrb[12].mxu1 %v3819_v19  ;;  %v14529_v62 = vand.u32 4294901760, %v12844_v25  ;;  %v3839_v14 = vand.u32 4294901760, %v3838_v2  ;;  %v11047_v2 = vld [vmem:[#allocation2 + $0xb8] sm:$0xff] }
 0x3c8   :  { %15449 = vst [vmem:[#allocation133_spill] sm:$0xff] %v12853_v47  ;;  %v12865_v1 = vand.u32 4294901760, %v3558_v46  ;;  %v12867_v43 = vsub.f32 %v11046_v44, %v3214_v45  ;;  %v3829_v13 = vand.u32 4294901760, %v3828_v0  ;;  %v14534_v61 = vand.u32 4294901760, %v12853_v47  ;;  %10055 = vmatpush3.bf16.msra.mxu1 %v15448_v49 }
 0x3c9   :  { %15450 = vst [vmem:[#allocation152_spill] sm:$0xff] %v12860_v54  ;;  %15451 = vst [vmem:[#allocation153_spill] sm:$0xff] %v12862_v28  ;;  %v12872_v37 = vsub.f32 %v3559_v58, %v12860_v54  ;;  %v3561_v57 = vmul.f32 %v12862_v28, %v12862_v28  ;;  %v3858_v19 = vsub.f32 %v12844_v25, %v14529_v62  ;;  %10057 = vmatprep.subr.bf16.mxu1 %v15455_v27 }
 0x3ca   :  { %15452 = vst [vmem:[#allocation154_spill] sm:$0xff] %v12865_v1  ;;  %15453 = vst [vmem:[#allocation157_spill] sm:$0xff] %v12867_v43  ;;  %v12881_v44 = vsub.f32 %v3558_v46, %v12865_v1  ;;  %v3560_v45 = vmul.f32 %v12867_v43, %v12867_v43  ;;  %v8975_v49 = vpop.f32.mrb[22].mxu0  ;;  %9089 = vmatprep.mubr.f32.mxu1 %v3829_v13  ;;  %v3848_v58 = vsub.f32 %v12853_v47, %v14534_v61 }
 0x3cb   :  { %15454 = vst [vmem:[#allocation160_spill] sm:$0xff] %v12872_v37  ;;  %v12888_v0 = vand.u32 4294901760, %v3561_v57  ;;  %v12890_v28 = vsub.f32 %v11047_v2, %v8975_v49  ;;  %v3226_v62 = vpop.f32.mrb[23].mxu0  ;;  %9090 = vmatmul.mubr.f32.gmra.mrb[14].mxu1 %v3839_v14  ;;  %v14537_v34 = vand.u32 4294901760, %v12872_v37  ;;  %v3859_v2 = vand.u32 4294901760, %v3858_v19  ;;  %v11049_v19 = vld [vmem:[#allocation2 + $0xc8] sm:$0xff] }
 0x3cc   :  { %15456 = vst [vmem:[#allocation164_spill] sm:$0xff] %v12881_v44  ;;  %v12893_v46 = vand.u32 4294901760, %v3560_v45  ;;  %v12895_v30 = vsub.f32 %v11048_v7, %v3226_v62  ;;  %v3849_v43 = vand.u32 4294901760, %v3848_v58  ;;  %v14543_v13 = vand.u32 4294901760, %v12881_v44  ;;  %10059 = vmatpush3.bf16.msra.mxu1 %v15455_v27 }
 0x3cd   :  { %15457 = vst [vmem:[#allocation166_spill] sm:$0xff] %v12888_v0  ;;  %15458 = vst [vmem:[#allocation13_spill] sm:$0xff] %v12890_v28  ;;  %v12900_v61 = vsub.f32 %v3561_v57, %v12888_v0  ;;  %v3563_v49 = vmul.f32 %v12890_v28, %v12890_v28  ;;  %v3878_v14 = vsub.f32 %v12872_v37, %v14537_v34  ;;  %10061 = vmatprep.subr.bf16.mxu1 %v15462_v56 }
 0x3ce   :  { %15459 = vst [vmem:[#allocation20_spill] sm:$0xff] %v12893_v46  ;;  %15460 = vst [vmem:[#allocation21_spill] sm:$0xff] %v12895_v30  ;;  %v12909_v7 = vsub.f32 %v3560_v45, %v12893_v46  ;;  %v3562_v62 = vmul.f32 %v12895_v30, %v12895_v30  ;;  %v8978_v27 = vpop.f32.mrb[24].mxu0  ;;  %9092 = vmatprep.mubr.f32.mxu1 %v3849_v43  ;;  %v3868_v57 = vsub.f32 %v12881_v44, %v14543_v13 }
 0x3cf   :  { %15461 = vst [vmem:[#allocation25_spill] sm:$0xff] %v12900_v61  ;;  %v12916_v58 = vand.u32 4294901760, %v3563_v49  ;;  %v12918_v28 = vsub.f32 %v11049_v19, %v8978_v27  ;;  %v3238_v34 = vpop.f32.mrb[25].mxu0  ;;  %9093 = vmatmul.mubr.f32.gmra.mrb[16].mxu1 %v3859_v2  ;;  %v14546_v33 = vand.u32 4294901760, %v12900_v61  ;;  %v3879_v27 = vand.u32 4294901760, %v3878_v14 }
 0x3d0   :  { %15463 = vst [vmem:[#allocation26_spill] sm:$0xff] %v12909_v7  ;;  %v12921_v45 = vand.u32 4294901760, %v3562_v62  ;;  %v12923_v18 = vsub.f32 %v11050_v21, %v3238_v34  ;;  %v3869_v30 = vand.u32 4294901760, %v3868_v57  ;;  %v14554_v43 = vand.u32 4294901760, %v12909_v7 }
 0x3d1   :  { %15464 = vst [vmem:[#allocation28_spill] sm:$0xff] %v12916_v58  ;;  %15465 = vst [vmem:[#allocation33_spill] sm:$0xff] %v12918_v28  ;;  %v12927_v38 = vsub.f32 %v3563_v49, %v12916_v58  ;;  %v3565_v13 = vmul.f32 %v12918_v28, %v12918_v28  ;;  %v3898_v2 = vsub.f32 %v12900_v61, %v14546_v33  ;;  %v11051_v28 = vld [vmem:[#allocation2 + $0xd8] sm:$0xff]  ;;  %v11052_v61 = vld [vmem:[#allocation2 + $0xd0] sm:$0xff] }
 0x3d2   :  { %15466 = vst [vmem:[#allocation34_spill] sm:$0xff] %v12921_v45  ;;  %15467 = vst [vmem:[#allocation36_spill] sm:$0xff] %v12923_v18  ;;  %v12935_v19 = vsub.f32 %v3562_v62, %v12921_v45  ;;  %v3564_v21 = vmul.f32 %v12923_v18, %v12923_v18  ;;  %v8981_v34 = vpop.f32.mrb[26].mxu0  ;;  %9095 = vmatprep.mubr.f32.mxu1 %v3869_v30  ;;  %v3888_v49 = vsub.f32 %v12909_v7, %v14554_v43 }
 0x3d3   :  { %15468 = vst [vmem:[#allocation39_spill] sm:$0xff] %v12927_v38  ;;  %v12942_v57 = vand.u32 4294901760, %v3565_v13  ;;  %v12944_v14 = vsub.f32 %v11051_v28, %v8981_v34  ;;  %v3250_v23 = vpop.f32.mrb[27].mxu0  ;;  %9096 = vmatmul.mubr.f32.gmra.mrb[18].mxu1 %v3879_v27  ;;  %v14558_v33 = vand.u32 4294901760, %v12927_v38  ;;  %v3899_v28 = vand.u32 4294901760, %v3898_v2 }
 0x3d4   :  { %15469 = vst [vmem:[#allocation41_spill] sm:$0xff] %v12935_v19  ;;  %v12947_v62 = vand.u32 4294901760, %v3564_v21  ;;  %v12949_v37 = vsub.f32 %v11052_v61, %v3250_v23  ;;  %v3889_v18 = vand.u32 4294901760, %v3888_v49  ;;  %v14566_v30 = vand.u32 4294901760, %v12935_v19 }
 0x3d5   :  { %15470 = vst [vmem:[#allocation44_spill] sm:$0xff] %v12942_v57  ;;  %15471 = vst [vmem:[#allocation46_spill] sm:$0xff] %v12944_v14  ;;  %v12953_v44 = vsub.f32 %v3565_v13, %v12942_v57  ;;  %v3567_v43 = vmul.f32 %v12944_v14, %v12944_v14  ;;  %v3918_v27 = vsub.f32 %v12927_v38, %v14558_v33  ;;  %v11053_v14 = vld [vmem:[#allocation2 + $0xe8] sm:$0xff]  ;;  %v11054_v38 = vld [vmem:[#allocation2 + $0xe0] sm:$0xff] }
 0x3d6   :  { %15472 = vst [vmem:[#allocation49_spill] sm:$0xff] %v12947_v62  ;;  %15473 = vst [vmem:[#allocation50_spill] sm:$0xff] %v12949_v37  ;;  %v12961_v34 = vsub.f32 %v3564_v21, %v12947_v62  ;;  %v3566_v23 = vmul.f32 %v12949_v37, %v12949_v37  ;;  %v8984_v61 = vpop.f32.mrb[28].mxu0  ;;  %9098 = vmatprep.mubr.f32.mxu1 %v3889_v18  ;;  %v3908_v13 = vsub.f32 %v12935_v19, %v14566_v30 }
 0x3d7   :  { %15474 = vst [vmem:[#allocation52_spill] sm:$0xff] %v12953_v44  ;;  %v12968_v49 = vand.u32 4294901760, %v3567_v43  ;;  %v12970_v2 = vsub.f32 %v11053_v14, %v8984_v61  ;;  %v3262_v7 = vpop.f32.mrb[29].mxu0  ;;  %9099 = vmatmul.mubr.f32.gmra.mrb[20].mxu1 %v3899_v28  ;;  %v14570_v33 = vand.u32 4294901760, %v12953_v44  ;;  %v3919_v14 = vand.u32 4294901760, %v3918_v27 }
 0x3d8   :  { %15475 = vst [vmem:[#allocation55_spill] sm:$0xff] %v12961_v34  ;;  %v12973_v21 = vand.u32 4294901760, %v3566_v23  ;;  %v12975_v25 = vsub.f32 %v11054_v38, %v3262_v7  ;;  %v3909_v37 = vand.u32 4294901760, %v3908_v13  ;;  %v14578_v18 = vand.u32 4294901760, %v12961_v34 }
 0x3d9   :  { %15476 = vst [vmem:[#allocation59_spill] sm:$0xff] %v12968_v49  ;;  %15477 = vst [vmem:[#allocation61_spill] sm:$0xff] %v12970_v2  ;;  %v12979_v47 = vsub.f32 %v3567_v43, %v12968_v49  ;;  %v3569_v30 = vmul.f32 %v12970_v2, %v12970_v2  ;;  %v3938_v28 = vsub.f32 %v12953_v44, %v14570_v33  ;;  %v11055_v2 = vld [vmem:[#allocation2 + $0xf8] sm:$0xff]  ;;  %v11056_v44 = vld [vmem:[#allocation2 + $0xf0] sm:$0xff] }
 0x3da   :  { %15478 = vst [vmem:[#allocation63_spill] sm:$0xff] %v12973_v21  ;;  %15479 = vst [vmem:[#allocation65_spill] sm:$0xff] %v12975_v25  ;;  %v12987_v61 = vsub.f32 %v3566_v23, %v12973_v21  ;;  %v3568_v38 = vmul.f32 %v12975_v25, %v12975_v25  ;;  %v8987_v7 = vpop.f32.mrb[30].mxu0  ;;  %9101 = vmatprep.mubr.f32.mxu1 %v3909_v37  ;;  %v3928_v43 = vsub.f32 %v12961_v34, %v14578_v18 }
 0x3db   :  { %15480 = vst [vmem:[#allocation67_spill] sm:$0xff] %v12979_v47  ;;  %v12994_v13 = vand.u32 4294901760, %v3569_v30  ;;  %v12996_v27 = vsub.f32 %v11055_v2, %v8987_v7  ;;  %v3274_v19 = vpop.f32.mrb[31].mxu0  ;;  %9102 = vmatmul.mubr.f32.gmra.mrb[22].mxu1 %v3919_v14  ;;  %v14582_v33 = vand.u32 4294901760, %v12979_v47  ;;  %v3939_v2 = vand.u32 4294901760, %v3938_v28 }
 0x3dc   :  { %15481 = vst [vmem:[#allocation68_spill] sm:$0xff] %v12987_v61  ;;  %v12999_v23 = vand.u32 4294901760, %v3568_v38  ;;  %v13001_v53 = vsub.f32 %v11056_v44, %v3274_v19  ;;  %v3929_v25 = vand.u32 4294901760, %v3928_v43  ;;  %v14590_v37 = vand.u32 4294901760, %v12987_v61 }
 0x3dd   :  { %15482 = vst [vmem:[#allocation73_spill] sm:$0xff] %v12994_v13  ;;  %15483 = vst [vmem:[#allocation76_spill] sm:$0xff] %v12996_v27  ;;  %v13005_v55 = vsub.f32 %v3569_v30, %v12994_v13  ;;  %v3571_v18 = vmul.f32 %v12996_v27, %v12996_v27  ;;  %v3958_v14 = vsub.f32 %v12979_v47, %v14582_v33  ;;  %v11057_v27 = vld [vmem:[#allocation2 + $0x108] sm:$0xff]  ;;  %v11058_v47 = vld [vmem:[#allocation2 + $0x100] sm:$0xff] }
 0x3de   :  { %15484 = vst [vmem:[#allocation78_spill] sm:$0xff] %v12999_v23  ;;  %15485 = vst [vmem:[#allocation81_spill] sm:$0xff] %v13001_v53  ;;  %v13013_v7 = vsub.f32 %v3568_v38, %v12999_v23  ;;  %v3570_v44 = vmul.f32 %v13001_v53, %v13001_v53  ;;  %v8990_v19 = vpop.f32.mrb[32].mxu0  ;;  %9104 = vmatprep.mubr.f32.mxu1 %v3929_v25  ;;  %v3948_v30 = vsub.f32 %v12987_v61, %v14590_v37 }
 0x3df   :  { %15486 = vst [vmem:[#allocation85_spill] sm:$0xff] %v13005_v55  ;;  %v13020_v43 = vand.u32 4294901760, %v3571_v18  ;;  %v13022_v28 = vsub.f32 %v11057_v27, %v8990_v19  ;;  %v3286_v34 = vpop.f32.mrb[33].mxu0  ;;  %9105 = vmatmul.mubr.f32.gmra.mrb[24].mxu1 %v3939_v2  ;;  %v14594_v33 = vand.u32 4294901760, %v13005_v55  ;;  %v3959_v27 = vand.u32 4294901760, %v3958_v14 }
 0x3e0   :  { %15487 = vst [vmem:[#allocation86_spill] sm:$0xff] %v13013_v7  ;;  %v13025_v38 = vand.u32 4294901760, %v3570_v44  ;;  %v13027_v31 = vsub.f32 %v11058_v47, %v3286_v34  ;;  %v3949_v53 = vand.u32 4294901760, %v3948_v30  ;;  %v14602_v25 = vand.u32 4294901760, %v13013_v7 }
 0x3e1   :  { %15488 = vst [vmem:[#allocation88_spill] sm:$0xff] %v13020_v43  ;;  %15489 = vst [vmem:[#allocation91_spill] sm:$0xff] %v13022_v28  ;;  %v13031_v50 = vsub.f32 %v3571_v18, %v13020_v43  ;;  %v3573_v37 = vmul.f32 %v13022_v28, %v13022_v28  ;;  %v3978_v2 = vsub.f32 %v13005_v55, %v14594_v33  ;;  %v11059_v28 = vld [vmem:[#allocation2 + $0x118] sm:$0xff]  ;;  %v11060_v55 = vld [vmem:[#allocation2 + $0x110] sm:$0xff] }
 0x3e2   :  { %15490 = vst [vmem:[#allocation93_spill] sm:$0xff] %v13025_v38  ;;  %15491 = vst [vmem:[#allocation96_spill] sm:$0xff] %v13027_v31  ;;  %v13039_v19 = vsub.f32 %v3570_v44, %v13025_v38  ;;  %v3572_v47 = vmul.f32 %v13027_v31, %v13027_v31  ;;  %v8993_v34 = vpop.f32.mrb[34].mxu0  ;;  %9107 = vmatprep.mubr.f32.mxu1 %v3949_v53  ;;  %v3968_v18 = vsub.f32 %v13013_v7, %v14602_v25 }
 0x3e3   :  { %15492 = vst [vmem:[#allocation97_spill] sm:$0xff] %v13031_v50  ;;  %v13046_v30 = vand.u32 4294901760, %v3573_v37  ;;  %v13048_v14 = vsub.f32 %v11059_v28, %v8993_v34  ;;  %v3298_v61 = vpop.f32.mrb[35].mxu0  ;;  %9108 = vmatmul.mubr.f32.gmra.mrb[26].mxu1 %v3959_v27  ;;  %v14606_v33 = vand.u32 4294901760, %v13031_v50  ;;  %v3979_v28 = vand.u32 4294901760, %v3978_v2 }
 0x3e4   :  { %15493 = vst [vmem:[#allocation102_spill] sm:$0xff] %v13039_v19  ;;  %v13051_v44 = vand.u32 4294901760, %v3572_v47  ;;  %v13053_v10 = vsub.f32 %v11060_v55, %v3298_v61  ;;  %v3969_v31 = vand.u32 4294901760, %v3968_v18  ;;  %v14614_v53 = vand.u32 4294901760, %v13039_v19 }
 0x3e5   :  { %15494 = vst [vmem:[#allocation104_spill] sm:$0xff] %v13046_v30  ;;  %15495 = vst [vmem:[#allocation105_spill] sm:$0xff] %v13048_v14  ;;  %v13057_v26 = vsub.f32 %v3573_v37, %v13046_v30  ;;  %v3575_v25 = vmul.f32 %v13048_v14, %v13048_v14  ;;  %v3998_v27 = vsub.f32 %v13031_v50, %v14606_v33  ;;  %v11061_v14 = vld [vmem:[#allocation2 + $0x128] sm:$0xff]  ;;  %v11062_v50 = vld [vmem:[#allocation2 + $0x120] sm:$0xff] }
 0x3e6   :  { %15496 = vst [vmem:[#allocation108_spill] sm:$0xff] %v13051_v44  ;;  %15497 = vst [vmem:[#allocation111_spill] sm:$0xff] %v13053_v10  ;;  %v13065_v34 = vsub.f32 %v3572_v47, %v13051_v44  ;;  %v3574_v55 = vmul.f32 %v13053_v10, %v13053_v10  ;;  %v8996_v61 = vpop.f32.mrb[36].mxu0  ;;  %9110 = vmatprep.mubr.f32.mxu1 %v3969_v31  ;;  %v3988_v37 = vsub.f32 %v13039_v19, %v14614_v53 }
 0x3e7   :  { %15498 = vst [vmem:[#allocation113_spill] sm:$0xff] %v13057_v26  ;;  %v13072_v18 = vand.u32 4294901760, %v3575_v25  ;;  %v13074_v2 = vsub.f32 %v11061_v14, %v8996_v61  ;;  %v3310_v7 = vpop.f32.mrb[37].mxu0  ;;  %9111 = vmatmul.mubr.f32.gmra.mrb[28].mxu1 %v3979_v28  ;;  %v14618_v33 = vand.u32 4294901760, %v13057_v26  ;;  %v3999_v14 = vand.u32 4294901760, %v3998_v27 }
 0x3e8   :  { %15499 = vst [vmem:[#allocation115_spill] sm:$0xff] %v13065_v34  ;;  %v13077_v47 = vand.u32 4294901760, %v3574_v55  ;;  %v13079_v40 = vsub.f32 %v11062_v50, %v3310_v7  ;;  %v3989_v10 = vand.u32 4294901760, %v3988_v37  ;;  %v14626_v31 = vand.u32 4294901760, %v13065_v34 }
 0x3e9   :  { %15500 = vst [vmem:[#allocation117_spill] sm:$0xff] %v13072_v18  ;;  %15501 = vst [vmem:[#allocation119_spill] sm:$0xff] %v13074_v2  ;;  %v13083_v41 = vsub.f32 %v3575_v25, %v13072_v18  ;;  %v3577_v53 = vmul.f32 %v13074_v2, %v13074_v2  ;;  %v4018_v28 = vsub.f32 %v13057_v26, %v14618_v33  ;;  %v11063_v2 = vld [vmem:[#allocation2 + $0x138] sm:$0xff]  ;;  %v11064_v26 = vld [vmem:[#allocation2 + $0x130] sm:$0xff] }
 0x3ea   :  { %15502 = vst [vmem:[#allocation120_spill] sm:$0xff] %v13077_v47  ;;  %15503 = vst [vmem:[#allocation123_spill] sm:$0xff] %v13079_v40  ;;  %v13091_v61 = vsub.f32 %v3574_v55, %v13077_v47  ;;  %v3576_v50 = vmul.f32 %v13079_v40, %v13079_v40  ;;  %v8999_v7 = vpop.f32.mrb[38].mxu0  ;;  %9113 = vmatprep.mubr.f32.mxu1 %v3989_v10  ;;  %v4008_v25 = vsub.f32 %v13065_v34, %v14626_v31 }
 0x3eb   :  { %15504 = vst [vmem:[#allocation127_spill] sm:$0xff] %v13083_v41  ;;  %v13098_v37 = vand.u32 4294901760, %v3577_v53  ;;  %v13100_v27 = vsub.f32 %v11063_v2, %v8999_v7  ;;  %v3322_v19 = vpop.f32.mrb[39].mxu0  ;;  %9114 = vmatmul.mubr.f32.gmra.mrb[30].mxu1 %v3999_v14  ;;  %v14630_v33 = vand.u32 4294901760, %v13083_v41  ;;  %v4019_v2 = vand.u32 4294901760, %v4018_v28 }
 0x3ec   :  { %15505 = vst [vmem:[#allocation128_spill] sm:$0xff] %v13091_v61  ;;  %v13103_v55 = vand.u32 4294901760, %v3576_v50  ;;  %v13105_v9 = vsub.f32 %v11064_v26, %v3322_v19  ;;  %v4009_v40 = vand.u32 4294901760, %v4008_v25  ;;  %v14638_v10 = vand.u32 4294901760, %v13091_v61 }
 0x3ed   :  { %15506 = vst [vmem:[#allocation134_spill] sm:$0xff] %v13098_v37  ;;  %15507 = vst [vmem:[#allocation135_spill] sm:$0xff] %v13100_v27  ;;  %v13109_v51 = vsub.f32 %v3577_v53, %v13098_v37  ;;  %v3579_v31 = vmul.f32 %v13100_v27, %v13100_v27  ;;  %v4038_v14 = vsub.f32 %v13083_v41, %v14630_v33  ;;  %v11065_v27 = vld [vmem:[#allocation2 + $0x148] sm:$0xff]  ;;  %v11066_v41 = vld [vmem:[#allocation2 + $0x140] sm:$0xff] }
 0x3ee   :  { %15508 = vst [vmem:[#allocation137_spill] sm:$0xff] %v13103_v55  ;;  %15509 = vst [vmem:[#allocation139_spill] sm:$0xff] %v13105_v9  ;;  %v13117_v7 = vsub.f32 %v3576_v50, %v13103_v55  ;;  %v3578_v26 = vmul.f32 %v13105_v9, %v13105_v9  ;;  %v9002_v19 = vpop.f32.mrb[40].mxu0  ;;  %9116 = vmatprep.mubr.f32.mxu1 %v4009_v40  ;;  %v4028_v53 = vsub.f32 %v13091_v61, %v14638_v10 }
 0x3ef   :  { %15510 = vst [vmem:[#allocation140_spill] sm:$0xff] %v13109_v51  ;;  %v13124_v25 = vand.u32 4294901760, %v3579_v31  ;;  %v13126_v28 = vsub.f32 %v11065_v27, %v9002_v19  ;;  %v3334_v34 = vpop.f32.mrb[41].mxu0  ;;  %9117 = vmatmul.mubr.f32.gmra.mrb[32].mxu1 %v4019_v2  ;;  %v14642_v33 = vand.u32 4294901760, %v13109_v51  ;;  %v4039_v27 = vand.u32 4294901760, %v4038_v14 }
 0x3f0   :  { %15511 = vst [vmem:[#allocation144_spill] sm:$0xff] %v13117_v7  ;;  %v13129_v50 = vand.u32 4294901760, %v3578_v26  ;;  %v13131_v42 = vsub.f32 %v11066_v41, %v3334_v34  ;;  %v4029_v9 = vand.u32 4294901760, %v4028_v53  ;;  %v14650_v40 = vand.u32 4294901760, %v13117_v7 }
 0x3f1   :  { %15512 = vst [vmem:[#allocation146_spill] sm:$0xff] %v13124_v25  ;;  %15513 = vst [vmem:[#allocation148_spill] sm:$0xff] %v13126_v28  ;;  %v13135_v17 = vsub.f32 %v3579_v31, %v13124_v25  ;;  %v3581_v10 = vmul.f32 %v13126_v28, %v13126_v28  ;;  %v4058_v2 = vsub.f32 %v13109_v51, %v14642_v33  ;;  %v11067_v28 = vld [vmem:[#allocation2 + $0x158] sm:$0xff]  ;;  %v11068_v51 = vld [vmem:[#allocation2 + $0x150] sm:$0xff] }
 0x3f2   :  { %15514 = vst [vmem:[#allocation150_spill] sm:$0xff] %v13129_v50  ;;  %15515 = vst [vmem:[#allocation151_spill] sm:$0xff] %v13131_v42  ;;  %v13143_v19 = vsub.f32 %v3578_v26, %v13129_v50  ;;  %v3580_v41 = vmul.f32 %v13131_v42, %v13131_v42  ;;  %v9005_v34 = vpop.f32.mrb[42].mxu0  ;;  %9119 = vmatprep.mubr.f32.mxu1 %v4029_v9  ;;  %v4048_v31 = vsub.f32 %v13117_v7, %v14650_v40 }
 0x3f3   :  { %15516 = vst [vmem:[#allocation155_spill] sm:$0xff] %v13135_v17  ;;  %v13150_v53 = vand.u32 4294901760, %v3581_v10  ;;  %v13152_v14 = vsub.f32 %v11067_v28, %v9005_v34  ;;  %v3346_v61 = vpop.f32.mrb[43].mxu0  ;;  %9120 = vmatmul.mubr.f32.gmra.mrb[34].mxu1 %v4039_v27  ;;  %v14654_v33 = vand.u32 4294901760, %v13135_v17  ;;  %v4059_v28 = vand.u32 4294901760, %v4058_v2 }
 0x3f4   :  { %15517 = vst [vmem:[#allocation156_spill] sm:$0xff] %v13143_v19  ;;  %v13155_v26 = vand.u32 4294901760, %v3580_v41  ;;  %v13157_v63 = vsub.f32 %v11068_v51, %v3346_v61  ;;  %v4049_v42 = vand.u32 4294901760, %v4048_v31  ;;  %v14662_v9 = vand.u32 4294901760, %v13143_v19 }
 0x3f5   :  { %15518 = vst [vmem:[#allocation158_spill] sm:$0xff] %v13150_v53  ;;  %15519 = vst [vmem:[#allocation161_spill] sm:$0xff] %v13152_v14  ;;  %v13161_v22 = vsub.f32 %v3581_v10, %v13150_v53  ;;  %v3583_v40 = vmul.f32 %v13152_v14, %v13152_v14  ;;  %v4078_v27 = vsub.f32 %v13135_v17, %v14654_v33  ;;  %v11069_v14 = vld [vmem:[#allocation2 + $0x168] sm:$0xff]  ;;  %v11070_v17 = vld [vmem:[#allocation2 + $0x160] sm:$0xff] }
 0x3f6   :  { %15520 = vst [vmem:[#allocation162_spill] sm:$0xff] %v13155_v26  ;;  %15521 = vst [vmem:[#allocation163_spill] sm:$0xff] %v13157_v63  ;;  %v13169_v34 = vsub.f32 %v3580_v41, %v13155_v26  ;;  %v3582_v51 = vmul.f32 %v13157_v63, %v13157_v63  ;;  %v9008_v61 = vpop.f32.mrb[44].mxu0  ;;  %9122 = vmatprep.mubr.f32.mxu1 %v4049_v42  ;;  %v4068_v10 = vsub.f32 %v13143_v19, %v14662_v9 }
 0x3f7   :  { %15522 = vst [vmem:[#allocation165_spill] sm:$0xff] %v13161_v22  ;;  %v13176_v31 = vand.u32 4294901760, %v3583_v40  ;;  %v13178_v2 = vsub.f32 %v11069_v14, %v9008_v61  ;;  %v3358_v7 = vpop.f32.mrb[45].mxu0  ;;  %9123 = vmatmul.mubr.f32.gmra.mrb[36].mxu1 %v4059_v28  ;;  %v14666_v33 = vand.u32 4294901760, %v13161_v22  ;;  %v4079_v14 = vand.u32 4294901760, %v4078_v27 }
 0x3f8   :  { %15523 = vst [vmem:[#allocation37_spill] sm:$0xff] %v13169_v34  ;;  %v13181_v41 = vand.u32 4294901760, %v3582_v51  ;;  %v13183_v52 = vsub.f32 %v11070_v17, %v3358_v7  ;;  %v4069_v63 = vand.u32 4294901760, %v4068_v10  ;;  %v14674_v42 = vand.u32 4294901760, %v13169_v34 }
 0x3f9   :  { %15524 = vst [vmem:[#allocation42_spill] sm:$0xff] %v13176_v31  ;;  %15525 = vst [vmem:[#allocation47_spill] sm:$0xff] %v13178_v2  ;;  %v13187_v32 = vsub.f32 %v3583_v40, %v13176_v31  ;;  %v3585_v9 = vmul.f32 %v13178_v2, %v13178_v2  ;;  %v4098_v28 = vsub.f32 %v13161_v22, %v14666_v33  ;;  %v11071_v2 = vld [vmem:[#allocation2 + $0x178] sm:$0xff]  ;;  %v11072_v22 = vld [vmem:[#allocation2 + $0x170] sm:$0xff] }
 0x3fa   :  { %15526 = vst [vmem:[#allocation66_spill] sm:$0xff] %v13181_v41  ;;  %15527 = vst [vmem:[#allocation79_spill] sm:$0xff] %v13183_v52  ;;  %v13195_v61 = vsub.f32 %v3582_v51, %v13181_v41  ;;  %v3584_v17 = vmul.f32 %v13183_v52, %v13183_v52  ;;  %v9011_v7 = vpop.f32.mrb[46].mxu0  ;;  %9125 = vmatprep.mubr.f32.mxu1 %v4069_v63  ;;  %v4088_v40 = vsub.f32 %v13169_v34, %v14674_v42 }
 0x3fb   :  { %15528 = vst [vmem:[#allocation94_spill] sm:$0xff] %v13187_v32  ;;  %v13202_v10 = vand.u32 4294901760, %v3585_v9  ;;  %v13204_v27 = vsub.f32 %v11071_v2, %v9011_v7  ;;  %v3370_v19 = vpop.f32.mrb[47].mxu0  ;;  %9126 = vmatmul.mubr.f32.gmra.mrb[38].mxu1 %v4079_v14  ;;  %v14678_v33 = vand.u32 4294901760, %v13187_v32  ;;  %v4099_v2 = vand.u32 4294901760, %v4098_v28 }
 0x3fc   :  { %15529 = vst [vmem:[#allocation109_spill] sm:$0xff] %v13195_v61  ;;  %v13207_v51 = vand.u32 4294901760, %v3584_v17  ;;  %v13209_v31 = vsub.f32 %v11072_v22, %v3370_v19  ;;  %v4089_v52 = vand.u32 4294901760, %v4088_v40  ;;  %v14686_v63 = vand.u32 4294901760, %v13195_v61 }
 0x3fd   :  { %15530 = vst [vmem:[#allocation124_spill] sm:$0xff] %v13202_v10  ;;  %15531 = vst [vmem:[#allocation125_spill] sm:$0xff] %v13204_v27  ;;  %v13213_v41 = vsub.f32 %v3585_v9, %v13202_v10  ;;  %v3587_v42 = vmul.f32 %v13204_v27, %v13204_v27  ;;  %v4118_v14 = vsub.f32 %v13187_v32, %v14678_v33  ;;  %v11073_v27 = vld [vmem:[#allocation2 + $0x188] sm:$0xff]  ;;  %v11074_v32 = vld [vmem:[#allocation2 + $0x180] sm:$0xff] }
 0x3fe   :  { %15532 = vst [vmem:[#allocation170_spill] sm:$0xff] %v13207_v51  ;;  %15533 = vst [vmem:[#allocation171_spill] sm:$0xff] %v13209_v31  ;;  %v13221_v7 = vsub.f32 %v3584_v17, %v13207_v51  ;;  %v3586_v22 = vmul.f32 %v13209_v31, %v13209_v31  ;;  %v9014_v19 = vpop.f32.mrb[48].mxu0  ;;  %9128 = vmatprep.mubr.f32.mxu1 %v4089_v52  ;;  %v4108_v9 = vsub.f32 %v13195_v61, %v14686_v63 }
 0x3ff   :  { %15534 = vst [vmem:[#allocation172_spill] sm:$0xff] %v13213_v41  ;;  %v13228_v40 = vand.u32 4294901760, %v3587_v42  ;;  %v13230_v28 = vsub.f32 %v11073_v27, %v9014_v19  ;;  %v3382_v34 = vpop.f32.mrb[49].mxu0  ;;  %9129 = vmatmul.mubr.f32.gmra.mrb[40].mxu1 %v4099_v2  ;;  %v14690_v33 = vand.u32 4294901760, %v13213_v41  ;;  %v4119_v27 = vand.u32 4294901760, %v4118_v14 }
 0x400   :  { %15535 = vst [vmem:[#allocation173_spill] sm:$0xff] %v13221_v7  ;;  %v13233_v17 = vand.u32 4294901760, %v3586_v22  ;;  %v13235_v10 = vsub.f32 %v11074_v32, %v3382_v34  ;;  %v4109_v31 = vand.u32 4294901760, %v4108_v9  ;;  %v14698_v52 = vand.u32 4294901760, %v13221_v7 }
 0x401   :  { %15536 = vst [vmem:[#allocation174_spill] sm:$0xff] %v13228_v40  ;;  %15537 = vst [vmem:[#allocation175_spill] sm:$0xff] %v13230_v28  ;;  %v13239_v51 = vsub.f32 %v3587_v42, %v13228_v40  ;;  %v3589_v63 = vmul.f32 %v13230_v28, %v13230_v28  ;;  %v4138_v2 = vsub.f32 %v13213_v41, %v14690_v33  ;;  %v11075_v28 = vld [vmem:[#allocation2 + $0x198] sm:$0xff]  ;;  %v11076_v41 = vld [vmem:[#allocation2 + $0x190] sm:$0xff] }
 0x402   :  { %15538 = vst [vmem:[#allocation176_spill] sm:$0xff] %v13233_v17  ;;  %15539 = vst [vmem:[#allocation177_spill] sm:$0xff] %v13235_v10  ;;  %v13247_v19 = vsub.f32 %v3586_v22, %v13233_v17  ;;  %v3588_v32 = vmul.f32 %v13235_v10, %v13235_v10  ;;  %v9017_v34 = vpop.f32.mrb[50].mxu0  ;;  %9131 = vmatprep.mubr.f32.mxu1 %v4109_v31  ;;  %v4128_v42 = vsub.f32 %v13221_v7, %v14698_v52 }
 0x403   :  { %15540 = vst [vmem:[#allocation178_spill] sm:$0xff] %v13239_v51  ;;  %v13254_v9 = vand.u32 4294901760, %v3589_v63  ;;  %v13256_v14 = vsub.f32 %v11075_v28, %v9017_v34  ;;  %v3394_v61 = vpop.f32.mrb[51].mxu0  ;;  %9132 = vmatmul.mubr.f32.gmra.mrb[42].mxu1 %v4119_v27  ;;  %v14702_v33 = vand.u32 4294901760, %v13239_v51  ;;  %v4139_v28 = vand.u32 4294901760, %v4138_v2 }
 0x404   :  { %15541 = vst [vmem:[#allocation179_spill] sm:$0xff] %v13247_v19  ;;  %v13259_v22 = vand.u32 4294901760, %v3588_v32  ;;  %v13261_v40 = vsub.f32 %v11076_v41, %v3394_v61  ;;  %v4129_v10 = vand.u32 4294901760, %v4128_v42  ;;  %v14710_v31 = vand.u32 4294901760, %v13247_v19 }
 0x405   :  { %15542 = vst [vmem:[#allocation180_spill] sm:$0xff] %v13254_v9  ;;  %15543 = vst [vmem:[#allocation181_spill] sm:$0xff] %v13256_v14  ;;  %v13265_v17 = vsub.f32 %v3589_v63, %v13254_v9  ;;  %v3591_v52 = vmul.f32 %v13256_v14, %v13256_v14  ;;  %v4158_v27 = vsub.f32 %v13239_v51, %v14702_v33  ;;  %v11077_v14 = vld [vmem:[#allocation2 + $0x1a8] sm:$0xff]  ;;  %v11078_v51 = vld [vmem:[#allocation2 + $0x1a0] sm:$0xff] }
 0x406   :  { %15544 = vst [vmem:[#allocation182_spill] sm:$0xff] %v13259_v22  ;;  %15545 = vst [vmem:[#allocation183_spill] sm:$0xff] %v13261_v40  ;;  %v13273_v34 = vsub.f32 %v3588_v32, %v13259_v22  ;;  %v3590_v41 = vmul.f32 %v13261_v40, %v13261_v40  ;;  %v9020_v61 = vpop.f32.mrb[52].mxu0  ;;  %9134 = vmatprep.mubr.f32.mxu1 %v4129_v10  ;;  %v4148_v63 = vsub.f32 %v13247_v19, %v14710_v31 }
 0x407   :  { %15546 = vst [vmem:[#allocation184_spill] sm:$0xff] %v13265_v17  ;;  %v13280_v42 = vand.u32 4294901760, %v3591_v52  ;;  %v13282_v2 = vsub.f32 %v11077_v14, %v9020_v61  ;;  %v3406_v7 = vpop.f32.mrb[53].mxu0  ;;  %9135 = vmatmul.mubr.f32.gmra.mrb[44].mxu1 %v4139_v28  ;;  %v14714_v33 = vand.u32 4294901760, %v13265_v17  ;;  %v4159_v14 = vand.u32 4294901760, %v4158_v27 }
 0x408   :  { %15547 = vst [vmem:[#allocation185_spill] sm:$0xff] %v13273_v34  ;;  %v13285_v32 = vand.u32 4294901760, %v3590_v41  ;;  %v13287_v9 = vsub.f32 %v11078_v51, %v3406_v7  ;;  %v4149_v40 = vand.u32 4294901760, %v4148_v63  ;;  %v14722_v10 = vand.u32 4294901760, %v13273_v34 }
 0x409   :  { %15548 = vst [vmem:[#allocation186_spill] sm:$0xff] %v13280_v42  ;;  %15549 = vst [vmem:[#allocation187_spill] sm:$0xff] %v13282_v2  ;;  %v13291_v22 = vsub.f32 %v3591_v52, %v13280_v42  ;;  %v3593_v31 = vmul.f32 %v13282_v2, %v13282_v2  ;;  %v4178_v28 = vsub.f32 %v13265_v17, %v14714_v33  ;;  %v11079_v2 = vld [vmem:[#allocation2 + $0x1b8] sm:$0xff]  ;;  %v11080_v17 = vld [vmem:[#allocation2 + $0x1b0] sm:$0xff] }
 0x40a   :  { %15550 = vst [vmem:[#allocation188_spill] sm:$0xff] %v13285_v32  ;;  %15551 = vst [vmem:[#allocation189_spill] sm:$0xff] %v13287_v9  ;;  %v13299_v61 = vsub.f32 %v3590_v41, %v13285_v32  ;;  %v3592_v51 = vmul.f32 %v13287_v9, %v13287_v9  ;;  %v9023_v7 = vpop.f32.mrb[54].mxu0  ;;  %9137 = vmatprep.mubr.f32.mxu1 %v4149_v40  ;;  %v4168_v52 = vsub.f32 %v13273_v34, %v14722_v10 }
 0x40b   :  { %15552 = vst [vmem:[#allocation190_spill] sm:$0xff] %v13291_v22  ;;  %v13306_v63 = vand.u32 4294901760, %v3593_v31  ;;  %v13308_v27 = vsub.f32 %v11079_v2, %v9023_v7  ;;  %v3418_v19 = vpop.f32.mrb[55].mxu0  ;;  %9138 = vmatmul.mubr.f32.gmra.mrb[46].mxu1 %v4159_v14  ;;  %v14726_v33 = vand.u32 4294901760, %v13291_v22  ;;  %v4179_v2 = vand.u32 4294901760, %v4178_v28 }
 0x40c   :  { %15553 = vst [vmem:[#allocation191_spill] sm:$0xff] %v13299_v61  ;;  %v13311_v41 = vand.u32 4294901760, %v3592_v51  ;;  %v13313_v42 = vsub.f32 %v11080_v17, %v3418_v19  ;;  %v4169_v9 = vand.u32 4294901760, %v4168_v52  ;;  %v14734_v40 = vand.u32 4294901760, %v13299_v61 }
 0x40d   :  { %15554 = vst [vmem:[#allocation192_spill] sm:$0xff] %v13306_v63  ;;  %15555 = vst [vmem:[#allocation193_spill] sm:$0xff] %v13308_v27  ;;  %v13317_v32 = vsub.f32 %v3593_v31, %v13306_v63  ;;  %v3595_v10 = vmul.f32 %v13308_v27, %v13308_v27  ;;  %v4198_v14 = vsub.f32 %v13291_v22, %v14726_v33  ;;  %v11081_v27 = vld [vmem:[#allocation2 + $0x1c8] sm:$0xff]  ;;  %v11082_v22 = vld [vmem:[#allocation2 + $0x1c0] sm:$0xff] }
 0x40e   :  { %15556 = vst [vmem:[#allocation194_spill] sm:$0xff] %v13311_v41  ;;  %15557 = vst [vmem:[#allocation195_spill] sm:$0xff] %v13313_v42  ;;  %v13325_v7 = vsub.f32 %v3592_v51, %v13311_v41  ;;  %v3594_v17 = vmul.f32 %v13313_v42, %v13313_v42  ;;  %v9026_v19 = vpop.f32.mrb[56].mxu0  ;;  %9140 = vmatprep.mubr.f32.mxu1 %v4169_v9  ;;  %v4188_v31 = vsub.f32 %v13299_v61, %v14734_v40 }
 0x40f   :  { %15558 = vst [vmem:[#allocation196_spill] sm:$0xff] %v13317_v32  ;;  %v13332_v52 = vand.u32 4294901760, %v3595_v10  ;;  %v13334_v28 = vsub.f32 %v11081_v27, %v9026_v19  ;;  %v3430_v34 = vpop.f32.mrb[57].mxu0  ;;  %9141 = vmatmul.mubr.f32.gmra.mrb[48].mxu1 %v4179_v2  ;;  %v14738_v33 = vand.u32 4294901760, %v13317_v32  ;;  %v4199_v27 = vand.u32 4294901760, %v4198_v14 }
 0x410   :  { %15559 = vst [vmem:[#allocation197_spill] sm:$0xff] %v13325_v7  ;;  %v13337_v51 = vand.u32 4294901760, %v3594_v17  ;;  %v13339_v63 = vsub.f32 %v11082_v22, %v3430_v34  ;;  %v4189_v42 = vand.u32 4294901760, %v4188_v31  ;;  %v14746_v9 = vand.u32 4294901760, %v13325_v7 }
 0x411   :  { %15560 = vst [vmem:[#allocation198_spill] sm:$0xff] %v13332_v52  ;;  %15561 = vst [vmem:[#allocation199_spill] sm:$0xff] %v13334_v28  ;;  %v13343_v41 = vsub.f32 %v3595_v10, %v13332_v52  ;;  %v3597_v40 = vmul.f32 %v13334_v28, %v13334_v28  ;;  %v4218_v2 = vsub.f32 %v13317_v32, %v14738_v33  ;;  %v11083_v28 = vld [vmem:[#allocation2 + $0x1d8] sm:$0xff]  ;;  %v11084_v32 = vld [vmem:[#allocation2 + $0x1d0] sm:$0xff] }
 0x412   :  { %15562 = vst [vmem:[#allocation200_spill] sm:$0xff] %v13337_v51  ;;  %15563 = vst [vmem:[#allocation201_spill] sm:$0xff] %v13339_v63  ;;  %v13351_v19 = vsub.f32 %v3594_v17, %v13337_v51  ;;  %v3596_v22 = vmul.f32 %v13339_v63, %v13339_v63  ;;  %v9029_v34 = vpop.f32.mrb[58].mxu0  ;;  %9143 = vmatprep.mubr.f32.mxu1 %v4189_v42  ;;  %v4208_v10 = vsub.f32 %v13325_v7, %v14746_v9 }
 0x413   :  { %15564 = vst [vmem:[#allocation202_spill] sm:$0xff] %v13343_v41  ;;  %v13358_v31 = vand.u32 4294901760, %v3597_v40  ;;  %v13360_v14 = vsub.f32 %v11083_v28, %v9029_v34  ;;  %v3442_v61 = vpop.f32.mrb[59].mxu0  ;;  %9144 = vmatmul.mubr.f32.gmra.mrb[50].mxu1 %v4199_v27  ;;  %v14750_v33 = vand.u32 4294901760, %v13343_v41  ;;  %v4219_v28 = vand.u32 4294901760, %v4218_v2 }
 0x414   :  { %15565 = vst [vmem:[#allocation203_spill] sm:$0xff] %v13351_v19  ;;  %v13363_v17 = vand.u32 4294901760, %v3596_v22  ;;  %v13365_v52 = vsub.f32 %v11084_v32, %v3442_v61  ;;  %v4209_v63 = vand.u32 4294901760, %v4208_v10  ;;  %v14758_v42 = vand.u32 4294901760, %v13351_v19 }
 0x415   :  { %15566 = vst [vmem:[#allocation204_spill] sm:$0xff] %v13358_v31  ;;  %15567 = vst [vmem:[#allocation205_spill] sm:$0xff] %v13360_v14  ;;  %v13369_v51 = vsub.f32 %v3597_v40, %v13358_v31  ;;  %v3599_v9 = vmul.f32 %v13360_v14, %v13360_v14  ;;  %v4238_v27 = vsub.f32 %v13343_v41, %v14750_v33  ;;  %v11085_v14 = vld [vmem:[#allocation2 + $0x1e8] sm:$0xff]  ;;  %v11086_v41 = vld [vmem:[#allocation2 + $0x1e0] sm:$0xff] }
 0x416   :  { %15568 = vst [vmem:[#allocation206_spill] sm:$0xff] %v13363_v17  ;;  %15569 = vst [vmem:[#allocation207_spill] sm:$0xff] %v13365_v52  ;;  %v13377_v34 = vsub.f32 %v3596_v22, %v13363_v17  ;;  %v3598_v32 = vmul.f32 %v13365_v52, %v13365_v52  ;;  %v9032_v61 = vpop.f32.mrb[60].mxu0  ;;  %9146 = vmatprep.mubr.f32.mxu1 %v4209_v63  ;;  %v4228_v40 = vsub.f32 %v13351_v19, %v14758_v42 }
 0x417   :  { %15570 = vst [vmem:[#allocation208_spill] sm:$0xff] %v13369_v51  ;;  %v13384_v10 = vand.u32 4294901760, %v3599_v9  ;;  %v13386_v2 = vsub.f32 %v11085_v14, %v9032_v61  ;;  %v3454_v7 = vpop.f32.mrb[61].mxu0  ;;  %9147 = vmatmul.mubr.f32.gmra.mrb[52].mxu1 %v4219_v28  ;;  %v14762_v33 = vand.u32 4294901760, %v13369_v51  ;;  %v4239_v14 = vand.u32 4294901760, %v4238_v27 }
 0x418   :  { %v13389_v22 = vand.u32 4294901760, %v3598_v32  ;;  %v13391_v31 = vsub.f32 %v11086_v41, %v3454_v7  ;;  %v4229_v52 = vand.u32 4294901760, %v4228_v40  ;;  %v14770_v63 = vand.u32 4294901760, %v13377_v34 }
 0x419   :  { %15571 = vst [vmem:[#allocation209_spill] sm:$0xff] %v13384_v10  ;;  %15572 = vst [vmem:[#allocation210_spill] sm:$0xff] %v13386_v2  ;;  %v13395_v17 = vsub.f32 %v3599_v9, %v13384_v10  ;;  %v3601_v42 = vmul.f32 %v13386_v2, %v13386_v2  ;;  %v4258_v28 = vsub.f32 %v13369_v51, %v14762_v33  ;;  %v11087_v2 = vld [vmem:[#allocation2 + $0x1f8] sm:$0xff]  ;;  %v11088_v51 = vld [vmem:[#allocation2 + $0x1f0] sm:$0xff] }
 0x41a   :  { %15573 = vst [vmem:[#allocation211_spill] sm:$0xff] %v13389_v22  ;;  %15574 = vst [vmem:[#allocation212_spill] sm:$0xff] %v13391_v31  ;;  %v13403_v61 = vsub.f32 %v3598_v32, %v13389_v22  ;;  %v3600_v41 = vmul.f32 %v13391_v31, %v13391_v31  ;;  %v9035_v7 = vpop.f32.mrb[62].mxu0  ;;  %9149 = vmatprep.mubr.f32.mxu1 %v4229_v52  ;;  %v4248_v9 = vsub.f32 %v13377_v34, %v14770_v63 }
 0x41b   :  { %15575 = vst [vmem:[#allocation213_spill] sm:$0xff] %v13395_v17  ;;  %v13410_v40 = vand.u32 4294901760, %v3601_v42  ;;  %v13412_v27 = vsub.f32 %v11087_v2, %v9035_v7  ;;  %v3466_v19 = vpop.f32.mrb[63].mxu0  ;;  %9150 = vmatmul.mubr.f32.gmra.mrb[54].mxu1 %v4239_v14  ;;  %v14772_v33 = vand.u32 4294901760, %v13395_v17  ;;  %v4259_v2 = vand.u32 4294901760, %v4258_v28 }
 0x41c   :  { %15576 = vst [vmem:[#allocation214_spill] sm:$0xff] %v13403_v61  ;;  %v13415_v32 = vand.u32 4294901760, %v3600_v41  ;;  %v13417_v10 = vsub.f32 %v11088_v51, %v3466_v19  ;;  %v4249_v31 = vand.u32 4294901760, %v4248_v9  ;;  %v14775_v52 = vand.u32 4294901760, %v13403_v61 }
 0x41d   :  { %15577 = vst [vmem:[#allocation215_spill] sm:$0xff] %v13410_v40  ;;  %15578 = vst [vmem:[#allocation216_spill] sm:$0xff] %v13412_v27  ;;  %v13421_v22 = vsub.f32 %v3601_v42, %v13410_v40  ;;  %v3603_v63 = vmul.f32 %v13412_v27, %v13412_v27  ;;  %v4278_v14 = vsub.f32 %v13395_v17, %v14772_v33 }
 0x41e   :  { %15579 = vst [vmem:[#allocation217_spill] sm:$0xff] %v13415_v32  ;;  %15580 = vst [vmem:[#allocation218_spill] sm:$0xff] %v13417_v10  ;;  %v13429_v7 = vsub.f32 %v3600_v41, %v13415_v32  ;;  %v3602_v51 = vmul.f32 %v13417_v10, %v13417_v10  ;;  %9152 = vmatprep.mubr.f32.mxu1 %v4249_v31  ;;  %v4268_v19 = vsub.f32 %v13403_v61, %v14775_v52 }
 0x41f   :  { %v13436_v42 = vand.u32 4294901760, %v3603_v63  ;;  %9153 = vmatmul.mubr.f32.gmra.mrb[56].mxu1 %v4259_v2  ;;  %v14779_v28 = vand.u32 4294901760, %v13421_v22  ;;  %v4279_v17 = vand.u32 4294901760, %v4278_v14 }
 0x420   :  { %15581 = vst [vmem:[#allocation219_spill] sm:$0xff] %v13429_v7  ;;  %v13439_v9 = vand.u32 4294901760, %v3602_v51  ;;  %v4269_v27 = vand.u32 4294901760, %v4268_v19  ;;  %v14782_v33 = vand.u32 4294901760, %v13429_v7 }
 0x421   :  { %15582 = vst [vmem:[#allocation220_spill] sm:$0xff] %v13436_v42  ;;  %v13443_v41 = vsub.f32 %v3603_v63, %v13436_v42  ;;  %v4298_v31 = vsub.f32 %v13421_v22, %v14779_v28 }
 0x422   :  { %15583 = vst [vmem:[#allocation221_spill] sm:$0xff] %v13439_v9  ;;  %v13449_v52 = vsub.f32 %v3602_v51, %v13439_v9  ;;  %9155 = vmatprep.mubr.f32.mxu1 %v4269_v27  ;;  %v4288_v2 = vsub.f32 %v13429_v7, %v14782_v33  ;;  %v15604_v33 = vld [vmem:[#allocation192_spill] sm:$0xff] }
 0x423   :  { %9156 = vmatmul.mubr.f32.gmra.mrb[58].mxu1 %v4279_v17  ;;  %v14780_v19 = vand.u32 4294901760, %v13443_v41  ;;  %v4299_v61 = vand.u32 4294901760, %v4298_v31  ;;  %v15585_v17 = vld [vmem:[#allocation168_spill] sm:$0xff]  ;;  %v15590_v31 = vld [vmem:[#allocation159_spill] sm:$0xff] }
 0x424   :  { %15584 = vst [vmem:[#allocation222_spill] sm:$0xff] %v13449_v52  ;;  %v4289_v10 = vand.u32 4294901760, %v4288_v2  ;;  %v14781_v63 = vand.u32 4294901760, %v13449_v52  ;;  %v15591_v2 = vld [vmem:[#allocation167_spill] sm:$0xff] }
 0x425   :  { %v4318_v14 = vsub.f32 %v13443_v41, %v14780_v19  ;;  %v15602_v19 = vld [vmem:[#allocation186_spill] sm:$0xff] }
 0x426   :  { %9158 = vmatprep.mubr.f32.mxu1 %v4289_v10  ;;  %v4308_v27 = vsub.f32 %v13449_v52, %v14781_v63  ;;  %v15586_v10 = vld [vmem:[#allocation169_spill] sm:$0xff]  ;;  %v15603_v63 = vld [vmem:[#allocation194_spill] sm:$0xff] }
 0x427   :  { %9159 = vmatmul.mubr.f32.gmra.mrb[60].mxu1 %v4299_v61  ;;  %v4319_v28 = vand.u32 4294901760, %v4318_v14  ;;  %v15587_v61 = vld [vmem:[#allocation129_spill] sm:$0xff]  ;;  %v15592_v14 = vld [vmem:[#allocation11_spill] sm:$0xff] }
 0x428   :  { %v4309_v51 = vand.u32 4294901760, %v4308_v27  ;;  %v15593_v27 = vld [vmem:[#allocation66_spill] sm:$0xff] }
 0x42a   :  { %9161 = vmatprep.mubr.f32.mxu1 %v4309_v51  ;;  %v15594_v51 = vld [vmem:[#allocation42_spill] sm:$0xff] }
 0x42b   :  { %9162 = vmatmul.mubr.f32.gmra.mrb[62].mxu1 %v4319_v28  ;;  %v15589_v28 = vld [vmem:[#allocation142_spill] sm:$0xff] }
 0x42c   :  { %9196 = vmatprep.mubr.f32.mxu1 %v12626_v60  ;;  %v15675_v60 = vld [vmem:[#allocation208_spill] sm:$0xff] }
 0x42f   :  { %9197 = vmatmul.mubr.f32.vlgmr.msra.gmra.mrb[0].mxu1 %v12622_v15  ;;  %v15674_v15 = vld [vmem:[#allocation202_spill] sm:$0xff] }
 0x430   :  { %9199 = vmatprep.mubr.f32.mxu1 %v12645_v16  ;;  %10063 = vmatpush3.bf16.msra.mxu1 %v15462_v56  ;;  %v15588_v56 = vld [vmem:[#allocation130_spill] sm:$0xff]  ;;  %v15673_v16 = vld [vmem:[#allocation203_spill] sm:$0xff] }
 0x431   :  { %10065 = vmatprep.subr.bf16.mxu1 %v15585_v17 }
 0x433   :  { %9200 = vmatmul.mubr.f32.gmra.mrb[2].mxu1 %v12640_v36  ;;  %v15671_v36 = vld [vmem:[#allocation197_spill] sm:$0xff] }
 0x434   :  { %9202 = vmatprep.mubr.f32.mxu1 %v12671_v24  ;;  %10067 = vmatpush3.bf16.msra.mxu1 %v15585_v17  ;;  %v15595_v17 = vld [vmem:[#allocation170_spill] sm:$0xff] }
 0x435   :  { %10069 = vmatprep.subr.bf16.mxu1 %v15586_v10  ;;  %v15670_v24 = vld [vmem:[#allocation190_spill] sm:$0xff] }
 0x437   :  { %9203 = vmatmul.mubr.f32.gmra.mrb[4].mxu1 %v12666_v5  ;;  %v15668_v5 = vld [vmem:[#allocation184_spill] sm:$0xff] }
 0x438   :  { %9205 = vmatprep.mubr.f32.mxu1 %v12697_v35  ;;  %10071 = vmatpush3.bf16.msra.mxu1 %v15586_v10  ;;  %v15596_v10 = vld [vmem:[#allocation124_spill] sm:$0xff]  ;;  %v15667_v35 = vld [vmem:[#allocation185_spill] sm:$0xff] }
 0x439   :  { %10073 = vmatprep.subr.bf16.mxu1 %v15587_v61 }
 0x43b   :  { %9206 = vmatmul.mubr.f32.gmra.mrb[6].mxu1 %v12692_v59  ;;  %v15665_v59 = vld [vmem:[#allocation179_spill] sm:$0xff] }
 0x43c   :  { %9208 = vmatprep.mubr.f32.mxu1 %v12725_v3  ;;  %10075 = vmatpush3.bf16.msra.mxu1 %v15587_v61  ;;  %v15597_v61 = vld [vmem:[#allocation176_spill] sm:$0xff] }
 0x43d   :  { %10077 = vmatprep.subr.bf16.mxu1 %v15588_v56  ;;  %v15664_v3 = vld [vmem:[#allocation172_spill] sm:$0xff] }
 0x43f   :  { %9209 = vmatmul.mubr.f32.gmra.mrb[8].mxu1 %v12720_v8  ;;  %v15662_v8 = vld [vmem:[#allocation94_spill] sm:$0xff] }
 0x440   :  { %9211 = vmatprep.mubr.f32.mxu1 %v12753_v20  ;;  %10079 = vmatpush3.bf16.msra.mxu1 %v15588_v56  ;;  %v15598_v56 = vld [vmem:[#allocation174_spill] sm:$0xff]  ;;  %v15661_v20 = vld [vmem:[#allocation109_spill] sm:$0xff] }
 0x441   :  { %10081 = vmatprep.subr.bf16.mxu1 %v15589_v28 }
 0x443   :  { %9212 = vmatmul.mubr.f32.gmra.mrb[10].mxu1 %v12748_v48  ;;  %v15659_v48 = vld [vmem:[#allocation37_spill] sm:$0xff] }
 0x444   :  { %9214 = vmatprep.mubr.f32.mxu1 %v12781_v11  ;;  %10083 = vmatpush3.bf16.msra.mxu1 %v15589_v28  ;;  %v15599_v28 = vld [vmem:[#allocation182_spill] sm:$0xff]  ;;  %v15658_v11 = vld [vmem:[#allocation155_spill] sm:$0xff] }
 0x445   :  { %10085 = vmatprep.subr.bf16.mxu1 %v15590_v31 }
 0x447   :  { %9215 = vmatmul.mubr.f32.gmra.mrb[12].mxu1 %v12776_v29  ;;  %v15656_v29 = vld [vmem:[#allocation140_spill] sm:$0xff] }
 0x448   :  { %9217 = vmatprep.mubr.f32.mxu1 %v12809_v4  ;;  %10087 = vmatpush3.bf16.msra.mxu1 %v15590_v31  ;;  %v15600_v31 = vld [vmem:[#allocation180_spill] sm:$0xff] }
 0x449   :  { %10089 = vmatprep.subr.bf16.mxu1 %v15591_v2  ;;  %v15655_v4 = vld [vmem:[#allocation144_spill] sm:$0xff] }
 0x44b   :  { %9218 = vmatmul.mubr.f32.gmra.mrb[14].mxu1 %v12804_v12  ;;  %v15653_v12 = vld [vmem:[#allocation128_spill] sm:$0xff] }
 0x44c   :  { %9220 = vmatprep.mubr.f32.mxu1 %v12837_v6  ;;  %10091 = vmatpush3.bf16.msra.mxu1 %v15591_v2  ;;  %v15601_v2 = vld [vmem:[#allocation188_spill] sm:$0xff]  ;;  %v15652_v6 = vld [vmem:[#allocation113_spill] sm:$0xff] }
 0x44d   :  { %10093 = vmatprep.subr.bf16.mxu1 %v15592_v14 }
 0x44f   :  { %9221 = vmatmul.mubr.f32.gmra.mrb[16].mxu1 %v12832_v39  ;;  %v15651_v39 = vld [vmem:[#allocation115_spill] sm:$0xff] }
 0x450   :  { %9223 = vmatprep.mubr.f32.mxu1 %v12865_v1  ;;  %v15650_v1 = vld [vmem:[#allocation97_spill] sm:$0xff] }
 0x453   :  { %9224 = vmatmul.mubr.f32.gmra.mrb[18].mxu1 %v12860_v54  ;;  %v15649_v54 = vld [vmem:[#allocation102_spill] sm:$0xff] }
 0x454   :  { %9226 = vmatprep.mubr.f32.mxu1 %v12893_v46  ;;  %v15648_v46 = vld [vmem:[#allocation85_spill] sm:$0xff] }
 0x457   :  { %9227 = vmatmul.mubr.f32.gmra.mrb[20].mxu1 %v12888_v0  ;;  %v15647_v0 = vld [vmem:[#allocation86_spill] sm:$0xff] }
 0x458   :  { %9229 = vmatprep.mubr.f32.mxu1 %v12921_v45  ;;  %v15646_v45 = vld [vmem:[#allocation67_spill] sm:$0xff] }
 0x45b   :  { %9230 = vmatmul.mubr.f32.gmra.mrb[22].mxu1 %v12916_v58  ;;  %v15645_v58 = vld [vmem:[#allocation68_spill] sm:$0xff] }
 0x45c   :  { %9232 = vmatprep.mubr.f32.mxu1 %v12947_v62  ;;  %v15644_v62 = vld [vmem:[#allocation52_spill] sm:$0xff] }
 0x45f   :  { %9233 = vmatmul.mubr.f32.gmra.mrb[24].mxu1 %v12942_v57  ;;  %v15643_v57 = vld [vmem:[#allocation55_spill] sm:$0xff] }
 0x460   :  { %9235 = vmatprep.mubr.f32.mxu1 %v12973_v21  ;;  %v15642_v21 = vld [vmem:[#allocation39_spill] sm:$0xff] }
 0x463   :  { %9236 = vmatmul.mubr.f32.gmra.mrb[26].mxu1 %v12968_v49  ;;  %v15641_v49 = vld [vmem:[#allocation41_spill] sm:$0xff] }
 0x464   :  { %9238 = vmatprep.mubr.f32.mxu1 %v12999_v23  ;;  %v15640_v23 = vld [vmem:[#allocation25_spill] sm:$0xff] }
 0x467   :  { %9239 = vmatmul.mubr.f32.gmra.mrb[28].mxu1 %v12994_v13  ;;  %v15639_v13 = vld [vmem:[#allocation26_spill] sm:$0xff] }
 0x468   :  { %9241 = vmatprep.mubr.f32.mxu1 %v13025_v38  ;;  %v15638_v38 = vld [vmem:[#allocation160_spill] sm:$0xff] }
 0x46b   :  { %9242 = vmatmul.mubr.f32.gmra.mrb[30].mxu1 %v13020_v43  ;;  %v15637_v43 = vld [vmem:[#allocation164_spill] sm:$0xff] }
 0x46c   :  { %9244 = vmatprep.mubr.f32.mxu1 %v13051_v44  ;;  %v15636_v44 = vld [vmem:[#allocation132_spill] sm:$0xff] }
 0x46f   :  { %9245 = vmatmul.mubr.f32.gmra.mrb[32].mxu1 %v13046_v30  ;;  %v15635_v30 = vld [vmem:[#allocation15_spill] sm:$0xff] }
 0x470   :  { %9247 = vmatprep.mubr.f32.mxu1 %v13077_v47  ;;  %v15634_v47 = vld [vmem:[#allocation133_spill] sm:$0xff] }
 0x473   :  { %9248 = vmatmul.mubr.f32.gmra.mrb[34].mxu1 %v13072_v18  ;;  %v15633_v18 = vld [vmem:[#allocation116_spill] sm:$0xff] }
 0x474   :  { %9250 = vmatprep.mubr.f32.mxu1 %v13103_v55  ;;  %v15632_v55 = vld [vmem:[#allocation31_spill] sm:$0xff] }
 0x477   :  { %9251 = vmatmul.mubr.f32.gmra.mrb[36].mxu1 %v13098_v37  ;;  %v15631_v37 = vld [vmem:[#allocation118_spill] sm:$0xff] }
 0x478   :  { %9253 = vmatprep.mubr.f32.mxu1 %v13129_v50  ;;  %v15630_v50 = vld [vmem:[#allocation69_spill] sm:$0xff] }
 0x47b   :  { %9254 = vmatmul.mubr.f32.gmra.mrb[38].mxu1 %v13124_v25  ;;  %v15629_v25 = vld [vmem:[#allocation27_spill] sm:$0xff] }
 0x47c   :  { %9256 = vmatprep.mubr.f32.mxu1 %v13155_v26  ;;  %v15628_v26 = vld [vmem:[#allocation71_spill] sm:$0xff] }
 0x47f   :  { %9257 = vmatmul.mubr.f32.gmra.mrb[40].mxu1 %v13150_v53  ;;  %v15627_v53 = vld [vmem:[#allocation143_spill] sm:$0xff] }
 0x480   :  { %9259 = vmatprep.mubr.f32.mxu1 %v15593_v27  ;;  %v15626_v27 = vld [vmem:[#allocation22_spill] sm:$0xff] }
 0x483   :  { %9260 = vmatmul.mubr.f32.gmra.mrb[42].mxu1 %v15594_v51  ;;  %v15605_v51 = vld [vmem:[#allocation200_spill] sm:$0xff] }
 0x484   :  { %9262 = vmatprep.mubr.f32.mxu1 %v15595_v17  ;;  %v15606_v17 = vld [vmem:[#allocation198_spill] sm:$0xff] }
 0x487   :  { %9263 = vmatmul.mubr.f32.gmra.mrb[44].mxu1 %v15596_v10  ;;  %v15607_v10 = vld [vmem:[#allocation206_spill] sm:$0xff] }
 0x488   :  { %9265 = vmatprep.mubr.f32.mxu1 %v15597_v61  ;;  %v15608_v61 = vld [vmem:[#allocation204_spill] sm:$0xff] }
 0x48b   :  { %9266 = vmatmul.mubr.f32.gmra.mrb[46].mxu1 %v15598_v56  ;;  %v15609_v56 = vld [vmem:[#allocation211_spill] sm:$0xff] }
 0x48c   :  { %9268 = vmatprep.mubr.f32.mxu1 %v15599_v28  ;;  %v15610_v28 = vld [vmem:[#allocation209_spill] sm:$0xff] }
 0x48f   :  { %9269 = vmatmul.mubr.f32.gmra.mrb[48].mxu1 %v15600_v31  ;;  %v15625_v31 = vld [vmem:[#allocation145_spill] sm:$0xff] }
 0x490   :  { %9271 = vmatprep.mubr.f32.mxu1 %v15601_v2  ;;  %v15624_v2 = vld [vmem:[#allocation110_spill] sm:$0xff] }
 0x493   :  { %9272 = vmatmul.mubr.f32.gmra.mrb[50].mxu1 %v15602_v19  ;;  %v15623_v19 = vld [vmem:[#allocation17_spill] sm:$0xff] }
 0x494   :  { %9274 = vmatprep.mubr.f32.mxu1 %v15603_v63  ;;  %v15622_v63 = vld [vmem:[#allocation112_spill] sm:$0xff] }
 0x497   :  { %9275 = vmatmul.mubr.f32.gmra.mrb[52].mxu1 %v15604_v33  ;;  %v15611_v33 = vld [vmem:[#allocation18_spill] sm:$0xff] }
 0x498   :  { %9277 = vmatprep.mubr.f32.mxu1 %v15605_v51  ;;  %v15612_v51 = vld [vmem:[#allocation54_spill] sm:$0xff] }
 0x49b   :  { %9278 = vmatmul.mubr.f32.gmra.mrb[54].mxu1 %v15606_v17  ;;  %v15613_v17 = vld [vmem:[#allocation70_spill] sm:$0xff] }
 0x49c   :  { %9280 = vmatprep.mubr.f32.mxu1 %v15607_v10  ;;  %v15621_v10 = vld [vmem:[#allocation95_spill] sm:$0xff] }
 0x49f   :  { %9281 = vmatmul.mubr.f32.gmra.mrb[56].mxu1 %v15608_v61  ;;  %v15614_v61 = vld [vmem:[#allocation12_spill] sm:$0xff] }
 0x4a0   :  { %9283 = vmatprep.mubr.f32.mxu1 %v15609_v56  ;;  %v15615_v56 = vld [vmem:[#allocation64_spill] sm:$0xff] }
 0x4a3   :  { %9284 = vmatmul.mubr.f32.gmra.mrb[58].mxu1 %v15610_v28  ;;  %v15616_v28 = vld [vmem:[#allocation83_spill] sm:$0xff] }
 0x4a4   :  { %9286 = vmatprep.mubr.f32.mxu1 %v13415_v32  ;;  %v15620_v32 = vld [vmem:[#allocation16_spill] sm:$0xff] }
 0x4a7   :  { %9287 = vmatmul.mubr.f32.gmra.mrb[60].mxu1 %v13410_v40  ;;  %v15617_v40 = vld [vmem:[#allocation14_spill] sm:$0xff] }
 0x4a8   :  { %9289 = vmatprep.mubr.f32.mxu1 %v13439_v9  ;;  %v15618_v9 = vld [vmem:[#allocation80_spill] sm:$0xff] }
 0x4ab   :  { %9290 = vmatmul.mubr.f32.gmra.mrb[62].mxu1 %v13436_v42  ;;  %v15619_v42 = vld [vmem:[#allocation99_spill] sm:$0xff] }
 0x4ac   :  { %9324 = vmatprep.mubr.f32.mxu1 %v15611_v33 }
 0x4af   :  { %9325 = vmatmul.mubr.f32.vlgmr.msra.gmra.mrb[0].mxu1 %v15612_v51 }
 0x4b0   :  { %9327 = vmatprep.mubr.f32.mxu1 %v15613_v17  ;;  %10095 = vmatpush3.bf16.msra.mxu1 %v15592_v14 }
 0x4b1   :  { %10097 = vmatprep.subr.bf16.mxu1 %v15614_v61 }
 0x4b3   :  { %9328 = vmatmul.mubr.f32.gmra.mrb[2].mxu1 %v15615_v56 }
 0x4b4   :  { %9330 = vmatprep.mubr.f32.mxu1 %v15616_v28  ;;  %10099 = vmatpush3.bf16.msra.mxu1 %v15614_v61  ;;  %v15672_v61 = vld [vmem:[#allocation196_spill] sm:$0xff] }
 0x4b5   :  { %10101 = vmatprep.subr.bf16.mxu1 %v15617_v40 }
 0x4b7   :  { %9331 = vmatmul.mubr.f32.gmra.mrb[4].mxu1 %v15618_v9 }
 0x4b8   :  { %9333 = vmatprep.mubr.f32.mxu1 %v15619_v42  ;;  %10103 = vmatpush3.bf16.msra.mxu1 %v15617_v40  ;;  %v15669_v40 = vld [vmem:[#allocation191_spill] sm:$0xff] }
 0x4b9   :  { %10105 = vmatprep.subr.bf16.mxu1 %v15620_v32 }
 0x4bb   :  { %9334 = vmatmul.mubr.f32.gmra.mrb[6].mxu1 %v15621_v10 }
 0x4bc   :  { %9336 = vmatprep.mubr.f32.mxu1 %v15622_v63  ;;  %10107 = vmatpush3.bf16.msra.mxu1 %v15620_v32  ;;  %v15666_v32 = vld [vmem:[#allocation178_spill] sm:$0xff] }
 0x4bd   :  { %10109 = vmatprep.subr.bf16.mxu1 %v15623_v19 }
 0x4bf   :  { %9337 = vmatmul.mubr.f32.gmra.mrb[8].mxu1 %v15624_v2 }
 0x4c0   :  { %9339 = vmatprep.mubr.f32.mxu1 %v15625_v31  ;;  %10111 = vmatpush3.bf16.msra.mxu1 %v15623_v19  ;;  %v15663_v19 = vld [vmem:[#allocation173_spill] sm:$0xff] }
 0x4c1   :  { %10113 = vmatprep.subr.bf16.mxu1 %v15626_v27 }
 0x4c3   :  { %9340 = vmatmul.mubr.f32.gmra.mrb[10].mxu1 %v15627_v53 }
 0x4c4   :  { %9342 = vmatprep.mubr.f32.mxu1 %v15628_v26  ;;  %10115 = vmatpush3.bf16.msra.mxu1 %v15626_v27  ;;  %v15660_v27 = vld [vmem:[#allocation165_spill] sm:$0xff] }
 0x4c5   :  { %10117 = vmatprep.subr.bf16.mxu1 %v15629_v25 }
 0x4c7   :  { %9343 = vmatmul.mubr.f32.gmra.mrb[12].mxu1 %v15630_v50 }
 0x4c8   :  { %9345 = vmatprep.mubr.f32.mxu1 %v15631_v37  ;;  %10119 = vmatpush3.bf16.msra.mxu1 %v15629_v25  ;;  %v15657_v25 = vld [vmem:[#allocation156_spill] sm:$0xff] }
 0x4c9   :  { %10121 = vmatprep.subr.bf16.mxu1 %v15632_v55 }
 0x4cb   :  { %9346 = vmatmul.mubr.f32.gmra.mrb[14].mxu1 %v15633_v18 }
 0x4cc   :  { %9348 = vmatprep.mubr.f32.mxu1 %v15634_v47  ;;  %10123 = vmatpush3.bf16.msra.mxu1 %v15632_v55  ;;  %v15654_v55 = vld [vmem:[#allocation127_spill] sm:$0xff] }
 0x4cd   :  { %10125 = vmatprep.subr.bf16.mxu1 %v15635_v30 }
 0x4cf   :  { %9349 = vmatmul.mubr.f32.gmra.mrb[16].mxu1 %v15636_v44 }
 0x4d0   :  { %9351 = vmatprep.mubr.f32.mxu1 %v15637_v43 }
 0x4d3   :  { %9352 = vmatmul.mubr.f32.gmra.mrb[18].mxu1 %v15638_v38 }
 0x4d4   :  { %9354 = vmatprep.mubr.f32.mxu1 %v15639_v13 }
 0x4d7   :  { %9355 = vmatmul.mubr.f32.gmra.mrb[20].mxu1 %v15640_v23 }
 0x4d8   :  { %9357 = vmatprep.mubr.f32.mxu1 %v15641_v49 }
 0x4db   :  { %9358 = vmatmul.mubr.f32.gmra.mrb[22].mxu1 %v15642_v21 }
 0x4dc   :  { %9360 = vmatprep.mubr.f32.mxu1 %v15643_v57 }
 0x4df   :  { %9361 = vmatmul.mubr.f32.gmra.mrb[24].mxu1 %v15644_v62 }
 0x4e0   :  { %9363 = vmatprep.mubr.f32.mxu1 %v15645_v58 }
 0x4e3   :  { %9364 = vmatmul.mubr.f32.gmra.mrb[26].mxu1 %v15646_v45 }
 0x4e4   :  { %9366 = vmatprep.mubr.f32.mxu1 %v15647_v0 }
 0x4e7   :  { %9367 = vmatmul.mubr.f32.gmra.mrb[28].mxu1 %v15648_v46 }
 0x4e8   :  { %9369 = vmatprep.mubr.f32.mxu1 %v15649_v54 }
 0x4eb   :  { %9370 = vmatmul.mubr.f32.gmra.mrb[30].mxu1 %v15650_v1 }
 0x4ec   :  { %9372 = vmatprep.mubr.f32.mxu1 %v15651_v39 }
 0x4ef   :  { %9373 = vmatmul.mubr.f32.gmra.mrb[32].mxu1 %v15652_v6 }
 0x4f0   :  { %9375 = vmatprep.mubr.f32.mxu1 %v15653_v12 }
 0x4f3   :  { %9376 = vmatmul.mubr.f32.gmra.mrb[34].mxu1 %v15654_v55 }
 0x4f4   :  { %9378 = vmatprep.mubr.f32.mxu1 %v15655_v4 }
 0x4f7   :  { %9379 = vmatmul.mubr.f32.gmra.mrb[36].mxu1 %v15656_v29 }
 0x4f8   :  { %9381 = vmatprep.mubr.f32.mxu1 %v15657_v25 }
 0x4fb   :  { %9382 = vmatmul.mubr.f32.gmra.mrb[38].mxu1 %v15658_v11 }
 0x4fc   :  { %9384 = vmatprep.mubr.f32.mxu1 %v15659_v48 }
 0x4ff   :  { %9385 = vmatmul.mubr.f32.gmra.mrb[40].mxu1 %v15660_v27 }
 0x500   :  { %9387 = vmatprep.mubr.f32.mxu1 %v15661_v20 }
 0x503   :  { %9388 = vmatmul.mubr.f32.gmra.mrb[42].mxu1 %v15662_v8 }
 0x504   :  { %9390 = vmatprep.mubr.f32.mxu1 %v15663_v19 }
 0x507   :  { %9391 = vmatmul.mubr.f32.gmra.mrb[44].mxu1 %v15664_v3 }
 0x508   :  { %9393 = vmatprep.mubr.f32.mxu1 %v15665_v59 }
 0x50b   :  { %9394 = vmatmul.mubr.f32.gmra.mrb[46].mxu1 %v15666_v32  ;;  %v15676_v32 = vld [vmem:[#allocation214_spill] sm:$0xff] }
 0x50c   :  { %9396 = vmatprep.mubr.f32.mxu1 %v15667_v35  ;;  %v15677_v35 = vld [vmem:[#allocation213_spill] sm:$0xff] }
 0x50f   :  { %9397 = vmatmul.mubr.f32.gmra.mrb[48].mxu1 %v15668_v5 }
 0x510   :  { %9399 = vmatprep.mubr.f32.mxu1 %v15669_v40 }
 0x513   :  { %9400 = vmatmul.mubr.f32.gmra.mrb[50].mxu1 %v15670_v24 }
 0x514   :  { %9402 = vmatprep.mubr.f32.mxu1 %v15671_v36 }
 0x517   :  { %9403 = vmatmul.mubr.f32.gmra.mrb[52].mxu1 %v15672_v61 }
 0x518   :  { %9405 = vmatprep.mubr.f32.mxu1 %v15673_v16  ;;  %v15678_v16 = vand.u32 4294901760, %v15611_v33  ;;  %v15684_v33 = vld [vmem:[#allocation24_spill] sm:$0xff] }
 0x51b   :  { %9406 = vmatmul.mubr.f32.gmra.mrb[54].mxu1 %v15674_v15  ;;  %v15679_v15 = vand.u32 4294901760, %v15612_v51  ;;  %v15694_v51 = vand.u32 4294901760, %v15627_v53  ;;  %v15700_v53 = vand.u32 4294901760, %v15633_v18  ;;  %v15706_v18 = vand.u32 4294901760, %v15640_v23 }
 0x51c   :  { %9408 = vmatprep.mubr.f32.mxu1 %v13377_v34  ;;  %v15713_v23 = vand.u32 4294901760, %v15647_v0  ;;  %v15720_v0 = vand.u32 4294901760, %v15654_v55  ;;  %v15727_v55 = vand.u32 4294901760, %v15661_v20  ;;  %v15736_v20 = vand.u32 4294901760, %v15668_v5 }
 0x51d   :  { %v15745_v5 = vand.u32 4294901760, %v13377_v34  ;;  %v15756_v34 = vand.u32 4294901760, %v13443_v41 }
 0x51f   :  { %9409 = vmatmul.mubr.f32.gmra.mrb[56].mxu1 %v15675_v60  ;;  %v15680_v60 = vand.u32 4294901760, %v15613_v17  ;;  %v15696_v17 = vld [vmem:[#allocation35_spill] sm:$0xff] }
 0x520   :  { %9411 = vmatprep.mubr.f32.mxu1 %v15676_v32 }
 0x523   :  { %9412 = vmatmul.mubr.f32.gmra.mrb[58].mxu1 %v15677_v35  ;;  %v15681_v35 = vld [vmem:[#allocation23_spill] sm:$0xff] }
 0x524   :  { %9414 = vmatprep.mubr.f32.mxu1 %v13429_v7  ;;  %v15682_v7 = vand.u32 4294901760, %v15615_v56  ;;  %v15698_v56 = vand.u32 4294901760, %v15631_v37  ;;  %v15703_v37 = vand.u32 4294901760, %v15637_v43  ;;  %v15710_v43 = vand.u32 4294901760, %v15644_v62 }
 0x525   :  { %v15717_v62 = vand.u32 4294901760, %v15651_v39  ;;  %v15724_v39 = vand.u32 4294901760, %v15658_v11  ;;  %v15731_v11 = vand.u32 4294901760, %v15665_v59  ;;  %v15740_v59 = vand.u32 4294901760, %v15672_v61  ;;  %v15751_v61 = vld [vmem:[#allocation219_spill] sm:$0xff] }
 0x527   :  { %9415 = vmatmul.mubr.f32.gmra.mrb[60].mxu1 %v13421_v22 }
 0x528   :  { %9417 = vmatprep.mubr.f32.mxu1 %v13449_v52  ;;  %v15683_v52 = vand.u32 4294901760, %v15616_v28  ;;  %v15699_v28 = vld [vmem:[#allocation38_spill] sm:$0xff] }
 0x52b   :  { %9418 = vmatmul.mubr.f32.gmra.mrb[62].mxu1 %v13443_v41  ;;  %v15764_v41 = vld [vmem:[#allocation72_spill] sm:$0xff] }
 0x52c   :  { %9452 = vmatprep.mubr.f32.mxu1 %v15678_v16  ;;  %v15685_v16 = vand.u32 4294901760, %v15618_v9  ;;  %v15693_v9 = vld [vmem:[#allocation32_spill] sm:$0xff] }
 0x52f   :  { %9453 = vmatmul.mubr.f32.vlgmr.msra.gmra.mrb[0].mxu1 %v15679_v15  ;;  %v15686_v15 = vand.u32 4294901760, %v15619_v42  ;;  %v15692_v42 = vand.u32 4294901760, %v15625_v31  ;;  %v15704_v31 = vand.u32 4294901760, %v15638_v38  ;;  %v15711_v38 = vand.u32 4294901760, %v15645_v58 }
 0x530   :  { %9455 = vmatprep.mubr.f32.mxu1 %v15680_v60  ;;  %10127 = vmatpush3.bf16.msra.mxu1 %v15635_v30  ;;  %v15687_v60 = vld [vmem:[#allocation29_spill] sm:$0xff]  ;;  %v15688_v30 = vand.u32 4294901760, %v15621_v10  ;;  %v15697_v10 = vand.u32 4294901760, %v15630_v50  ;;  %v15702_v50 = vand.u32 4294901760, %v15636_v44  ;;  %v15709_v44 = vand.u32 4294901760, %v15643_v57 }
 0x531   :  { %10129 = vmatprep.subr.bf16.mxu1 %v15681_v35  ;;  %v15716_v57 = vand.u32 4294901760, %v15650_v1  ;;  %v15718_v58 = vand.u32 4294901760, %v15652_v6  ;;  %v15723_v1 = vand.u32 4294901760, %v15657_v25  ;;  %v15725_v6 = vand.u32 4294901760, %v15659_v48  ;;  %v15732_v48 = vld [vmem:[#allocation178_spill] sm:$0xff] }
 0x532   :  { %v15730_v25 = vand.u32 4294901760, %v15664_v3  ;;  %v15739_v3 = vand.u32 4294901760, %v15671_v36  ;;  %v15749_v36 = vld [vmem:[#allocation213_spill] sm:$0xff] }
 0x533   :  { %9456 = vmatmul.mubr.f32.gmra.mrb[2].mxu1 %v15682_v7  ;;  %v15689_v7 = vand.u32 4294901760, %v15622_v63  ;;  %v15695_v63 = vand.u32 4294901760, %v15628_v26  ;;  %v15701_v26 = vand.u32 4294901760, %v15634_v47  ;;  %v15707_v47 = vand.u32 4294901760, %v15641_v49 }
 0x534   :  { %9458 = vmatprep.mubr.f32.mxu1 %v15683_v52  ;;  %10131 = vmatpush3.bf16.msra.mxu1 %v15681_v35  ;;  %v15690_v35 = vld [vmem:[#allocation30_spill] sm:$0xff]  ;;  %v15691_v52 = vand.u32 4294901760, %v15624_v2  ;;  %v15705_v2 = vand.u32 4294901760, %v15639_v13  ;;  %v15712_v13 = vand.u32 4294901760, %v15646_v45  ;;  %v15714_v49 = vand.u32 4294901760, %v15648_v46 }
 0x535   :  { %10133 = vmatprep.subr.bf16.mxu1 %v15684_v33  ;;  %v15719_v45 = vand.u32 4294901760, %v15653_v12  ;;  %v15721_v46 = vand.u32 4294901760, %v15655_v4  ;;  %v15726_v12 = vand.u32 4294901760, %v15660_v27  ;;  %v15728_v4 = vand.u32 4294901760, %v15662_v8  ;;  %v15734_v27 = vld [vmem:[#allocation185_spill] sm:$0xff] }
 0x536   :  { %v15737_v8 = vand.u32 4294901760, %v15669_v40  ;;  %v15746_v40 = vld [vmem:[#allocation208_spill] sm:$0xff] }
 0x537   :  { %9459 = vmatmul.mubr.f32.gmra.mrb[4].mxu1 %v15685_v16  ;;  %v15733_v16 = vand.u32 4294901760, %v15732_v48  ;;  %v15796_v48 = vld [vmem:[#allocation108_spill] sm:$0xff] }
 0x538   :  { %9461 = vmatprep.mubr.f32.mxu1 %v15686_v15  ;;  %10135 = vmatpush3.bf16.msra.mxu1 %v15684_v33  ;;  %v15708_v33 = vand.u32 4294901760, %v15642_v21  ;;  %v15715_v21 = vand.u32 4294901760, %v15649_v54  ;;  %v15722_v54 = vand.u32 4294901760, %v15656_v29  ;;  %v15729_v29 = vand.u32 4294901760, %v15663_v19 }
 0x539   :  { %10137 = vmatprep.subr.bf16.mxu1 %v15687_v60  ;;  %v15735_v15 = vand.u32 4294901760, %v15734_v27  ;;  %v15738_v19 = vand.u32 4294901760, %v15670_v24  ;;  %v15748_v24 = vand.u32 4294901760, %v15676_v32  ;;  %v15759_v32 = vld [vmem:[#allocation60_spill] sm:$0xff] }
 0x53a   :  { %v15798_v27 = vld [vmem:[#allocation120_spill] sm:$0xff] }
 0x53b   :  { %9462 = vmatmul.mubr.f32.gmra.mrb[6].mxu1 %v15688_v30 }
 0x53c   :  { %9464 = vmatprep.mubr.f32.mxu1 %v15689_v7  ;;  %10139 = vmatpush3.bf16.msra.mxu1 %v15687_v60  ;;  %v15741_v60 = vld [vmem:[#allocation203_spill] sm:$0xff]  ;;  %v15743_v7 = vld [vmem:[#allocation202_spill] sm:$0xff] }
 0x53d   :  { %10141 = vmatprep.subr.bf16.mxu1 %v15690_v35  ;;  %v15742_v30 = vand.u32 4294901760, %v15741_v60  ;;  %v15805_v60 = vld [vmem:[#allocation158_spill] sm:$0xff] }
 0x53f   :  { %9465 = vmatmul.mubr.f32.gmra.mrb[8].mxu1 %v15691_v52  ;;  %v15747_v52 = vand.u32 4294901760, %v15746_v40  ;;  %v15810_v40 = vld [vmem:[#allocation176_spill] sm:$0xff] }
 0x540   :  { %9467 = vmatprep.mubr.f32.mxu1 %v15692_v42  ;;  %10143 = vmatpush3.bf16.msra.mxu1 %v15690_v35  ;;  %v15744_v35 = vand.u32 4294901760, %v15743_v7  ;;  %v15750_v42 = vand.u32 4294901760, %v15749_v36  ;;  %v15807_v7 = vld [vmem:[#allocation42_spill] sm:$0xff]  ;;  %v15813_v36 = vld [vmem:[#allocation180_spill] sm:$0xff] }
 0x541   :  { %10145 = vmatprep.subr.bf16.mxu1 %v15693_v9 }
 0x543   :  { %9468 = vmatmul.mubr.f32.gmra.mrb[10].mxu1 %v15694_v51  ;;  %v15753_v51 = vand.u32 4294901760, %v13421_v22  ;;  %v15762_v22 = vld [vmem:[#allocation75_spill] sm:$0xff] }
 0x544   :  { %9470 = vmatprep.mubr.f32.mxu1 %v15695_v63  ;;  %10147 = vmatpush3.bf16.msra.mxu1 %v15693_v9  ;;  %v15752_v9 = vand.u32 4294901760, %v15751_v61  ;;  %v15754_v63 = vld [vmem:[#allocation222_spill] sm:$0xff] }
 0x545   :  { %10149 = vmatprep.subr.bf16.mxu1 %v15696_v17  ;;  %v15815_v61 = vld [vmem:[#allocation186_spill] sm:$0xff] }
 0x547   :  { %9471 = vmatmul.mubr.f32.gmra.mrb[12].mxu1 %v15697_v10  ;;  %v15757_v10 = vld [vmem:[#allocation51_spill] sm:$0xff] }
 0x548   :  { %9473 = vmatprep.mubr.f32.mxu1 %v15698_v56  ;;  %10151 = vmatpush3.bf16.msra.mxu1 %v15696_v17  ;;  %v15755_v17 = vand.u32 4294901760, %v15754_v63  ;;  %v15758_v56 = vld [vmem:[#allocation45_spill] sm:$0xff]  ;;  %v15818_v63 = vld [vmem:[#allocation200_spill] sm:$0xff] }
 0x549   :  { %10153 = vmatprep.subr.bf16.mxu1 %v15699_v28 }
 0x54b   :  { %9474 = vmatmul.mubr.f32.gmra.mrb[14].mxu1 %v15700_v53  ;;  %v15761_v53 = vld [vmem:[#allocation19_spill] sm:$0xff] }
 0x54c   :  { %9476 = vmatprep.mubr.f32.mxu1 %v15701_v26  ;;  %10155 = vmatpush3.bf16.msra.mxu1 %v15699_v28  ;;  %v15760_v28 = vld [vmem:[#allocation12_spill] sm:$0xff]  ;;  %v15763_v26 = vld [vmem:[#allocation14_spill] sm:$0xff] }
 0x54d   :  { %10157 = vmatprep.subr.bf16.mxu1 %v15592_v14 }
 0x54f   :  { %9477 = vmatmul.mubr.f32.gmra.mrb[16].mxu1 %v15702_v50  ;;  %v15765_v50 = vld [vmem:[#allocation90_spill] sm:$0xff] }
 0x550   :  { %9479 = vmatprep.mubr.f32.mxu1 %v15703_v37  ;;  %v15766_v37 = vld [vmem:[#allocation16_spill] sm:$0xff] }
 0x553   :  { %9480 = vmatmul.mubr.f32.gmra.mrb[18].mxu1 %v15704_v31  ;;  %v15767_v31 = vld [vmem:[#allocation87_spill] sm:$0xff] }
 0x554   :  { %9482 = vmatprep.mubr.f32.mxu1 %v15705_v2  ;;  %v15769_v2 = vld [vmem:[#allocation17_spill] sm:$0xff] }
 0x557   :  { %9483 = vmatmul.mubr.f32.gmra.mrb[20].mxu1 %v15706_v18  ;;  %v15770_v18 = vld [vmem:[#allocation101_spill] sm:$0xff] }
 0x558   :  { %9485 = vmatprep.mubr.f32.mxu1 %v15707_v47  ;;  %v15771_v47 = vld [vmem:[#allocation138_spill] sm:$0xff] }
 0x55b   :  { %9486 = vmatmul.mubr.f32.gmra.mrb[22].mxu1 %v15708_v33  ;;  %v15772_v33 = vld [vmem:[#allocation22_spill] sm:$0xff] }
 0x55c   :  { %9488 = vmatprep.mubr.f32.mxu1 %v15709_v44  ;;  %v15773_v44 = vld [vmem:[#allocation114_spill] sm:$0xff] }
 0x55f   :  { %9489 = vmatmul.mubr.f32.gmra.mrb[24].mxu1 %v15710_v43  ;;  %v15774_v43 = vld [vmem:[#allocation56_spill] sm:$0xff] }
 0x560   :  { %9491 = vmatprep.mubr.f32.mxu1 %v15711_v38  ;;  %v15775_v38 = vld [vmem:[#allocation27_spill] sm:$0xff] }
 0x563   :  { %9492 = vmatmul.mubr.f32.gmra.mrb[26].mxu1 %v15712_v13  ;;  %v15776_v13 = vld [vmem:[#allocation147_spill] sm:$0xff] }
 0x564   :  { %9494 = vmatprep.mubr.f32.mxu1 %v15713_v23  ;;  %v15777_v23 = vld [vmem:[#allocation98_spill] sm:$0xff] }
 0x567   :  { %9495 = vmatmul.mubr.f32.gmra.mrb[28].mxu1 %v15714_v49  ;;  %v15778_v49 = vld [vmem:[#allocation31_spill] sm:$0xff] }
 0x568   :  { %9497 = vmatprep.mubr.f32.mxu1 %v15715_v21  ;;  %v15779_v21 = vld [vmem:[#allocation82_spill] sm:$0xff] }
 0x56b   :  { %9498 = vmatmul.mubr.f32.gmra.mrb[30].mxu1 %v15716_v57  ;;  %v15780_v57 = vld [vmem:[#allocation126_spill] sm:$0xff] }
 0x56c   :  { %9500 = vmatprep.mubr.f32.mxu1 %v15717_v62  ;;  %v15781_v62 = vld [vmem:[#allocation121_spill] sm:$0xff] }
 0x56f   :  { %9501 = vmatmul.mubr.f32.gmra.mrb[32].mxu1 %v15718_v58  ;;  %v15782_v58 = vld [vmem:[#allocation154_spill] sm:$0xff] }
 0x570   :  { %9503 = vmatprep.mubr.f32.mxu1 %v15719_v45  ;;  %v15783_v45 = vld [vmem:[#allocation152_spill] sm:$0xff] }
 0x573   :  { %9504 = vmatmul.mubr.f32.gmra.mrb[34].mxu1 %v15720_v0  ;;  %v15784_v0 = vld [vmem:[#allocation20_spill] sm:$0xff] }
 0x574   :  { %9506 = vmatprep.mubr.f32.mxu1 %v15721_v46  ;;  %v15785_v46 = vld [vmem:[#allocation166_spill] sm:$0xff] }
 0x577   :  { %9507 = vmatmul.mubr.f32.gmra.mrb[36].mxu1 %v15722_v54  ;;  %v15786_v54 = vld [vmem:[#allocation34_spill] sm:$0xff] }
 0x578   :  { %9509 = vmatprep.mubr.f32.mxu1 %v15723_v1  ;;  %v15787_v1 = vld [vmem:[#allocation28_spill] sm:$0xff] }
 0x57b   :  { %9510 = vmatmul.mubr.f32.gmra.mrb[38].mxu1 %v15724_v39  ;;  %v15788_v39 = vld [vmem:[#allocation49_spill] sm:$0xff] }
 0x57c   :  { %9512 = vmatprep.mubr.f32.mxu1 %v15725_v6  ;;  %v15789_v6 = vld [vmem:[#allocation44_spill] sm:$0xff] }
 0x57f   :  { %9513 = vmatmul.mubr.f32.gmra.mrb[40].mxu1 %v15726_v12  ;;  %v15790_v12 = vld [vmem:[#allocation63_spill] sm:$0xff] }
 0x580   :  { %9515 = vmatprep.mubr.f32.mxu1 %v15727_v55  ;;  %v15791_v55 = vld [vmem:[#allocation59_spill] sm:$0xff] }
 0x583   :  { %9516 = vmatmul.mubr.f32.gmra.mrb[42].mxu1 %v15728_v4  ;;  %v15792_v4 = vld [vmem:[#allocation78_spill] sm:$0xff] }
 0x584   :  { %9518 = vmatprep.mubr.f32.mxu1 %v15729_v29  ;;  %v15793_v29 = vld [vmem:[#allocation73_spill] sm:$0xff] }
 0x587   :  { %9519 = vmatmul.mubr.f32.gmra.mrb[44].mxu1 %v15730_v25  ;;  %v15794_v25 = vld [vmem:[#allocation93_spill] sm:$0xff] }
 0x588   :  { %9521 = vmatprep.mubr.f32.mxu1 %v15731_v11  ;;  %v15795_v11 = vld [vmem:[#allocation88_spill] sm:$0xff] }
 0x58b   :  { %9522 = vmatmul.mubr.f32.gmra.mrb[46].mxu1 %v15733_v16  ;;  %v15797_v16 = vld [vmem:[#allocation104_spill] sm:$0xff] }
 0x58c   :  { %9524 = vmatprep.mubr.f32.mxu1 %v15735_v15  ;;  %v15799_v15 = vld [vmem:[#allocation117_spill] sm:$0xff] }
 0x58f   :  { %9525 = vmatmul.mubr.f32.gmra.mrb[48].mxu1 %v15736_v20  ;;  %v15800_v20 = vld [vmem:[#allocation137_spill] sm:$0xff] }
 0x590   :  { %9527 = vmatprep.mubr.f32.mxu1 %v15737_v8  ;;  %v15801_v8 = vld [vmem:[#allocation134_spill] sm:$0xff] }
 0x593   :  { %9528 = vmatmul.mubr.f32.gmra.mrb[50].mxu1 %v15738_v19  ;;  %v15802_v19 = vld [vmem:[#allocation150_spill] sm:$0xff] }
 0x594   :  { %9530 = vmatprep.mubr.f32.mxu1 %v15739_v3  ;;  %v15803_v3 = vld [vmem:[#allocation146_spill] sm:$0xff] }
 0x597   :  { %9531 = vmatmul.mubr.f32.gmra.mrb[52].mxu1 %v15740_v59  ;;  %v15804_v59 = vld [vmem:[#allocation162_spill] sm:$0xff] }
 0x598   :  { %9533 = vmatprep.mubr.f32.mxu1 %v15742_v30  ;;  %v15806_v30 = vld [vmem:[#allocation66_spill] sm:$0xff] }
 0x59b   :  { %9534 = vmatmul.mubr.f32.gmra.mrb[54].mxu1 %v15744_v35  ;;  %v15808_v35 = vld [vmem:[#allocation170_spill] sm:$0xff] }
 0x59c   :  { %9536 = vmatprep.mubr.f32.mxu1 %v15745_v5  ;;  %v15809_v5 = vld [vmem:[#allocation124_spill] sm:$0xff] }
 0x59f   :  { %9537 = vmatmul.mubr.f32.gmra.mrb[56].mxu1 %v15747_v52  ;;  %v15811_v52 = vld [vmem:[#allocation174_spill] sm:$0xff] }
 0x5a0   :  { %9539 = vmatprep.mubr.f32.mxu1 %v15748_v24  ;;  %v15812_v24 = vld [vmem:[#allocation182_spill] sm:$0xff] }
 0x5a3   :  { %9540 = vmatmul.mubr.f32.gmra.mrb[58].mxu1 %v15750_v42  ;;  %v15814_v42 = vld [vmem:[#allocation188_spill] sm:$0xff] }
 0x5a4   :  { %9542 = vmatprep.mubr.f32.mxu1 %v15752_v9  ;;  %v15816_v9 = vld [vmem:[#allocation194_spill] sm:$0xff] }
 0x5a7   :  { %9543 = vmatmul.mubr.f32.gmra.mrb[60].mxu1 %v15753_v51  ;;  %v15817_v51 = vld [vmem:[#allocation192_spill] sm:$0xff] }
 0x5a8   :  { %9545 = vmatprep.mubr.f32.mxu1 %v15755_v17  ;;  %v15819_v17 = vld [vmem:[#allocation198_spill] sm:$0xff] }
 0x5ab   :  { %9546 = vmatmul.mubr.f32.gmra.mrb[62].mxu1 %v15756_v34  ;;  %v15820_v34 = vld [vmem:[#allocation206_spill] sm:$0xff] }
 0x5ac   :  { %9580 = vmatprep.mubr.f32.mxu1 %v15757_v10 }
 0x5af   :  { %9581 = vmatmul.mubr.f32.vlgmr.msra.gmra.mrb[0].mxu1 %v15758_v56 }
 0x5b0   :  { %9583 = vmatprep.mubr.f32.mxu1 %v15759_v32  ;;  %10159 = vmatpush3.bf16.msra.mxu1 %v15592_v14  ;;  %v15768_v14 = vld [vmem:[#allocation106_spill] sm:$0xff] }
 0x5b1   :  { %10161 = vmatprep.subr.bf16.mxu1 %v15760_v28 }
 0x5b3   :  { %9584 = vmatmul.mubr.f32.gmra.mrb[2].mxu1 %v15761_v53 }
 0x5b4   :  { %9586 = vmatprep.mubr.f32.mxu1 %v15762_v22  ;;  %10163 = vmatpush3.bf16.msra.mxu1 %v15760_v28  ;;  %v15821_v28 = vld [vmem:[#allocation204_spill] sm:$0xff] }
 0x5b5   :  { %10165 = vmatprep.subr.bf16.mxu1 %v15763_v26 }
 0x5b7   :  { %9587 = vmatmul.mubr.f32.gmra.mrb[4].mxu1 %v15764_v41 }
 0x5b8   :  { %9589 = vmatprep.mubr.f32.mxu1 %v15765_v50  ;;  %10167 = vmatpush3.bf16.msra.mxu1 %v15763_v26  ;;  %v15822_v26 = vld [vmem:[#allocation211_spill] sm:$0xff] }
 0x5b9   :  { %10169 = vmatprep.subr.bf16.mxu1 %v15766_v37 }
 0x5bb   :  { %9590 = vmatmul.mubr.f32.gmra.mrb[6].mxu1 %v15767_v31 }
 0x5bc   :  { %9592 = vmatprep.mubr.f32.mxu1 %v15768_v14  ;;  %10171 = vmatpush3.bf16.msra.mxu1 %v15766_v37  ;;  %v15823_v37 = vld [vmem:[#allocation209_spill] sm:$0xff] }
 0x5bd   :  { %10173 = vmatprep.subr.bf16.mxu1 %v15769_v2 }
 0x5bf   :  { %9593 = vmatmul.mubr.f32.gmra.mrb[8].mxu1 %v15770_v18 }
 0x5c0   :  { %9595 = vmatprep.mubr.f32.mxu1 %v15771_v47  ;;  %10175 = vmatpush3.bf16.msra.mxu1 %v15769_v2  ;;  %v15824_v2 = vld [vmem:[#allocation217_spill] sm:$0xff] }
 0x5c1   :  { %10177 = vmatprep.subr.bf16.mxu1 %v15772_v33 }
 0x5c3   :  { %9596 = vmatmul.mubr.f32.gmra.mrb[10].mxu1 %v15773_v44 }
 0x5c4   :  { %9598 = vmatprep.mubr.f32.mxu1 %v15774_v43  ;;  %10179 = vmatpush3.bf16.msra.mxu1 %v15772_v33  ;;  %v15825_v33 = vld [vmem:[#allocation215_spill] sm:$0xff] }
 0x5c5   :  { %10181 = vmatprep.subr.bf16.mxu1 %v15775_v38 }
 0x5c7   :  { %9599 = vmatmul.mubr.f32.gmra.mrb[12].mxu1 %v15776_v13 }
 0x5c8   :  { %9601 = vmatprep.mubr.f32.mxu1 %v15777_v23  ;;  %10183 = vmatpush3.bf16.msra.mxu1 %v15775_v38  ;;  %v15826_v38 = vld [vmem:[#allocation221_spill] sm:$0xff] }
 0x5c9   :  { %10185 = vmatprep.subr.bf16.mxu1 %v15778_v49 }
 0x5cb   :  { %9602 = vmatmul.mubr.f32.gmra.mrb[14].mxu1 %v15779_v21 }
 0x5cc   :  { %9604 = vmatprep.mubr.f32.mxu1 %v15780_v57  ;;  %10187 = vmatpush3.bf16.msra.mxu1 %v15778_v49  ;;  %v15827_v49 = vld [vmem:[#allocation220_spill] sm:$0xff] }
 0x5cf   :  { %9605 = vmatmul.mubr.f32.gmra.mrb[16].mxu1 %v15781_v62 }
 0x5d0   :  { %9607 = vmatprep.mubr.f32.mxu1 %v15782_v58 }
 0x5d3   :  { %9608 = vmatmul.mubr.f32.gmra.mrb[18].mxu1 %v15783_v45 }
 0x5d4   :  { %9610 = vmatprep.mubr.f32.mxu1 %v15784_v0 }
 0x5d7   :  { %9611 = vmatmul.mubr.f32.gmra.mrb[20].mxu1 %v15785_v46 }
 0x5d8   :  { %9613 = vmatprep.mubr.f32.mxu1 %v15786_v54 }
 0x5db   :  { %9614 = vmatmul.mubr.f32.gmra.mrb[22].mxu1 %v15787_v1 }
 0x5dc   :  { %9616 = vmatprep.mubr.f32.mxu1 %v15788_v39 }
 0x5df   :  { %9617 = vmatmul.mubr.f32.gmra.mrb[24].mxu1 %v15789_v6 }
 0x5e0   :  { %9619 = vmatprep.mubr.f32.mxu1 %v15790_v12 }
 0x5e3   :  { %9620 = vmatmul.mubr.f32.gmra.mrb[26].mxu1 %v15791_v55 }
 0x5e4   :  { %9622 = vmatprep.mubr.f32.mxu1 %v15792_v4 }
 0x5e7   :  { %9623 = vmatmul.mubr.f32.gmra.mrb[28].mxu1 %v15793_v29 }
 0x5e8   :  { %9625 = vmatprep.mubr.f32.mxu1 %v15794_v25 }
 0x5eb   :  { %9626 = vmatmul.mubr.f32.gmra.mrb[30].mxu1 %v15795_v11 }
 0x5ec   :  { %9628 = vmatprep.mubr.f32.mxu1 %v15796_v48 }
 0x5ef   :  { %9629 = vmatmul.mubr.f32.gmra.mrb[32].mxu1 %v15797_v16 }
 0x5f0   :  { %9631 = vmatprep.mubr.f32.mxu1 %v15798_v27 }
 0x5f3   :  { %9632 = vmatmul.mubr.f32.gmra.mrb[34].mxu1 %v15799_v15 }
 0x5f4   :  { %9634 = vmatprep.mubr.f32.mxu1 %v15800_v20 }
 0x5f7   :  { %9635 = vmatmul.mubr.f32.gmra.mrb[36].mxu1 %v15801_v8 }
 0x5f8   :  { %9637 = vmatprep.mubr.f32.mxu1 %v15802_v19 }
 0x5fb   :  { %9638 = vmatmul.mubr.f32.gmra.mrb[38].mxu1 %v15803_v3 }
 0x5fc   :  { %9640 = vmatprep.mubr.f32.mxu1 %v15804_v59 }
 0x5ff   :  { %9641 = vmatmul.mubr.f32.gmra.mrb[40].mxu1 %v15805_v60 }
 0x600   :  { %9643 = vmatprep.mubr.f32.mxu1 %v15806_v30 }
 0x603   :  { %9644 = vmatmul.mubr.f32.gmra.mrb[42].mxu1 %v15807_v7 }
 0x604   :  { %9646 = vmatprep.mubr.f32.mxu1 %v15808_v35 }
 0x607   :  { %9647 = vmatmul.mubr.f32.gmra.mrb[44].mxu1 %v15809_v5 }
 0x608   :  { %9649 = vmatprep.mubr.f32.mxu1 %v15810_v40 }
 0x60b   :  { %9650 = vmatmul.mubr.f32.gmra.mrb[46].mxu1 %v15811_v52 }
 0x60c   :  { %9652 = vmatprep.mubr.f32.mxu1 %v15812_v24 }
 0x60f   :  { %9653 = vmatmul.mubr.f32.gmra.mrb[48].mxu1 %v15813_v36 }
 0x610   :  { %9655 = vmatprep.mubr.f32.mxu1 %v15814_v42 }
 0x613   :  { %9656 = vmatmul.mubr.f32.gmra.mrb[50].mxu1 %v15815_v61 }
 0x614   :  { %9658 = vmatprep.mubr.f32.mxu1 %v15816_v9 }
 0x617   :  { %9659 = vmatmul.mubr.f32.gmra.mrb[52].mxu1 %v15817_v51 }
 0x618   :  { %9661 = vmatprep.mubr.f32.mxu1 %v15818_v63 }
 0x61b   :  { %9662 = vmatmul.mubr.f32.gmra.mrb[54].mxu1 %v15819_v17 }
 0x61c   :  { %9664 = vmatprep.mubr.f32.mxu1 %v15820_v34 }
 0x61f   :  { %9665 = vmatmul.mubr.f32.gmra.mrb[56].mxu1 %v15821_v28 }
 0x620   :  { %9667 = vmatprep.mubr.f32.mxu1 %v15822_v26 }
 0x623   :  { %9668 = vmatmul.mubr.f32.gmra.mrb[58].mxu1 %v15823_v37 }
 0x624   :  { %9670 = vmatprep.mubr.f32.mxu1 %v15824_v2 }
 0x627   :  { %9671 = vmatmul.mubr.f32.gmra.mrb[60].mxu1 %v15825_v33 }
 0x628   :  { %9673 = vmatprep.mubr.f32.mxu1 %v15826_v38 }
 0x62b   :  { %9674 = vmatmul.mubr.f32.gmra.mrb[62].mxu1 %v15827_v49 }
 0x62c   :  { %9708 = vmatprep.mubr.f32.mxu1 %v15757_v10 }
 0x62f   :  { %9709 = vmatmul.mubr.f32.vlgmr.msra.gmra.mrb[0].mxu1 %v15758_v56 }
 0x630   :  { %9711 = vmatprep.mubr.f32.mxu1 %v15759_v32 }
 0x633   :  { %9712 = vmatmul.mubr.f32.gmra.mrb[2].mxu1 %v15761_v53 }
 0x634   :  { %9714 = vmatprep.mubr.f32.mxu1 %v15762_v22 }
 0x637   :  { %9715 = vmatmul.mubr.f32.gmra.mrb[4].mxu1 %v15764_v41 }
 0x638   :  { %9717 = vmatprep.mubr.f32.mxu1 %v15765_v50 }
 0x63b   :  { %9718 = vmatmul.mubr.f32.gmra.mrb[6].mxu1 %v15767_v31 }
 0x63c   :  { %9720 = vmatprep.mubr.f32.mxu1 %v15768_v14 }
 0x63f   :  { %9721 = vmatmul.mubr.f32.gmra.mrb[8].mxu1 %v15770_v18 }
 0x640   :  { %9723 = vmatprep.mubr.f32.mxu1 %v15771_v47 }
 0x643   :  { %9724 = vmatmul.mubr.f32.gmra.mrb[10].mxu1 %v15773_v44 }
 0x644   :  { %9726 = vmatprep.mubr.f32.mxu1 %v15774_v43  ;;  %v13912_v43 = vld [vmem:[%s14128_s2] ss:$0 sm:$0xff]  ;;  %s11165_s2 = smov [#allocation7]  }
 0x647   :  { %9727 = vmatmul.mubr.f32.gmra.mrb[12].mxu1 %v15776_v13 }
 0x648   :  { %9729 = vmatprep.mubr.f32.mxu1 %v15777_v23 }
 0x64b   :  { %9730 = vmatmul.mubr.f32.gmra.mrb[14].mxu1 %v15779_v21 }
 0x64c   :  { %9732 = vmatprep.mubr.f32.mxu1 %v15780_v57 }
 0x64f   :  { %9733 = vmatmul.mubr.f32.gmra.mrb[16].mxu1 %v15781_v62 }
 0x650   :  { %9735 = vmatprep.mubr.f32.mxu1 %v15782_v58 }
 0x653   :  { %9736 = vmatmul.mubr.f32.gmra.mrb[18].mxu1 %v15783_v45 }
 0x654   :  { %9738 = vmatprep.mubr.f32.mxu1 %v15784_v0  ;;  %v13918_v0 = vld [vmem:[%s14129_s3] ss:$0 sm:$0xff]  ;;  %s7293_s3 = sshll.u32 %s11165_s2, 4  ;;  %s7294_s3 = int_to_ptr.vmem [resolvable:$true] %s7293_s3 }
 0x655   :  { %s11133_s17 = scalar_lea.vmem %s7294_s3, 8192  ;;  %p11138_p3 = scmp.lt.s32.totalorder %s7294_s3, %s7294_s3 }
 0x656   :  { %p11134_p2 = scmp.ne.s32.totalorder %s7294_s3, %s11133_s17  ;;  %p11139_p4 = scmp.lt.s32.totalorder %s11133_s17, %s11133_s17 }
 0x657   :  { %9739 = vmatmul.mubr.f32.gmra.mrb[20].mxu1 %v15785_v46 }
 0x658   :  { %9741 = vmatprep.mubr.f32.mxu1 %v15786_v54  ;;  %v15828_v54 = vld [vmem:[#allocation40_spill] sm:$0xff]  ;;  %p11140_p5 = por %p11139_p4, %p11138_p3 }
 0x65a   :  { %p11141_p6 = pnand %p11140_p5, %p11134_p2 }
 0x65b   :  { %9742 = vmatmul.mubr.f32.gmra.mrb[22].mxu1 %v15787_v1 }
 0x65c   :  { %9744 = vmatprep.mubr.f32.mxu1 %v15788_v39 }
 0x65f   :  { %9745 = vmatmul.mubr.f32.gmra.mrb[24].mxu1 %v15789_v6 }
 0x660   :  { %9747 = vmatprep.mubr.f32.mxu1 %v15790_v12  ;;  %v15829_v12 = vld [vmem:[#allocation43_spill] sm:$0xff] }
 0x663   :  { %9748 = vmatmul.mubr.f32.gmra.mrb[26].mxu1 %v15791_v55 }
 0x664   :  { %9750 = vmatprep.mubr.f32.mxu1 %v15792_v4 }
 0x667   :  { %9751 = vmatmul.mubr.f32.gmra.mrb[28].mxu1 %v15793_v29 }
 0x668   :  { %9753 = vmatprep.mubr.f32.mxu1 %v15794_v25 }
 0x66b   :  { %9754 = vmatmul.mubr.f32.gmra.mrb[30].mxu1 %v15795_v11 }
 0x66c   :  { %9756 = vmatprep.mubr.f32.mxu1 %v15796_v48 }
 0x66f   :  { %9757 = vmatmul.mubr.f32.gmra.mrb[32].mxu1 %v15797_v16 }
 0x670   :  { %9759 = vmatprep.mubr.f32.mxu1 %v15798_v27 }
 0x673   :  { %9760 = vmatmul.mubr.f32.gmra.mrb[34].mxu1 %v15799_v15 }
 0x674   :  { %9762 = vmatprep.mubr.f32.mxu1 %v15800_v20  ;;  %v15830_v20 = vld [vmem:[#allocation48_spill] sm:$0xff] }
 0x677   :  { %9763 = vmatmul.mubr.f32.gmra.mrb[36].mxu1 %v15801_v8 }
 0x678   :  { %9765 = vmatprep.mubr.f32.mxu1 %v15802_v19 }
 0x67b   :  { %9766 = vmatmul.mubr.f32.gmra.mrb[38].mxu1 %v15803_v3 }
 0x67c   :  { %9768 = vmatprep.mubr.f32.mxu1 %v15804_v59  ;;  %v15831_v59 = vld [vmem:[#allocation53_spill] sm:$0xff] }
 0x67f   :  { %9769 = vmatmul.mubr.f32.gmra.mrb[40].mxu1 %v15805_v60 }
 0x680   :  { %9771 = vmatprep.mubr.f32.mxu1 %v15806_v30 }
 0x683   :  { %9772 = vmatmul.mubr.f32.gmra.mrb[42].mxu1 %v15807_v7 }
 0x684   :  { %9774 = vmatprep.mubr.f32.mxu1 %v15808_v35 }
 0x687   :  { %9775 = vmatmul.mubr.f32.gmra.mrb[44].mxu1 %v15809_v5 }
 0x688   :  { %9777 = vmatprep.mubr.f32.mxu1 %v15810_v40 }
 0x68b   :  { %9778 = vmatmul.mubr.f32.gmra.mrb[46].mxu1 %v15811_v52 }
 0x68c   :  { %9780 = vmatprep.mubr.f32.mxu1 %v15812_v24 }
 0x68f   :  { %9781 = vmatmul.mubr.f32.gmra.mrb[48].mxu1 %v15813_v36 }
 0x690   :  { %9783 = vmatprep.mubr.f32.mxu1 %v15814_v42  ;;  %v15832_v42 = vld [vmem:[#allocation58_spill] sm:$0xff] }
 0x693   :  { %9784 = vmatmul.mubr.f32.gmra.mrb[50].mxu1 %v15815_v61 }
 0x694   :  { %9786 = vmatprep.mubr.f32.mxu1 %v15816_v9 }
 0x697   :  { %9787 = vmatmul.mubr.f32.gmra.mrb[52].mxu1 %v15817_v51 }
 0x698   :  { %9789 = vmatprep.mubr.f32.mxu1 %v15818_v63  ;;  %v15833_v63 = vld [vmem:[#allocation62_spill] sm:$0xff] }
 0x69b   :  { %9790 = vmatmul.mubr.f32.gmra.mrb[54].mxu1 %v15819_v17 }
 0x69c   :  { %9792 = vmatprep.mubr.f32.mxu1 %v15820_v34 }
 0x69f   :  { %9793 = vmatmul.mubr.f32.gmra.mrb[56].mxu1 %v15821_v28 }
 0x6a0   :  { %9795 = vmatprep.mubr.f32.mxu1 %v15822_v26 }
 0x6a3   :  { %9796 = vmatmul.mubr.f32.gmra.mrb[58].mxu1 %v15823_v37 }
 0x6a4   :  { %9798 = vmatprep.mubr.f32.mxu1 %v15824_v2 }
 0x6a7   :  { %9799 = vmatmul.mubr.f32.gmra.mrb[60].mxu1 %v15825_v33 }
 0x6a8   :  { %9801 = vmatprep.mubr.f32.mxu1 %v15826_v38 }
 0x6ab   :  { %9802 = vmatmul.mubr.f32.gmra.mrb[62].mxu1 %v15827_v49 }
 0x702   :  { %v9710_v10 = vpop.f32.mrb[0].mxu1 }
 0x703   :  { %v10188_v56 = vadd.f32 1e-06, %v9710_v10  ;;  %v6572_v32 = vpop.f32.mrb[1].mxu1  ;;  %v15834_v10 = vld [vmem:[#allocation74_spill] sm:$0xff] }
 0x704   :  { %v10189_v53 = vadd.f32 1e-06, %v6572_v32 }
 0x705   :  { %10897 = vrsqrt.f32 %v10188_v56 }
 0x706   :  { %10899 = vrsqrt.f32 %v10189_v53  ;;  %v9713_v22 = vpop.f32.mrb[2].mxu1 }
 0x707   :  { %v10190_v41 = vadd.f32 1e-06, %v9713_v22  ;;  %v6584_v50 = vpop.f32.mrb[3].mxu1  ;;  %v15835_v22 = vld [vmem:[#allocation77_spill] sm:$0xff] }
 0x708   :  { %v10191_v31 = vadd.f32 1e-06, %v6584_v50 }
 0x709   :  { %10901 = vrsqrt.f32 %v10190_v41 }
 0x70a   :  { %10903 = vrsqrt.f32 %v10191_v31  ;;  %v9716_v14 = vpop.f32.mrb[4].mxu1 }
 0x70b   :  { %v10192_v18 = vadd.f32 1e-06, %v9716_v14  ;;  %v6596_v47 = vpop.f32.mrb[5].mxu1 }
 0x70c   :  { %v10193_v44 = vadd.f32 1e-06, %v6596_v47 }
 0x70d   :  { %10905 = vrsqrt.f32 %v10192_v18 }
 0x70e   :  { %10907 = vrsqrt.f32 %v10193_v44  ;;  %v9719_v13 = vpop.f32.mrb[6].mxu1 }
 0x70f   :  { %v10898_v23 = vpop.eup %10897  ;;  %v10194_v21 = vadd.f32 1e-06, %v9719_v13  ;;  %v6608_v57 = vpop.f32.mrb[7].mxu1 }
 0x710   :  { %v10900_v62 = vpop.eup %10899  ;;  %v7026_v58 = vmul.f32 %v10898_v23, %v13912_v43  ;;  %v10195_v45 = vadd.f32 1e-06, %v6608_v57 }
 0x711   :  { %v7025_v46 = vmul.f32 %v10900_v62, %v13912_v43  ;;  %10909 = vrsqrt.f32 %v10194_v21  ;;  %v15836_v21 = vld [vmem:[#allocation89_spill] sm:$0xff] }
 0x712   :  { %v7090_v1 = vmul.f32 %v7026_v58, %v15828_v54  ;;  %10911 = vrsqrt.f32 %v10195_v45  ;;  %v9722_v39 = vpop.f32.mrb[8].mxu1  ;;  %v15837_v45 = vld [vmem:[#allocation92_spill] sm:$0xff] }
 0x713   :  { %v10902_v6 = vpop.eup %10901  ;;  %v7089_v55 = vmul.f32 %v7025_v46, %v15829_v12  ;;  %v10196_v4 = vadd.f32 1e-06, %v9722_v39  ;;  %v6620_v29 = vpop.f32.mrb[9].mxu1 }
 0x714   :  { %v10904_v25 = vpop.eup %10903  ;;  %v7161_v11 = vadd.f32 %v13918_v0, %v7090_v1  ;;  %v7028_v48 = vmul.f32 %v10902_v6, %v13912_v43  ;;  %v10197_v16 = vadd.f32 1e-06, %v6620_v29 }
 0x715   :  { %v7160_v27 = vadd.f32 %v13918_v0, %v7089_v55  ;;  %v7027_v15 = vmul.f32 %v10904_v25, %v13912_v43  ;;  %10913 = vrsqrt.f32 %v10196_v4  ;;  %v15838_v25 = vld [vmem:[#allocation103_spill] sm:$0xff] }
 0x716   :  { %7225 = vst [vmem:[#allocation7 + $0x8] sm:$0xff] %v7161_v11  ;;  %v7092_v8 = vmul.f32 %v7028_v48, %v15830_v20  ;;  %10915 = vrsqrt.f32 %v10197_v16  ;;  %v9725_v19 = vpop.f32.mrb[10].mxu1 }
 0x717   :  { %v10906_v3 = vpop.eup %10905  ;;  %7224 = vst [vmem:[#allocation7] sm:$0xff] %v7160_v27  ;;  %v7091_v60 = vmul.f32 %v7027_v15, %v15831_v59  ;;  %v10198_v30 = vadd.f32 1e-06, %v9725_v19  ;;  %v6632_v7 = vpop.f32.mrb[11].mxu1  ;;  %v15839_v27 = vld [vmem:[#allocation107_spill] sm:$0xff] }
 0x718   :  { %v10908_v35 = vpop.eup %10907  ;;  %v7163_v5 = vadd.f32 %v13918_v0, %v7092_v8  ;;  %v7030_v40 = vmul.f32 %v10906_v3, %v13912_v43  ;;  %v10199_v52 = vadd.f32 1e-06, %v6632_v7 }
 0x719   :  { %v7162_v24 = vadd.f32 %v13918_v0, %v7091_v60  ;;  %v7029_v36 = vmul.f32 %v10908_v35, %v13912_v43  ;;  %10917 = vrsqrt.f32 %v10198_v30  ;;  %v15840_v35 = vld [vmem:[#allocation136_spill] sm:$0xff] }
 0x71a   :  { %7227 = vst [vmem:[#allocation7 + $0x18] sm:$0xff] %v7163_v5  ;;  %v7094_v61 = vmul.f32 %v7030_v40, %v15832_v42  ;;  %10919 = vrsqrt.f32 %v10199_v52  ;;  %v9728_v9 = vpop.f32.mrb[12].mxu1 }
 0x71b   :  { %v10910_v51 = vpop.eup %10909  ;;  %7226 = vst [vmem:[#allocation7 + $0x10] sm:$0xff] %v7162_v24  ;;  %v7093_v17 = vmul.f32 %v7029_v36, %v15833_v63  ;;  %v10200_v34 = vadd.f32 1e-06, %v9728_v9  ;;  %v6644_v28 = vpop.f32.mrb[13].mxu1  ;;  %v15841_v24 = vld [vmem:[#allocation141_spill] sm:$0xff] }
 0x71c   :  { %v10912_v26 = vpop.eup %10911  ;;  %v7165_v37 = vadd.f32 %v13918_v0, %v7094_v61  ;;  %v7032_v2 = vmul.f32 %v10910_v51, %v13912_v43  ;;  %v10201_v33 = vadd.f32 1e-06, %v6644_v28 }
 0x71d   :  { %v7164_v38 = vadd.f32 %v13918_v0, %v7093_v17  ;;  %v7031_v49 = vmul.f32 %v10912_v26, %v13912_v43  ;;  %10921 = vrsqrt.f32 %v10200_v34  ;;  %v15842_v26 = vld [vmem:[#allocation149_spill] sm:$0xff] }
 0x71e   :  { %7229 = vst [vmem:[#allocation7 + $0x28] sm:$0xff] %v7165_v37  ;;  %v7096_v56 = vmul.f32 %v7032_v2, %v15834_v10  ;;  %10923 = vrsqrt.f32 %v10201_v33  ;;  %v9731_v32 = vpop.f32.mrb[14].mxu1 }
 0x71f   :  { %v10914_v53 = vpop.eup %10913  ;;  %7228 = vst [vmem:[#allocation7 + $0x20] sm:$0xff] %v7164_v38  ;;  %v7095_v41 = vmul.f32 %v7031_v49, %v15835_v22  ;;  %v10202_v50 = vadd.f32 1e-06, %v9731_v32  ;;  %v6656_v31 = vpop.f32.mrb[15].mxu1  ;;  %v15843_v38 = vld [vmem:[#allocation57_spill] sm:$0xff] }
 0x720   :  { %v10916_v14 = vpop.eup %10915  ;;  %v7167_v18 = vadd.f32 %v13918_v0, %v7096_v56  ;;  %v7034_v47 = vmul.f32 %v10914_v53, %v13912_v43  ;;  %v10203_v44 = vadd.f32 1e-06, %v6656_v31 }
 0x721   :  { %v7166_v13 = vadd.f32 %v13918_v0, %v7095_v41  ;;  %v7033_v23 = vmul.f32 %v10916_v14, %v13912_v43  ;;  %10925 = vrsqrt.f32 %v10202_v50  ;;  %v15844_v14 = vld [vmem:[#allocation84_spill] sm:$0xff] }
 0x722   :  { %7231 = vst [vmem:[#allocation7 + $0x38] sm:$0xff] %v7167_v18  ;;  %v7098_v57 = vmul.f32 %v7034_v47, %v15836_v21  ;;  %10927 = vrsqrt.f32 %v10203_v44  ;;  %v9734_v62 = vpop.f32.mrb[16].mxu1 }
 0x723   :  { %v10918_v58 = vpop.eup %10917  ;;  %7230 = vst [vmem:[#allocation7 + $0x30] sm:$0xff] %v7166_v13  ;;  %v7097_v46 = vmul.f32 %v7033_v23, %v15837_v45  ;;  %v10204_v54 = vadd.f32 1e-06, %v9734_v62  ;;  %v6668_v1 = vpop.f32.mrb[17].mxu1  ;;  %v15845_v13 = vld [vmem:[#allocation100_spill] sm:$0xff] }
 0x724   :  { %v10920_v39 = vpop.eup %10919  ;;  %v7169_v6 = vadd.f32 %v13918_v0, %v7098_v57  ;;  %v7036_v12 = vmul.f32 %v10918_v58, %v13912_v43  ;;  %v10205_v55 = vadd.f32 1e-06, %v6668_v1 }
 0x725   :  { %v7168_v4 = vadd.f32 %v13918_v0, %v7097_v46  ;;  %v7035_v29 = vmul.f32 %v10920_v39, %v13912_v43  ;;  %10929 = vrsqrt.f32 %v10204_v54  ;;  %v15846_v39 = vld [vmem:[#allocation122_spill] sm:$0xff] }
 0x726   :  { %7233 = vst [vmem:[#allocation7 + $0x48] sm:$0xff] %v7169_v6  ;;  %v7100_v11 = vmul.f32 %v7036_v12, %v15838_v25  ;;  %10931 = vrsqrt.f32 %v10205_v55  ;;  %v9737_v48 = vpop.f32.mrb[18].mxu1 }
 0x727   :  { %v10922_v16 = vpop.eup %10921  ;;  %7232 = vst [vmem:[#allocation7 + $0x40] sm:$0xff] %v7168_v4  ;;  %v7099_v15 = vmul.f32 %v7035_v29, %v15839_v27  ;;  %v10206_v20 = vadd.f32 1e-06, %v9737_v48  ;;  %v6680_v8 = vpop.f32.mrb[19].mxu1  ;;  %v15847_v4 = vld [vmem:[#allocation131_spill] sm:$0xff] }
 0x728   :  { %v10924_v19 = vpop.eup %10923  ;;  %v7171_v3 = vadd.f32 %v13918_v0, %v7100_v11  ;;  %v7038_v59 = vmul.f32 %v10922_v16, %v13912_v43  ;;  %v10207_v60 = vadd.f32 1e-06, %v6680_v8 }
 0x729   :  { %v7170_v30 = vadd.f32 %v13918_v0, %v7099_v15  ;;  %v7037_v7 = vmul.f32 %v10924_v19, %v13912_v43  ;;  %10933 = vrsqrt.f32 %v10206_v20  ;;  %v15848_v19 = vld [vmem:[#allocation153_spill] sm:$0xff] }
 0x72a   :  { %7235 = vst [vmem:[#allocation7 + $0x58] sm:$0xff] %v7171_v3  ;;  %v7102_v5 = vmul.f32 %v7038_v59, %v15840_v35  ;;  %10935 = vrsqrt.f32 %v10207_v60  ;;  %v9740_v40 = vpop.f32.mrb[20].mxu1 }
 0x72b   :  { %v10926_v52 = vpop.eup %10925  ;;  %7234 = vst [vmem:[#allocation7 + $0x50] sm:$0xff] %v7170_v30  ;;  %v7101_v36 = vmul.f32 %v7037_v7, %v15841_v24  ;;  %v10208_v42 = vadd.f32 1e-06, %v9740_v40  ;;  %v6692_v61 = vpop.f32.mrb[21].mxu1  ;;  %v15849_v30 = vld [vmem:[#allocation157_spill] sm:$0xff] }
 0x72c   :  { %v10928_v9 = vpop.eup %10927  ;;  %v7173_v51 = vadd.f32 %v13918_v0, %v7102_v5  ;;  %v7040_v63 = vmul.f32 %v10926_v52, %v13912_v43  ;;  %v10209_v17 = vadd.f32 1e-06, %v6692_v61 }
 0x72d   :  { %v7172_v34 = vadd.f32 %v13918_v0, %v7101_v36  ;;  %v7039_v28 = vmul.f32 %v10928_v9, %v13912_v43  ;;  %10937 = vrsqrt.f32 %v10208_v42  ;;  %v15850_v9 = vld [vmem:[#allocation13_spill] sm:$0xff] }
 0x72e   :  { %7237 = vst [vmem:[#allocation7 + $0x68] sm:$0xff] %v7173_v51  ;;  %v7104_v37 = vmul.f32 %v7040_v63, %v15842_v26  ;;  %10939 = vrsqrt.f32 %v10209_v17  ;;  %v9743_v2 = vpop.f32.mrb[22].mxu1 }
 0x72f   :  { %v10930_v33 = vpop.eup %10929  ;;  %7236 = vst [vmem:[#allocation7 + $0x60] sm:$0xff] %v7172_v34  ;;  %v7103_v49 = vmul.f32 %v7039_v28, %v15843_v38  ;;  %v10210_v10 = vadd.f32 1e-06, %v9743_v2  ;;  %v6704_v56 = vpop.f32.mrb[23].mxu1  ;;  %v15851_v34 = vld [vmem:[#allocation21_spill] sm:$0xff] }
 0x730   :  { %v10932_v32 = vpop.eup %10931  ;;  %v7175_v53 = vadd.f32 %v13918_v0, %v7104_v37  ;;  %v7042_v22 = vmul.f32 %v10930_v33, %v13912_v43  ;;  %v10211_v41 = vadd.f32 1e-06, %v6704_v56 }
 0x731   :  { %v7174_v50 = vadd.f32 %v13918_v0, %v7103_v49  ;;  %v7041_v31 = vmul.f32 %v10932_v32, %v13912_v43  ;;  %10941 = vrsqrt.f32 %v10210_v10  ;;  %v15852_v32 = vld [vmem:[#allocation33_spill] sm:$0xff] }
 0x732   :  { %7239 = vst [vmem:[#allocation7 + $0x78] sm:$0xff] %v7175_v53  ;;  %v7106_v18 = vmul.f32 %v7042_v22, %v15844_v14  ;;  %10943 = vrsqrt.f32 %v10211_v41  ;;  %v9746_v47 = vpop.f32.mrb[24].mxu1 }
 0x733   :  { %v10934_v44 = vpop.eup %10933  ;;  %7238 = vst [vmem:[#allocation7 + $0x70] sm:$0xff] %v7174_v50  ;;  %v7105_v23 = vmul.f32 %v7041_v31, %v15845_v13  ;;  %v10212_v21 = vadd.f32 1e-06, %v9746_v47  ;;  %v6716_v57 = vpop.f32.mrb[25].mxu1  ;;  %v15853_v50 = vld [vmem:[#allocation36_spill] sm:$0xff] }
 0x734   :  { %v10936_v62 = vpop.eup %10935  ;;  %v7177_v58 = vadd.f32 %v13918_v0, %v7106_v18  ;;  %v7044_v45 = vmul.f32 %v10934_v44, %v13912_v43  ;;  %v10213_v46 = vadd.f32 1e-06, %v6716_v57 }
 0x735   :  { %v7176_v54 = vadd.f32 %v13918_v0, %v7105_v23  ;;  %v7043_v1 = vmul.f32 %v10936_v62, %v13912_v43  ;;  %10945 = vrsqrt.f32 %v10212_v21  ;;  %v15854_v62 = vld [vmem:[#allocation46_spill] sm:$0xff] }
 0x736   :  { %7241 = vst [vmem:[#allocation7 + $0x88] sm:$0xff] %v7177_v58  ;;  %v7108_v6 = vmul.f32 %v7044_v45, %v15846_v39  ;;  %10947 = vrsqrt.f32 %v10213_v46  ;;  %v9749_v12 = vpop.f32.mrb[26].mxu1 }
 0x737   :  { %v10938_v55 = vpop.eup %10937  ;;  %7240 = vst [vmem:[#allocation7 + $0x80] sm:$0xff] %v7176_v54  ;;  %v7107_v29 = vmul.f32 %v7043_v1, %v15847_v4  ;;  %v10214_v25 = vadd.f32 1e-06, %v9749_v12  ;;  %v6728_v11 = vpop.f32.mrb[27].mxu1  ;;  %v15855_v54 = vld [vmem:[#allocation50_spill] sm:$0xff] }
 0x738   :  { %v10940_v48 = vpop.eup %10939  ;;  %v7179_v16 = vadd.f32 %v13918_v0, %v7108_v6  ;;  %v7046_v27 = vmul.f32 %v10938_v55, %v13912_v43  ;;  %v10215_v15 = vadd.f32 1e-06, %v6728_v11 }
 0x739   :  { %v7178_v20 = vadd.f32 %v13918_v0, %v7107_v29  ;;  %v7045_v8 = vmul.f32 %v10940_v48, %v13912_v43  ;;  %10949 = vrsqrt.f32 %v10214_v25  ;;  %v15856_v48 = vld [vmem:[#allocation61_spill] sm:$0xff] }
 0x73a   :  { %7243 = vst [vmem:[#allocation7 + $0x98] sm:$0xff] %v7179_v16  ;;  %v7110_v3 = vmul.f32 %v7046_v27, %v15848_v19  ;;  %10951 = vrsqrt.f32 %v10215_v15  ;;  %v9752_v59 = vpop.f32.mrb[28].mxu1 }
 0x73b   :  { %v10942_v60 = vpop.eup %10941  ;;  %7242 = vst [vmem:[#allocation7 + $0x90] sm:$0xff] %v7178_v20  ;;  %v7109_v7 = vmul.f32 %v7045_v8, %v15849_v30  ;;  %v10216_v35 = vadd.f32 1e-06, %v9752_v59  ;;  %v6740_v5 = vpop.f32.mrb[29].mxu1  ;;  %v15857_v20 = vld [vmem:[#allocation65_spill] sm:$0xff] }
 0x73c   :  { %v10944_v40 = vpop.eup %10943  ;;  %v7181_v52 = vadd.f32 %v13918_v0, %v7110_v3  ;;  %v7048_v24 = vmul.f32 %v10942_v60, %v13912_v43  ;;  %v10217_v36 = vadd.f32 1e-06, %v6740_v5 }
 0x73d   :  { %v7180_v42 = vadd.f32 %v13918_v0, %v7109_v7  ;;  %v7047_v61 = vmul.f32 %v10944_v40, %v13912_v43  ;;  %10953 = vrsqrt.f32 %v10216_v35  ;;  %v15858_v40 = vld [vmem:[#allocation76_spill] sm:$0xff] }
 0x73e   :  { %7245 = vst [vmem:[#allocation7 + $0xa8] sm:$0xff] %v7181_v52  ;;  %v7112_v51 = vmul.f32 %v7048_v24, %v15850_v9  ;;  %10955 = vrsqrt.f32 %v10217_v36  ;;  %v9755_v63 = vpop.f32.mrb[30].mxu1 }
 0x73f   :  { %v10946_v17 = vpop.eup %10945  ;;  %7244 = vst [vmem:[#allocation7 + $0xa0] sm:$0xff] %v7180_v42  ;;  %v7111_v28 = vmul.f32 %v7047_v61, %v15851_v34  ;;  %v10218_v26 = vadd.f32 1e-06, %v9755_v63  ;;  %v6752_v37 = vpop.f32.mrb[31].mxu1  ;;  %v15859_v42 = vld [vmem:[#allocation81_spill] sm:$0xff] }
 0x740   :  { %v10948_v2 = vpop.eup %10947  ;;  %v7183_v33 = vadd.f32 %v13918_v0, %v7112_v51  ;;  %v7050_v38 = vmul.f32 %v10946_v17, %v13912_v43  ;;  %v10219_v49 = vadd.f32 1e-06, %v6752_v37 }
 0x741   :  { %v7182_v10 = vadd.f32 %v13918_v0, %v7111_v28  ;;  %v7049_v56 = vmul.f32 %v10948_v2, %v13912_v43  ;;  %10957 = vrsqrt.f32 %v10218_v26  ;;  %v15860_v2 = vld [vmem:[#allocation91_spill] sm:$0xff] }
 0x742   :  { %7247 = vst [vmem:[#allocation7 + $0xb8] sm:$0xff] %v7183_v33  ;;  %v7114_v53 = vmul.f32 %v7050_v38, %v15852_v32  ;;  %10959 = vrsqrt.f32 %v10219_v49  ;;  %v9758_v22 = vpop.f32.mrb[32].mxu1 }
 0x743   :  { %v10950_v41 = vpop.eup %10949  ;;  %7246 = vst [vmem:[#allocation7 + $0xb0] sm:$0xff] %v7182_v10  ;;  %v7113_v31 = vmul.f32 %v7049_v56, %v15853_v50  ;;  %v10220_v14 = vadd.f32 1e-06, %v9758_v22  ;;  %v6764_v18 = vpop.f32.mrb[33].mxu1  ;;  %v15861_v10 = vld [vmem:[#allocation96_spill] sm:$0xff] }
 0x744   :  { %v10952_v47 = vpop.eup %10951  ;;  %v7185_v44 = vadd.f32 %v13918_v0, %v7114_v53  ;;  %v7052_v13 = vmul.f32 %v10950_v41, %v13912_v43  ;;  %v10221_v23 = vadd.f32 1e-06, %v6764_v18 }
 0x745   :  { %v7184_v21 = vadd.f32 %v13918_v0, %v7113_v31  ;;  %v7051_v57 = vmul.f32 %v10952_v47, %v13912_v43  ;;  %10961 = vrsqrt.f32 %v10220_v14  ;;  %v15862_v47 = vld [vmem:[#allocation105_spill] sm:$0xff] }
 0x746   :  { %7249 = vst [vmem:[#allocation7 + $0xc8] sm:$0xff] %v7185_v44  ;;  %v7116_v58 = vmul.f32 %v7052_v13, %v15854_v62  ;;  %10963 = vrsqrt.f32 %v10221_v23  ;;  %v9761_v45 = vpop.f32.mrb[34].mxu1 }
 0x747   :  { %v10954_v46 = vpop.eup %10953  ;;  %7248 = vst [vmem:[#allocation7 + $0xc0] sm:$0xff] %v7184_v21  ;;  %v7115_v1 = vmul.f32 %v7051_v57, %v15855_v54  ;;  %v10222_v39 = vadd.f32 1e-06, %v9761_v45  ;;  %v6776_v6 = vpop.f32.mrb[35].mxu1  ;;  %v15863_v21 = vld [vmem:[#allocation111_spill] sm:$0xff] }
 0x748   :  { %v10956_v12 = vpop.eup %10955  ;;  %v7187_v55 = vadd.f32 %v13918_v0, %v7116_v58  ;;  %v7054_v4 = vmul.f32 %v10954_v46, %v13912_v43  ;;  %v10223_v29 = vadd.f32 1e-06, %v6776_v6 }
 0x749   :  { %v7186_v25 = vadd.f32 %v13918_v0, %v7115_v1  ;;  %v7053_v11 = vmul.f32 %v10956_v12, %v13912_v43  ;;  %10965 = vrsqrt.f32 %v10222_v39  ;;  %v15864_v12 = vld [vmem:[#allocation119_spill] sm:$0xff] }
 0x74a   :  { %7251 = vst [vmem:[#allocation7 + $0xd8] sm:$0xff] %v7187_v55  ;;  %v7118_v16 = vmul.f32 %v7054_v4, %v15856_v48  ;;  %10967 = vrsqrt.f32 %v10223_v29  ;;  %v9764_v27 = vpop.f32.mrb[36].mxu1 }
 0x74b   :  { %v10958_v15 = vpop.eup %10957  ;;  %7250 = vst [vmem:[#allocation7 + $0xd0] sm:$0xff] %v7186_v25  ;;  %v7117_v8 = vmul.f32 %v7053_v11, %v15857_v20  ;;  %v10224_v19 = vadd.f32 1e-06, %v9764_v27  ;;  %v6788_v3 = vpop.f32.mrb[37].mxu1  ;;  %v15865_v25 = vld [vmem:[#allocation123_spill] sm:$0xff] }
 0x74c   :  { %v10960_v59 = vpop.eup %10959  ;;  %v7189_v60 = vadd.f32 %v13918_v0, %v7118_v16  ;;  %v7056_v30 = vmul.f32 %v10958_v15, %v13912_v43  ;;  %v10225_v7 = vadd.f32 1e-06, %v6788_v3 }
 0x74d   :  { %v7188_v35 = vadd.f32 %v13918_v0, %v7117_v8  ;;  %v7055_v5 = vmul.f32 %v10960_v59, %v13912_v43  ;;  %10969 = vrsqrt.f32 %v10224_v19  ;;  %v15866_v59 = vld [vmem:[#allocation135_spill] sm:$0xff] }
 0x74e   :  { %7253 = vst [vmem:[#allocation7 + $0xe8] sm:$0xff] %v7189_v60  ;;  %v7120_v52 = vmul.f32 %v7056_v30, %v15858_v40  ;;  %10971 = vrsqrt.f32 %v10225_v7  ;;  %v9767_v24 = vpop.f32.mrb[38].mxu1 }
 0x74f   :  { %v10962_v36 = vpop.eup %10961  ;;  %7252 = vst [vmem:[#allocation7 + $0xe0] sm:$0xff] %v7188_v35  ;;  %v7119_v61 = vmul.f32 %v7055_v5, %v15859_v42  ;;  %v10226_v9 = vadd.f32 1e-06, %v9767_v24  ;;  %v6800_v51 = vpop.f32.mrb[39].mxu1  ;;  %v15867_v35 = vld [vmem:[#allocation139_spill] sm:$0xff] }
 0x750   :  { %v10964_v63 = vpop.eup %10963  ;;  %v7191_v17 = vadd.f32 %v13918_v0, %v7120_v52  ;;  %v7058_v34 = vmul.f32 %v10962_v36, %v13912_v43  ;;  %v10227_v28 = vadd.f32 1e-06, %v6800_v51 }
 0x751   :  { %v7190_v26 = vadd.f32 %v13918_v0, %v7119_v61  ;;  %v7057_v37 = vmul.f32 %v10964_v63, %v13912_v43  ;;  %10973 = vrsqrt.f32 %v10226_v9  ;;  %v15868_v63 = vld [vmem:[#allocation148_spill] sm:$0xff] }
 0x752   :  { %7255 = vst [vmem:[#allocation7 + $0xf8] sm:$0xff] %v7191_v17  ;;  %v7122_v33 = vmul.f32 %v7058_v34, %v15860_v2  ;;  %10975 = vrsqrt.f32 %v10227_v28  ;;  %v9770_v38 = vpop.f32.mrb[40].mxu1 }
 0x753   :  { %v10966_v49 = vpop.eup %10965  ;;  %7254 = vst [vmem:[#allocation7 + $0xf0] sm:$0xff] %v7190_v26  ;;  %v7121_v56 = vmul.f32 %v7057_v37, %v15861_v10  ;;  %v10228_v32 = vadd.f32 1e-06, %v9770_v38  ;;  %v6812_v53 = vpop.f32.mrb[41].mxu1  ;;  %v15869_v26 = vld [vmem:[#allocation151_spill] sm:$0xff] }
 0x754   :  { %v10968_v22 = vpop.eup %10967  ;;  %v7193_v41 = vadd.f32 %v13918_v0, %v7122_v33  ;;  %v7060_v50 = vmul.f32 %v10966_v49, %v13912_v43  ;;  %v10229_v31 = vadd.f32 1e-06, %v6812_v53 }
 0x755   :  { %v7192_v14 = vadd.f32 %v13918_v0, %v7121_v56  ;;  %v7059_v18 = vmul.f32 %v10968_v22, %v13912_v43  ;;  %10977 = vrsqrt.f32 %v10228_v32  ;;  %v15870_v22 = vld [vmem:[#allocation161_spill] sm:$0xff] }
 0x756   :  { %7257 = vst [vmem:[#allocation7 + $0x108] sm:$0xff] %v7193_v41  ;;  %v7124_v44 = vmul.f32 %v7060_v50, %v15862_v47  ;;  %10979 = vrsqrt.f32 %v10229_v31  ;;  %v9773_v13 = vpop.f32.mrb[42].mxu1 }
 0x757   :  { %v10970_v23 = vpop.eup %10969  ;;  %7256 = vst [vmem:[#allocation7 + $0x100] sm:$0xff] %v7192_v14  ;;  %v7123_v57 = vmul.f32 %v7059_v18, %v15863_v21  ;;  %v10230_v62 = vadd.f32 1e-06, %v9773_v13  ;;  %v6824_v58 = vpop.f32.mrb[43].mxu1  ;;  %v15871_v14 = vld [vmem:[#allocation163_spill] sm:$0xff] }
 0x758   :  { %v10972_v45 = vpop.eup %10971  ;;  %v7195_v46 = vadd.f32 %v13918_v0, %v7124_v44  ;;  %v7062_v54 = vmul.f32 %v10970_v23, %v13912_v43  ;;  %v10231_v1 = vadd.f32 1e-06, %v6824_v58 }
 0x759   :  { %v7194_v39 = vadd.f32 %v13918_v0, %v7123_v57  ;;  %v7061_v6 = vmul.f32 %v10972_v45, %v13912_v43  ;;  %10981 = vrsqrt.f32 %v10230_v62  ;;  %v15872_v45 = vld [vmem:[#allocation47_spill] sm:$0xff] }
 0x75a   :  { %7259 = vst [vmem:[#allocation7 + $0x118] sm:$0xff] %v7195_v46  ;;  %v7126_v55 = vmul.f32 %v7062_v54, %v15864_v12  ;;  %10983 = vrsqrt.f32 %v10231_v1  ;;  %v9776_v4 = vpop.f32.mrb[44].mxu1 }
 0x75b   :  { %v10974_v29 = vpop.eup %10973  ;;  %7258 = vst [vmem:[#allocation7 + $0x110] sm:$0xff] %v7194_v39  ;;  %v7125_v11 = vmul.f32 %v7061_v6, %v15865_v25  ;;  %v10232_v48 = vadd.f32 1e-06, %v9776_v4  ;;  %v6836_v16 = vpop.f32.mrb[45].mxu1  ;;  %v15873_v39 = vld [vmem:[#allocation79_spill] sm:$0xff] }
 0x75c   :  { %v10976_v27 = vpop.eup %10975  ;;  %v7197_v15 = vadd.f32 %v13918_v0, %v7126_v55  ;;  %v7064_v20 = vmul.f32 %v10974_v29, %v13912_v43  ;;  %v10233_v8 = vadd.f32 1e-06, %v6836_v16 }
 0x75d   :  { %v7196_v19 = vadd.f32 %v13918_v0, %v7125_v11  ;;  %v7063_v3 = vmul.f32 %v10976_v27, %v13912_v43  ;;  %10985 = vrsqrt.f32 %v10232_v48  ;;  %v15874_v27 = vld [vmem:[#allocation125_spill] sm:$0xff] }
 0x75e   :  { %7261 = vst [vmem:[#allocation7 + $0x128] sm:$0xff] %v7197_v15  ;;  %v7128_v60 = vmul.f32 %v7064_v20, %v15866_v59  ;;  %10987 = vrsqrt.f32 %v10233_v8  ;;  %v9779_v30 = vpop.f32.mrb[46].mxu1 }
 0x75f   :  { %v10978_v7 = vpop.eup %10977  ;;  %7260 = vst [vmem:[#allocation7 + $0x120] sm:$0xff] %v7196_v19  ;;  %v7127_v5 = vmul.f32 %v7063_v3, %v15867_v35  ;;  %v10234_v40 = vadd.f32 1e-06, %v9779_v30  ;;  %v6848_v52 = vpop.f32.mrb[47].mxu1  ;;  %v15875_v19 = vld [vmem:[#allocation171_spill] sm:$0xff] }
 0x760   :  { %v10980_v24 = vpop.eup %10979  ;;  %v7199_v36 = vadd.f32 %v13918_v0, %v7128_v60  ;;  %v7066_v42 = vmul.f32 %v10978_v7, %v13912_v43  ;;  %v10235_v61 = vadd.f32 1e-06, %v6848_v52 }
 0x761   :  { %v7198_v9 = vadd.f32 %v13918_v0, %v7127_v5  ;;  %v7065_v51 = vmul.f32 %v10980_v24, %v13912_v43  ;;  %10989 = vrsqrt.f32 %v10234_v40  ;;  %v15876_v24 = vld [vmem:[#allocation175_spill] sm:$0xff] }
 0x762   :  { %7263 = vst [vmem:[#allocation7 + $0x138] sm:$0xff] %v7199_v36  ;;  %v7130_v17 = vmul.f32 %v7066_v42, %v15868_v63  ;;  %10991 = vrsqrt.f32 %v10235_v61  ;;  %v9782_v34 = vpop.f32.mrb[48].mxu1 }
 0x763   :  { %v10982_v28 = vpop.eup %10981  ;;  %7262 = vst [vmem:[#allocation7 + $0x130] sm:$0xff] %v7198_v9  ;;  %v7129_v37 = vmul.f32 %v7065_v51, %v15869_v26  ;;  %v10236_v2 = vadd.f32 1e-06, %v9782_v34  ;;  %v6860_v33 = vpop.f32.mrb[49].mxu1  ;;  %v15877_v9 = vld [vmem:[#allocation177_spill] sm:$0xff] }
 0x764   :  { %v10984_v38 = vpop.eup %10983  ;;  %v7201_v49 = vadd.f32 %v13918_v0, %v7130_v17  ;;  %v7068_v10 = vmul.f32 %v10982_v28, %v13912_v43  ;;  %v10237_v56 = vadd.f32 1e-06, %v6860_v33 }
 0x765   :  { %v7200_v32 = vadd.f32 %v13918_v0, %v7129_v37  ;;  %v7067_v53 = vmul.f32 %v10984_v38, %v13912_v43  ;;  %10993 = vrsqrt.f32 %v10236_v2  ;;  %v15878_v38 = vld [vmem:[#allocation181_spill] sm:$0xff] }
 0x766   :  { %7265 = vst [vmem:[#allocation7 + $0x148] sm:$0xff] %v7201_v49  ;;  %v7132_v41 = vmul.f32 %v7068_v10, %v15870_v22  ;;  %10995 = vrsqrt.f32 %v10237_v56  ;;  %v9785_v50 = vpop.f32.mrb[50].mxu1 }
 0x767   :  { %v10986_v31 = vpop.eup %10985  ;;  %7264 = vst [vmem:[#allocation7 + $0x140] sm:$0xff] %v7200_v32  ;;  %v7131_v18 = vmul.f32 %v7067_v53, %v15871_v14  ;;  %v10238_v47 = vadd.f32 1e-06, %v9785_v50  ;;  %v6872_v44 = vpop.f32.mrb[51].mxu1  ;;  %v15879_v32 = vld [vmem:[#allocation183_spill] sm:$0xff] }
 0x768   :  { %v10988_v13 = vpop.eup %10987  ;;  %v7203_v23 = vadd.f32 %v13918_v0, %v7132_v41  ;;  %v7070_v21 = vmul.f32 %v10986_v31, %v13912_v43  ;;  %v10239_v57 = vadd.f32 1e-06, %v6872_v44 }
 0x769   :  { %v7202_v62 = vadd.f32 %v13918_v0, %v7131_v18  ;;  %v7069_v58 = vmul.f32 %v10988_v13, %v13912_v43  ;;  %10997 = vrsqrt.f32 %v10238_v47  ;;  %v15880_v13 = vld [vmem:[#allocation187_spill] sm:$0xff] }
 0x76a   :  { %7267 = vst [vmem:[#allocation7 + $0x158] sm:$0xff] %v7203_v23  ;;  %v7134_v46 = vmul.f32 %v7070_v21, %v15872_v45  ;;  %10999 = vrsqrt.f32 %v10239_v57  ;;  %v9788_v54 = vpop.f32.mrb[52].mxu1 }
 0x76b   :  { %v10990_v1 = vpop.eup %10989  ;;  %7266 = vst [vmem:[#allocation7 + $0x150] sm:$0xff] %v7202_v62  ;;  %v7133_v6 = vmul.f32 %v7069_v58, %v15873_v39  ;;  %v10240_v12 = vadd.f32 1e-06, %v9788_v54  ;;  %v6884_v55 = vpop.f32.mrb[53].mxu1  ;;  %v15881_v62 = vld [vmem:[#allocation189_spill] sm:$0xff] }
 0x76c   :  { %v10992_v4 = vpop.eup %10991  ;;  %v7205_v29 = vadd.f32 %v13918_v0, %v7134_v46  ;;  %v7072_v25 = vmul.f32 %v10990_v1, %v13912_v43  ;;  %v10241_v11 = vadd.f32 1e-06, %v6884_v55 }
 0x76d   :  { %v7204_v48 = vadd.f32 %v13918_v0, %v7133_v6  ;;  %v7071_v16 = vmul.f32 %v10992_v4, %v13912_v43  ;;  %11001 = vrsqrt.f32 %v10240_v12  ;;  %v15882_v4 = vld [vmem:[#allocation193_spill] sm:$0xff] }
 0x76e   :  { %7269 = vst [vmem:[#allocation7 + $0x168] sm:$0xff] %v7205_v29  ;;  %v7136_v15 = vmul.f32 %v7072_v25, %v15874_v27  ;;  %11003 = vrsqrt.f32 %v10241_v11  ;;  %v9791_v20 = vpop.f32.mrb[54].mxu1 }
 0x76f   :  { %v10994_v8 = vpop.eup %10993  ;;  %7268 = vst [vmem:[#allocation7 + $0x160] sm:$0xff] %v7204_v48  ;;  %v7135_v3 = vmul.f32 %v7071_v16, %v15875_v19  ;;  %v10242_v59 = vadd.f32 1e-06, %v9791_v20  ;;  %v6896_v60 = vpop.f32.mrb[55].mxu1  ;;  %v15883_v48 = vld [vmem:[#allocation195_spill] sm:$0xff] }
 0x770   :  { %v10996_v30 = vpop.eup %10995  ;;  %v7207_v7 = vadd.f32 %v13918_v0, %v7136_v15  ;;  %v7074_v35 = vmul.f32 %v10994_v8, %v13912_v43  ;;  %v10243_v5 = vadd.f32 1e-06, %v6896_v60 }
 0x771   :  { %v7206_v40 = vadd.f32 %v13918_v0, %v7135_v3  ;;  %v7073_v52 = vmul.f32 %v10996_v30, %v13912_v43  ;;  %11005 = vrsqrt.f32 %v10242_v59  ;;  %v15884_v30 = vld [vmem:[#allocation199_spill] sm:$0xff] }
 0x772   :  { %7271 = vst [vmem:[#allocation7 + $0x178] sm:$0xff] %v7207_v7  ;;  %v7138_v36 = vmul.f32 %v7074_v35, %v15876_v24  ;;  %11007 = vrsqrt.f32 %v10243_v5  ;;  %v9794_v42 = vpop.f32.mrb[56].mxu1  ;;  %v15885_v5 = vld [vmem:[#allocation201_spill] sm:$0xff] }
 0x773   :  { %v10998_v61 = vpop.eup %10997  ;;  %7270 = vst [vmem:[#allocation7 + $0x170] sm:$0xff] %v7206_v40  ;;  %v7137_v51 = vmul.f32 %v7073_v52, %v15877_v9  ;;  %v10244_v63 = vadd.f32 1e-06, %v9794_v42  ;;  %v6908_v17 = vpop.f32.mrb[57].mxu1  ;;  %v15886_v9 = vld [vmem:[#allocation205_spill] sm:$0xff] }
 0x774   :  { %v11000_v34 = vpop.eup %10999  ;;  %v7209_v28 = vadd.f32 %v13918_v0, %v7138_v36  ;;  %v7076_v26 = vmul.f32 %v10998_v61, %v13912_v43  ;;  %v10245_v37 = vadd.f32 1e-06, %v6908_v17  ;;  %v15887_v17 = vld [vmem:[#allocation207_spill] sm:$0xff] }
 0x775   :  { %v7208_v2 = vadd.f32 %v13918_v0, %v7137_v51  ;;  %v7075_v33 = vmul.f32 %v11000_v34, %v13912_v43  ;;  %11009 = vrsqrt.f32 %v10244_v63 }
 0x776   :  { %7273 = vst [vmem:[#allocation7 + $0x188] sm:$0xff] %v7209_v28  ;;  %v7140_v49 = vmul.f32 %v7076_v26, %v15878_v38  ;;  %11011 = vrsqrt.f32 %v10245_v37  ;;  %v9797_v10 = vpop.f32.mrb[58].mxu1  ;;  %v15888_v38 = vld [vmem:[#allocation210_spill] sm:$0xff] }
 0x777   :  { %v11002_v56 = vpop.eup %11001  ;;  %7272 = vst [vmem:[#allocation7 + $0x180] sm:$0xff] %v7208_v2  ;;  %v7139_v53 = vmul.f32 %v7075_v33, %v15879_v32  ;;  %v10246_v22 = vadd.f32 1e-06, %v9797_v10  ;;  %v6920_v41 = vpop.f32.mrb[59].mxu1 }
 0x778   :  { %v11004_v50 = vpop.eup %11003  ;;  %v7211_v31 = vadd.f32 %v13918_v0, %v7140_v49  ;;  %v7078_v14 = vmul.f32 %v11002_v56, %v13912_v43  ;;  %v10247_v18 = vadd.f32 1e-06, %v6920_v41  ;;  %v15889_v56 = vld [vmem:[#allocation212_spill] sm:$0xff] }
 0x779   :  { %v7210_v47 = vadd.f32 %v13918_v0, %v7139_v53  ;;  %v7077_v44 = vmul.f32 %v11004_v50, %v13912_v43  ;;  %11013 = vrsqrt.f32 %v10246_v22 }
 0x77a   :  { %7275 = vst [vmem:[#allocation7 + $0x198] sm:$0xff] %v7211_v31  ;;  %v7142_v23 = vmul.f32 %v7078_v14, %v15880_v13  ;;  %11015 = vrsqrt.f32 %v10247_v18  ;;  %v9800_v21 = vpop.f32.mrb[60].mxu1  ;;  %v15890_v14 = vld [vmem:[#allocation216_spill] sm:$0xff] }
 0x77b   :  { %v11006_v57 = vpop.eup %11005  ;;  %7274 = vst [vmem:[#allocation7 + $0x190] sm:$0xff] %v7210_v47  ;;  %v7141_v58 = vmul.f32 %v7077_v44, %v15881_v62  ;;  %v10248_v45 = vadd.f32 1e-06, %v9800_v21  ;;  %v6932_v46 = vpop.f32.mrb[61].mxu1  ;;  %v15891_v47 = vld [vmem:[#allocation218_spill] sm:$0xff] }
 0x77c   :  { %v11008_v54 = vpop.eup %11007  ;;  %v7213_v1 = vadd.f32 %v13918_v0, %v7142_v23  ;;  %v7080_v39 = vmul.f32 %v11006_v57, %v13912_v43  ;;  %v10249_v6 = vadd.f32 1e-06, %v6932_v46 }
 0x77d   :  { %v7212_v12 = vadd.f32 %v13918_v0, %v7141_v58  ;;  %v7079_v55 = vmul.f32 %v11008_v54, %v13912_v43  ;;  %11017 = vrsqrt.f32 %v10248_v45 }
 0x77e   :  { %7277 = vst [vmem:[#allocation7 + $0x1a8] sm:$0xff] %v7213_v1  ;;  %v7144_v29 = vmul.f32 %v7080_v39, %v15882_v4  ;;  %11019 = vrsqrt.f32 %v10249_v6  ;;  %v9803_v25 = vpop.f32.mrb[62].mxu1 }
 0x77f   :  { %v11010_v11 = vpop.eup %11009  ;;  %7276 = vst [vmem:[#allocation7 + $0x1a0] sm:$0xff] %v7212_v12  ;;  %v7143_v16 = vmul.f32 %v7079_v55, %v15883_v48  ;;  %v10250_v27 = vadd.f32 1e-06, %v9803_v25  ;;  %v6944_v15 = vpop.f32.mrb[63].mxu1 }
 0x780   :  { %v11012_v20 = vpop.eup %11011  ;;  %v7215_v8 = vadd.f32 %v13918_v0, %v7144_v29  ;;  %v7082_v19 = vmul.f32 %v11010_v11, %v13912_v43  ;;  %v10251_v3 = vadd.f32 1e-06, %v6944_v15 }
 0x781   :  { %v7214_v59 = vadd.f32 %v13918_v0, %v7143_v16  ;;  %v7081_v60 = vmul.f32 %v11012_v20, %v13912_v43  ;;  %11021 = vrsqrt.f32 %v10250_v27 }
 0x782   :  { %7279 = vst [vmem:[#allocation7 + $0x1b8] sm:$0xff] %v7215_v8  ;;  %v7146_v7 = vmul.f32 %v7082_v19, %v15884_v30  ;;  %11023 = vrsqrt.f32 %v10251_v3 }
 0x783   :  { %v11014_v35 = vpop.eup %11013  ;;  %7278 = vst [vmem:[#allocation7 + $0x1b0] sm:$0xff] %v7214_v59  ;;  %v7145_v40 = vmul.f32 %v7081_v60, %v15885_v5 }
 0x784   :  { %v11016_v52 = vpop.eup %11015  ;;  %v7217_v24 = vadd.f32 %v13918_v0, %v7146_v7  ;;  %v7084_v36 = vmul.f32 %v11014_v35, %v13912_v43 }
 0x785   :  { %v7216_v42 = vadd.f32 %v13918_v0, %v7145_v40  ;;  %v7083_v61 = vmul.f32 %v11016_v52, %v13912_v43 }
 0x786   :  { %7281 = vst [vmem:[#allocation7 + $0x1c8] sm:$0xff] %v7217_v24  ;;  %v7148_v51 = vmul.f32 %v7084_v36, %v15886_v9 }
 0x787   :  { %v11018_v63 = vpop.eup %11017  ;;  %7280 = vst [vmem:[#allocation7 + $0x1c0] sm:$0xff] %v7216_v42  ;;  %v7147_v34 = vmul.f32 %v7083_v61, %v15887_v17 }
 0x788   :  { %v11020_v28 = vpop.eup %11019  ;;  %v7219_v26 = vadd.f32 %v13918_v0, %v7148_v51  ;;  %v7086_v37 = vmul.f32 %v11018_v63, %v13912_v43 }
 0x789   :  { %v7218_v2 = vadd.f32 %v13918_v0, %v7147_v34  ;;  %v7085_v33 = vmul.f32 %v11020_v28, %v13912_v43 }
 0x78a   :  { %7283 = vst [vmem:[#allocation7 + $0x1d8] sm:$0xff] %v7219_v26  ;;  %v7150_v49 = vmul.f32 %v7086_v37, %v15888_v38 }
 0x78b   :  { %v11022_v10 = vpop.eup %11021  ;;  %7282 = vst [vmem:[#allocation7 + $0x1d0] sm:$0xff] %v7218_v2  ;;  %v7149_v32 = vmul.f32 %v7085_v33, %v15889_v56 }
 0x78c   :  { %v11024_v53 = vpop.eup %11023  ;;  %v7221_v22 = vadd.f32 %v13918_v0, %v7150_v49  ;;  %v7088_v41 = vmul.f32 %v11022_v10, %v13912_v43 }
 0x78d   :  { %v7220_v50 = vadd.f32 %v13918_v0, %v7149_v32  ;;  %v7087_v31 = vmul.f32 %v11024_v53, %v13912_v43 }
 0x78e   :  { %7285 = vst [vmem:[#allocation7 + $0x1e8] sm:$0xff] %v7221_v22  ;;  %v7152_v18 = vmul.f32 %v7088_v41, %v15890_v14 }
 0x78f   :  { %7284 = vst [vmem:[#allocation7 + $0x1e0] sm:$0xff] %v7220_v50  ;;  %v7151_v44 = vmul.f32 %v7087_v31, %v15891_v47 }
 0x790   :  { %v7223_v13 = vadd.f32 %v13918_v0, %v7152_v18 }
 0x791   :  { %v7222_v23 = vadd.f32 %v13918_v0, %v7151_v44 }
 0x792   :  { %7287 = vst [vmem:[#allocation7 + $0x1f8] sm:$0xff] %v7223_v13 }
 0x793   :  { %7286 = vst [vmem:[#allocation7 + $0x1f0] sm:$0xff] %v7222_v23 }
 0x794   :  { %11144 = shalt.err (!%p11141_p6)
}
 0x795   :  { %s11145_s20 = scalar_lea.hbm %s14130_s4, 8192 }
 0x796   :  { %p11146_p7 = scmp.ne.s32.totalorder %s14130_s4, %s11145_s20  ;;  %p11149_p8 = scmp.lt.u32.totalorder %s11145_s20, %s14130_s4 }
 0x798   :  { %p11151_p9 = pnand %p11149_p8, %p11146_p7 }
 0x79a   :  { %11154 = shalt.err (!%p11151_p9)
}
 0x79b   :  { %7299 = dma.vmem_to_hbm [thread:$0]  %s7294_s3, 8192, %s14130_s4, [#allocation4], %s11162_s25, %s11162_s25, %s11163_s26  }
 0x79c   :  { %11159 = dma.done.wait [#allocation4], 8192  }
 0x79d   :  { %11160 = vsyncadd [#allocation4], 4294959104 }
 0x79e   :  { %7303 = vsyncpa [#allocation3], 1 }
 0x79f   :  { %7304 = vsyncpa [#allocation6], 1 }
 0x7a0   :  { %7305 = vsyncpa [#allocation4], 1 }

</bundles_post_ra>
